<compile_context>
chip_gen: v6e
topology: v6e:2x2x1
jax: 0.10.0
libtpu: 0.0.40
codegen_flags: <defaults>
</compile_context>

<pallas_src>
import functools

import jax
import jax.numpy as jnp
from jax import lax
from jax.experimental import pallas as pl
from jax.experimental.pallas import tpu as pltpu


# ---------------------------------------------------------------------------
# Flattened-spatial geometry (input fixed at 3x32x32 by the module's 16*5*5
# flatten).  Conv outputs live on the *input-width* row grid:
#   conv1 output (r, c), r,c in [0,28)  ->  lane  n = 32*r + c
#   conv2 output (r, c), r,c in [0,10)  ->  lane  n = 14*r + c
# Lanes with c >= 28 (resp. c >= 10) hold finite garbage that is provably never
# selected by the pooling gathers (asserts below tie the geometry together).
# ---------------------------------------------------------------------------
_C1_LEN = 27 * 32 + 27 + 1     # 892 lanes spanned by conv1's valid outputs
_M1_LEN = 26 * 32 + 26 + 1     # 859 lanes needed after conv1's 2x2 shifted max
_C2_LEN = 9 * 14 + 9 + 1       # 136 lanes spanned by conv2's valid outputs
_M2_LEN = 8 * 14 + 8 + 1       # 121 lanes needed after conv2's 2x2 shifted max
_KPAD = 8                      # conv in-channels padded to 8 sublanes per tap
_KC = 25 * _KPAD               # 200: stacked-tap contraction depth (both convs)

# pool1 source lane t1(p) = 64*(p//14) + 2*(p%14), p in [0,196)
# pool2 source lane t2(p) = 28*(p//5)  + 2*(p%5),  p in [0,25)
assert 64 * 13 + 2 * 13 < _M1_LEN          # largest pool1 source stays in range
assert 28 * 4 + 2 * 4 < _M2_LEN            # largest pool2 source stays in range
assert 2 * 13 + 1 <= 27                    # pool1 windows only touch valid conv1 rows/cols
assert 2 * 4 + 1 <= 9                      # pool2 windows only touch valid conv2 rows/cols


def _lenet_kernel(tb,
                  x_ref, w1s_ref, b1c_ref, w2s_ref, b2c_ref, s1_ref, s2_ref,
                  w1f_ref, bf1_ref, w2f_ref, bf2_ref, w3f_ref, bf3_ref,
                  o_ref,
                  slab1_ref, slab2_ref, m1s_ref, p1s_ref, p2s_ref, flat_ref):
    f32 = jnp.float32
    bf16 = jnp.bfloat16

    # One-time: zero the staging buffer so each sample's 2 spare sublanes
    # (rows 6,7 of every 8-row block) are exact zeros for the whole launch.
    @pl.when(pl.program_id(0) == 0)
    def _init():
        m1s_ref[...] = jnp.zeros_like(m1s_ref)

    # ---- Phase A: conv1 (one K=200 MXU contraction) + ReLU + 2x2 window max ----
    def conv1_body(s, carry):
        xb = x_ref[s]                                     # (8, 1024) bf16, rows 3..7 == 0
        for di in range(5):
            for dj in range(5):
                t = 5 * di + dj
                off = 32 * di + dj
                slab1_ref[8 * t: 8 * t + 8, :] = xb[:, off: off + _C1_LEN]
        a1 = jnp.dot(w1s_ref[...], slab1_ref[...],
                     preferred_element_type=f32)          # (6, 892)
        a1 = jnp.maximum(a1 + b1c_ref[...], 0.0)
        m1 = jnp.maximum(a1[:, 0:_C1_LEN - 1], a1[:, 1:_C1_LEN])       # horiz pairs
        m1 = jnp.maximum(m1[:, 0:_M1_LEN], m1[:, 32:32 + _M1_LEN])     # vert pairs
        r = pl.multiple_of(s * 8, 8)
        m1s_ref[pl.ds(r, 6), :] = m1
        return carry

    lax.fori_loop(0, tb, conv1_body, 0)

    # ---- Phase B: stride-2 pool1 gather, batched over the tile (M = 8*tb) ----
    p1s_ref[...] = jnp.dot(m1s_ref[...].astype(bf16), s1_ref[...],
                           preferred_element_type=f32)    # (8*tb, 196)

    # ---- Phase C: conv2 (K=200) + ReLU + 2x2 max + pool2 gather, per sample ----
    def conv2_body(s, carry):
        r = pl.multiple_of(s * 8, 8)
        p1b = p1s_ref[pl.ds(r, 8), :].astype(bf16)        # (8, 196), rows 6..7 == 0
        for di in range(5):
            for dj in range(5):
                t = 5 * di + dj
                off = 14 * di + dj
                slab2_ref[8 * t: 8 * t + 8, :] = p1b[:, off: off + _C2_LEN]
        a2 = jnp.dot(w2s_ref[...], slab2_ref[...],
                     preferred_element_type=f32)          # (16, 136)
        a2 = jnp.maximum(a2 + b2c_ref[...], 0.0)
        m2 = jnp.maximum(a2[:, 0:_C2_LEN - 1], a2[:, 1:_C2_LEN])
        m2 = jnp.maximum(m2[:, 0:_M2_LEN], m2[:, 14:14 + _M2_LEN])     # (16, 121)
        p2s_ref[s] = jnp.dot(m2.astype(bf16), s2_ref[...],
                             preferred_element_type=f32)  # (16, 25)
        return carry

    lax.fori_loop(0, tb, conv2_body, 0)

    # ---- Phase D: flatten (torch c*25 + h*5 + w order) and batched FC stack ----
    p2 = p2s_ref[...]                                     # (tb, 16, 25) f32
    for c in range(16):
        flat_ref[:, 25 * c: 25 * (c + 1)] = p2[:, c, :]
    flat = flat_ref[...].astype(bf16)                     # (tb, 400)
    h1 = jnp.dot(flat, w1f_ref[...], preferred_element_type=f32) + bf1_ref[...]
    h1 = jnp.maximum(h1, 0.0)
    h2 = jnp.dot(h1.astype(bf16), w2f_ref[...], preferred_element_type=f32) + bf2_ref[...]
    h2 = jnp.maximum(h2, 0.0)
    h3 = jnp.dot(h2.astype(bf16), w3f_ref[...], preferred_element_type=f32) + bf3_ref[...]
    o_ref[0] = h3                                         # (tb, 128) lane-dense store


def _prepare_consts(params):
    """One-time weight repacking (free layout work, done by XLA outside the kernel)."""
    bf16 = jnp.bfloat16
    f32 = jnp.float32

    # Conv weights stacked over taps to match the in-kernel slab layout:
    #   slab row = 8*(5*di + dj) + c   <->   W[o, c, di, dj]   (rows c>=Cin are zero)
    w1p = jnp.zeros((6, 5, 5, _KPAD), f32).at[:, :, :, 0:3].set(
        params["conv1_w"].transpose(0, 2, 3, 1))
    w1s = w1p.reshape(6, _KC).astype(bf16)
    b1c = params["conv1_b"].reshape(6, 1).astype(f32)
    w2p = jnp.zeros((16, 5, 5, _KPAD), f32).at[:, :, :, 0:6].set(
        params["conv2_w"].transpose(0, 2, 3, 1))
    w2s = w2p.reshape(16, _KC).astype(bf16)
    b2c = params["conv2_b"].reshape(16, 1).astype(f32)

    # 0/1 selection matrices: the stride-2 pool "gathers" run on the MXU.
    p1 = jnp.arange(14 * 14)
    t1 = 64 * (p1 // 14) + 2 * (p1 % 14)
    s1 = (jnp.arange(_M1_LEN)[:, None] == t1[None, :]).astype(bf16)    # (859, 196)
    p2 = jnp.arange(5 * 5)
    t2 = 28 * (p2 // 5) + 2 * (p2 % 5)
    s2 = (jnp.arange(_M2_LEN)[:, None] == t2[None, :]).astype(bf16)    # (121, 25)

    w1f = params["fc1_w"].T.astype(bf16)                               # (400, 120)
    bf1 = params["fc1_b"].reshape(1, 120).astype(f32)
    w2f = params["fc2_w"].T.astype(bf16)                               # (120, 84)
    bf2 = params["fc2_b"].reshape(1, 84).astype(f32)
    w3f = jnp.zeros((84, 128), bf16).at[:, :10].set(params["fc3_w"].T.astype(bf16))
    bf3 = jnp.zeros((1, 128), f32).at[0, :10].set(params["fc3_b"])
    return (w1s, b1c, w2s, b2c, s1, s2, w1f, bf1, w2f, bf2, w3f, bf3)


def _const_spec(a):
    zeros = (0,) * a.ndim
    return pl.BlockSpec(a.shape, lambda i, _z=zeros: _z)   # resident in VMEM across the grid


def _pick_tile(b):
    # Large batches: 32 samples/step (~4.5 MB of VMEM, safe on v7x's 64 MiB);
    # medium batches: two grid steps so both v7x TensorCores get work.
    if b >= 64:
        return 32
    if b >= 4:
        return (b + 1) // 2
    return b


def net_forward_pallas(params, x):
    assert x.shape[1:] == (3, 32, 32), "Net hard-codes 3x32x32 inputs (16*5*5 flatten)"
    b = x.shape[0]
    tb = _pick_tile(b)
    nt = pl.cdiv(b, tb)
    bpad = nt * tb

    # Input as (B, 8, 1024) bf16: channels on sublanes 0..2, rows 3..7 zero so the
    # in-kernel tap slabs are tile-aligned; bf16 halves the per-step DMA.
    xf = x.reshape(b, 3, 32 * 32).astype(jnp.bfloat16)
    xprep = jnp.zeros((bpad, _KPAD, 32 * 32), jnp.bfloat16).at[:b, 0:3, :].set(xf)

    consts = _prepare_consts(params)
    kernel = functools.partial(_lenet_kernel, tb)

    grid_spec = pltpu.PrefetchScalarGridSpec(
        num_scalar_prefetch=0,
        grid=(nt,),
        in_specs=[pl.BlockSpec((tb, _KPAD, 32 * 32), lambda i: (i, 0, 0))]
                 + [_const_spec(a) for a in consts],
        out_specs=pl.BlockSpec((1, tb, 128), lambda i: (i, 0, 0)),
        scratch_shapes=[
            pltpu.VMEM((_KC, _C1_LEN), jnp.bfloat16),   # conv1 stacked-tap slab
            pltpu.VMEM((_KC, _C2_LEN), jnp.bfloat16),   # conv2 stacked-tap slab
            pltpu.VMEM((8 * tb, _M1_LEN), jnp.float32),  # conv1 window maxima (all samples)
            pltpu.VMEM((8 * tb, 14 * 14), jnp.float32),  # pool1 (all samples)
            pltpu.VMEM((tb, 16, 25), jnp.float32),       # pool2 (all samples)
            pltpu.VMEM((tb, 400), jnp.float32),          # flattened fc1 input
        ],
    )
    out = pl.pallas_call(
        kernel,
        out_shape=jax.ShapeDtypeStruct((nt, tb, 128), jnp.float32),
        grid_spec=grid_spec,
        compiler_params=pltpu.CompilerParams(
            dimension_semantics=("parallel",)),
    )(xprep, *consts)
    return out.reshape(bpad, 128)[:b, :10]


# ----------------------------- reference & test -----------------------------

def _reference_forward(params, x):
    dn = ("NCHW", "OIHW", "NCHW")
    y = lax.conv_general_dilated(x, params["conv1_w"], (1, 1), "VALID",
                                 dimension_numbers=dn)
    y = jax.nn.relu(y + params["conv1_b"][None, :, None, None])
    y = lax.reduce_window(y, -jnp.inf, lax.max, (1, 1, 2, 2), (1, 1, 2, 2), "VALID")
    y = lax.conv_general_dilated(y, params["conv2_w"], (1, 1), "VALID",
                                 dimension_numbers=dn)
    y = jax.nn.relu(y + params["conv2_b"][None, :, None, None])
    y = lax.reduce_window(y, -jnp.inf, lax.max, (1, 1, 2, 2), (1, 1, 2, 2), "VALID")
    y = y.reshape(y.shape[0], -1)
    y = jax.nn.relu(y @ params["fc1_w"].T + params["fc1_b"])
    y = jax.nn.relu(y @ params["fc2_w"].T + params["fc2_b"])
    return y @ params["fc3_w"].T + params["fc3_b"]


def init_params(key):
    ks = jax.random.split(key, 10)
    s = 0.1
    return {
        "conv1_w": s * jax.random.normal(ks[0], (6, 3, 5, 5), jnp.float32),
        "conv1_b": s * jax.random.normal(ks[1], (6,), jnp.float32),
        "conv2_w": s * jax.random.normal(ks[2], (16, 6, 5, 5), jnp.float32),
        "conv2_b": s * jax.random.normal(ks[3], (16,), jnp.float32),
        "fc1_w": s * jax.random.normal(ks[4], (120, 16 * 5 * 5), jnp.float32),
        "fc1_b": s * jax.random.normal(ks[5], (120,), jnp.float32),
        "fc2_w": s * jax.random.normal(ks[6], (84, 120), jnp.float32),
        "fc2_b": s * jax.random.normal(ks[7], (84,), jnp.float32),
        "fc3_w": s * jax.random.normal(ks[8], (10, 84), jnp.float32),
        "fc3_b": s * jax.random.normal(ks[9], (10,), jnp.float32),
    }


if __name__ == "__main__":
    key = jax.random.PRNGKey(0)
    pkey, xkey = jax.random.split(key)
    params = init_params(pkey)
    x = jax.random.normal(xkey, (4, 3, 32, 32), jnp.float32)   # 2 grid steps of 2 samples

    out = jax.block_until_ready(jax.jit(net_forward_pallas)(params, x))
    assert out.shape == (4, 10) and out.dtype == jnp.float32

    ref = jax.block_until_ready(jax.jit(_reference_forward)(params, x))
    rel_err = float(jnp.max(jnp.abs(out - ref)) / jnp.max(jnp.abs(ref)))
    assert rel_err < 0.1, f"mismatch vs f32 reference: rel_err={rel_err}"
    print("KERNEL_OK")
</pallas_src>

<mosaic_0001>
module attributes {stable_mosaic.version = 11 : i64} {
  func.func @_lenet_kernel(%arg0: i32, %arg1: memref<2x8x1024xbf16, #tpu.memory_space<vmem>>, %arg2: memref<6x200xbf16, #tpu.memory_space<vmem>>, %arg3: memref<6x1xf32, #tpu.memory_space<vmem>>, %arg4: memref<16x200xbf16, #tpu.memory_space<vmem>>, %arg5: memref<16x1xf32, #tpu.memory_space<vmem>>, %arg6: memref<859x196xbf16, #tpu.memory_space<vmem>>, %arg7: memref<121x25xbf16, #tpu.memory_space<vmem>>, %arg8: memref<400x120xbf16, #tpu.memory_space<vmem>>, %arg9: memref<1x120xf32, #tpu.memory_space<vmem>>, %arg10: memref<120x84xbf16, #tpu.memory_space<vmem>>, %arg11: memref<1x84xf32, #tpu.memory_space<vmem>>, %arg12: memref<84x128xbf16, #tpu.memory_space<vmem>>, %arg13: memref<1x128xf32, #tpu.memory_space<vmem>>, %arg14: memref<1x2x128xf32, #tpu.memory_space<vmem>>, %arg15: memref<200x892xbf16, #tpu.memory_space<vmem>>, %arg16: memref<200x136xbf16, #tpu.memory_space<vmem>>, %arg17: memref<16x859xf32, #tpu.memory_space<vmem>>, %arg18: memref<16x196xf32, #tpu.memory_space<vmem>>, %arg19: memref<2x16x25xf32, #tpu.memory_space<vmem>>, %arg20: memref<2x400xf32, #tpu.memory_space<vmem>>) attributes {dimension_semantics = [#tpu.dimension_semantics<parallel>], iteration_bounds = array<i64: 2>, scalar_prefetch = 0 : i64, scratch_operands = 6 : i64, tpu.core_type = #tpu.core_type<tc>, window_params = [{transform_indices = @transform_0, window_bounds = array<i64: 2, 8, 1024>}, {pipeline_mode = #tpu.pipeline_mode<synchronous>, transform_indices = @transform_1, window_bounds = array<i64: 6, 200>}, {pipeline_mode = #tpu.pipeline_mode<synchronous>, transform_indices = @transform_2, window_bounds = array<i64: 6, 1>}, {pipeline_mode = #tpu.pipeline_mode<synchronous>, transform_indices = @transform_3, window_bounds = array<i64: 16, 200>}, {pipeline_mode = #tpu.pipeline_mode<synchronous>, transform_indices = @transform_4, window_bounds = array<i64: 16, 1>}, {pipeline_mode = #tpu.pipeline_mode<synchronous>, transform_indices = @transform_5, window_bounds = array<i64: 859, 196>}, {pipeline_mode = #tpu.pipeline_mode<synchronous>, transform_indices = @transform_6, window_bounds = array<i64: 121, 25>}, {pipeline_mode = #tpu.pipeline_mode<synchronous>, transform_indices = @transform_7, window_bounds = array<i64: 400, 120>}, {pipeline_mode = #tpu.pipeline_mode<synchronous>, transform_indices = @transform_8, window_bounds = array<i64: 1, 120>}, {pipeline_mode = #tpu.pipeline_mode<synchronous>, transform_indices = @transform_9, window_bounds = array<i64: 120, 84>}, {pipeline_mode = #tpu.pipeline_mode<synchronous>, transform_indices = @transform_10, window_bounds = array<i64: 1, 84>}, {pipeline_mode = #tpu.pipeline_mode<synchronous>, transform_indices = @transform_11, window_bounds = array<i64: 84, 128>}, {pipeline_mode = #tpu.pipeline_mode<synchronous>, transform_indices = @transform_12, window_bounds = array<i64: 1, 128>}, {transform_indices = @transform_13, window_bounds = array<i64: 1, 2, 128>}]} {
    %c0_i32 = arith.constant 0 : i32
    %0 = arith.cmpi eq, %arg0, %c0_i32 : i32
    %1 = arith.extui %0 : i1 to i32
    %c0_i32_0 = arith.constant 0 : i32
    %2 = arith.cmpi ne, %1, %c0_i32_0 : i32
    scf.if %2 {
      %cst_54 = arith.constant 0.000000e+00 : f32
      %85 = vector.broadcast %cst_54 : f32 to vector<16x859xf32>
      %c0_55 = arith.constant 0 : index
      %c0_56 = arith.constant 0 : index
      %86 = vector.load %arg17[%c0_55, %c0_56] : memref<16x859xf32, #tpu.memory_space<vmem>>, vector<16x859xf32>
      tpu.vector_store %arg17[%c0_55, %c0_56], %85 {strides = array<i32>} : memref<16x859xf32, #tpu.memory_space<vmem>>, vector<16x859xf32>,
    } else {
    }
    %c0_i32_1 = arith.constant 0 : i32
    %c2_i32 = arith.constant 2 : i32
    %3 = arith.addi %c0_i32_1, %c2_i32 : i32
    %c1_i32 = arith.constant 1 : i32
    scf.for %arg21 = %c0_i32_1 to %3 step %c1_i32  : i32 {
      %85 = arith.index_cast %arg21 : i32 to index
      %c0_54 = arith.constant 0 : index
      %c0_55 = arith.constant 0 : index
      %86 = vector.load %arg1[%85, %c0_54, %c0_55] : memref<2x8x1024xbf16, #tpu.memory_space<vmem>>, vector<1x8x1024xbf16>
      %87 = vector.shape_cast %86 : vector<1x8x1024xbf16> to vector<8x1024xbf16>
      %88 = vector.extract_strided_slice %87 {offsets = [0, 0], sizes = [8, 892], strides = [1, 1]} : vector<8x1024xbf16> to vector<8x892xbf16>
      %c0_56 = arith.constant 0 : index
      %c0_57 = arith.constant 0 : index
      %89 = vector.load %arg15[%c0_56, %c0_57] : memref<200x892xbf16, #tpu.memory_space<vmem>>, vector<8x892xbf16>
      tpu.vector_store %arg15[%c0_56, %c0_57], %88 {strides = array<i32>} : memref<200x892xbf16, #tpu.memory_space<vmem>>, vector<8x892xbf16>,
      %90 = vector.extract_strided_slice %87 {offsets = [0, 1], sizes = [8, 892], strides = [1, 1]} : vector<8x1024xbf16> to vector<8x892xbf16>
      %c8 = arith.constant 8 : index
      %c0_58 = arith.constant 0 : index
      %91 = vector.load %arg15[%c8, %c0_58] : memref<200x892xbf16, #tpu.memory_space<vmem>>, vector<8x892xbf16>
      tpu.vector_store %arg15[%c8, %c0_58], %90 {strides = array<i32>} : memref<200x892xbf16, #tpu.memory_space<vmem>>, vector<8x892xbf16>,
      %92 = vector.extract_strided_slice %87 {offsets = [0, 2], sizes = [8, 892], strides = [1, 1]} : vector<8x1024xbf16> to vector<8x892xbf16>
      %c16 = arith.constant 16 : index
      %c0_59 = arith.constant 0 : index
      %93 = vector.load %arg15[%c16, %c0_59] : memref<200x892xbf16, #tpu.memory_space<vmem>>, vector<8x892xbf16>
      tpu.vector_store %arg15[%c16, %c0_59], %92 {strides = array<i32>} : memref<200x892xbf16, #tpu.memory_space<vmem>>, vector<8x892xbf16>,
      %94 = vector.extract_strided_slice %87 {offsets = [0, 3], sizes = [8, 892], strides = [1, 1]} : vector<8x1024xbf16> to vector<8x892xbf16>
      %c24 = arith.constant 24 : index
      %c0_60 = arith.constant 0 : index
      %95 = vector.load %arg15[%c24, %c0_60] : memref<200x892xbf16, #tpu.memory_space<vmem>>, vector<8x892xbf16>
      tpu.vector_store %arg15[%c24, %c0_60], %94 {strides = array<i32>} : memref<200x892xbf16, #tpu.memory_space<vmem>>, vector<8x892xbf16>,
      %96 = vector.extract_strided_slice %87 {offsets = [0, 4], sizes = [8, 892], strides = [1, 1]} : vector<8x1024xbf16> to vector<8x892xbf16>
      %c32 = arith.constant 32 : index
      %c0_61 = arith.constant 0 : index
      %97 = vector.load %arg15[%c32, %c0_61] : memref<200x892xbf16, #tpu.memory_space<vmem>>, vector<8x892xbf16>
      tpu.vector_store %arg15[%c32, %c0_61], %96 {strides = array<i32>} : memref<200x892xbf16, #tpu.memory_space<vmem>>, vector<8x892xbf16>,
      %98 = vector.extract_strided_slice %87 {offsets = [0, 32], sizes = [8, 892], strides = [1, 1]} : vector<8x1024xbf16> to vector<8x892xbf16>
      %c40 = arith.constant 40 : index
      %c0_62 = arith.constant 0 : index
      %99 = vector.load %arg15[%c40, %c0_62] : memref<200x892xbf16, #tpu.memory_space<vmem>>, vector<8x892xbf16>
      tpu.vector_store %arg15[%c40, %c0_62], %98 {strides = array<i32>} : memref<200x892xbf16, #tpu.memory_space<vmem>>, vector<8x892xbf16>,
      %100 = vector.extract_strided_slice %87 {offsets = [0, 33], sizes = [8, 892], strides = [1, 1]} : vector<8x1024xbf16> to vector<8x892xbf16>
      %c48 = arith.constant 48 : index
      %c0_63 = arith.constant 0 : index
      %101 = vector.load %arg15[%c48, %c0_63] : memref<200x892xbf16, #tpu.memory_space<vmem>>, vector<8x892xbf16>
      tpu.vector_store %arg15[%c48, %c0_63], %100 {strides = array<i32>} : memref<200x892xbf16, #tpu.memory_space<vmem>>, vector<8x892xbf16>,
      %102 = vector.extract_strided_slice %87 {offsets = [0, 34], sizes = [8, 892], strides = [1, 1]} : vector<8x1024xbf16> to vector<8x892xbf16>
      %c56 = arith.constant 56 : index
      %c0_64 = arith.constant 0 : index
      %103 = vector.load %arg15[%c56, %c0_64] : memref<200x892xbf16, #tpu.memory_space<vmem>>, vector<8x892xbf16>
      tpu.vector_store %arg15[%c56, %c0_64], %102 {strides = array<i32>} : memref<200x892xbf16, #tpu.memory_space<vmem>>, vector<8x892xbf16>,
      %104 = vector.extract_strided_slice %87 {offsets = [0, 35], sizes = [8, 892], strides = [1, 1]} : vector<8x1024xbf16> to vector<8x892xbf16>
      %c64 = arith.constant 64 : index
      %c0_65 = arith.constant 0 : index
      %105 = vector.load %arg15[%c64, %c0_65] : memref<200x892xbf16, #tpu.memory_space<vmem>>, vector<8x892xbf16>
      tpu.vector_store %arg15[%c64, %c0_65], %104 {strides = array<i32>} : memref<200x892xbf16, #tpu.memory_space<vmem>>, vector<8x892xbf16>,
      %106 = vector.extract_strided_slice %87 {offsets = [0, 36], sizes = [8, 892], strides = [1, 1]} : vector<8x1024xbf16> to vector<8x892xbf16>
      %c72 = arith.constant 72 : index
      %c0_66 = arith.constant 0 : index
      %107 = vector.load %arg15[%c72, %c0_66] : memref<200x892xbf16, #tpu.memory_space<vmem>>, vector<8x892xbf16>
      tpu.vector_store %arg15[%c72, %c0_66], %106 {strides = array<i32>} : memref<200x892xbf16, #tpu.memory_space<vmem>>, vector<8x892xbf16>,
      %108 = vector.extract_strided_slice %87 {offsets = [0, 64], sizes = [8, 892], strides = [1, 1]} : vector<8x1024xbf16> to vector<8x892xbf16>
      %c80 = arith.constant 80 : index
      %c0_67 = arith.constant 0 : index
      %109 = vector.load %arg15[%c80, %c0_67] : memref<200x892xbf16, #tpu.memory_space<vmem>>, vector<8x892xbf16>
      tpu.vector_store %arg15[%c80, %c0_67], %108 {strides = array<i32>} : memref<200x892xbf16, #tpu.memory_space<vmem>>, vector<8x892xbf16>,
      %110 = vector.extract_strided_slice %87 {offsets = [0, 65], sizes = [8, 892], strides = [1, 1]} : vector<8x1024xbf16> to vector<8x892xbf16>
      %c88 = arith.constant 88 : index
      %c0_68 = arith.constant 0 : index
      %111 = vector.load %arg15[%c88, %c0_68] : memref<200x892xbf16, #tpu.memory_space<vmem>>, vector<8x892xbf16>
      tpu.vector_store %arg15[%c88, %c0_68], %110 {strides = array<i32>} : memref<200x892xbf16, #tpu.memory_space<vmem>>, vector<8x892xbf16>,
      %112 = vector.extract_strided_slice %87 {offsets = [0, 66], sizes = [8, 892], strides = [1, 1]} : vector<8x1024xbf16> to vector<8x892xbf16>
      %c96 = arith.constant 96 : index
      %c0_69 = arith.constant 0 : index
      %113 = vector.load %arg15[%c96, %c0_69] : memref<200x892xbf16, #tpu.memory_space<vmem>>, vector<8x892xbf16>
      tpu.vector_store %arg15[%c96, %c0_69], %112 {strides = array<i32>} : memref<200x892xbf16, #tpu.memory_space<vmem>>, vector<8x892xbf16>,
      %114 = vector.extract_strided_slice %87 {offsets = [0, 67], sizes = [8, 892], strides = [1, 1]} : vector<8x1024xbf16> to vector<8x892xbf16>
      %c104 = arith.constant 104 : index
      %c0_70 = arith.constant 0 : index
      %115 = vector.load %arg15[%c104, %c0_70] : memref<200x892xbf16, #tpu.memory_space<vmem>>, vector<8x892xbf16>
      tpu.vector_store %arg15[%c104, %c0_70], %114 {strides = array<i32>} : memref<200x892xbf16, #tpu.memory_space<vmem>>, vector<8x892xbf16>,
      %116 = vector.extract_strided_slice %87 {offsets = [0, 68], sizes = [8, 892], strides = [1, 1]} : vector<8x1024xbf16> to vector<8x892xbf16>
      %c112 = arith.constant 112 : index
      %c0_71 = arith.constant 0 : index
      %117 = vector.load %arg15[%c112, %c0_71] : memref<200x892xbf16, #tpu.memory_space<vmem>>, vector<8x892xbf16>
      tpu.vector_store %arg15[%c112, %c0_71], %116 {strides = array<i32>} : memref<200x892xbf16, #tpu.memory_space<vmem>>, vector<8x892xbf16>,
      %118 = vector.extract_strided_slice %87 {offsets = [0, 96], sizes = [8, 892], strides = [1, 1]} : vector<8x1024xbf16> to vector<8x892xbf16>
      %c120 = arith.constant 120 : index
      %c0_72 = arith.constant 0 : index
      %119 = vector.load %arg15[%c120, %c0_72] : memref<200x892xbf16, #tpu.memory_space<vmem>>, vector<8x892xbf16>
      tpu.vector_store %arg15[%c120, %c0_72], %118 {strides = array<i32>} : memref<200x892xbf16, #tpu.memory_space<vmem>>, vector<8x892xbf16>,
      %120 = vector.extract_strided_slice %87 {offsets = [0, 97], sizes = [8, 892], strides = [1, 1]} : vector<8x1024xbf16> to vector<8x892xbf16>
      %c128 = arith.constant 128 : index
      %c0_73 = arith.constant 0 : index
      %121 = vector.load %arg15[%c128, %c0_73] : memref<200x892xbf16, #tpu.memory_space<vmem>>, vector<8x892xbf16>
      tpu.vector_store %arg15[%c128, %c0_73], %120 {strides = array<i32>} : memref<200x892xbf16, #tpu.memory_space<vmem>>, vector<8x892xbf16>,
      %122 = vector.extract_strided_slice %87 {offsets = [0, 98], sizes = [8, 892], strides = [1, 1]} : vector<8x1024xbf16> to vector<8x892xbf16>
      %c136 = arith.constant 136 : index
      %c0_74 = arith.constant 0 : index
      %123 = vector.load %arg15[%c136, %c0_74] : memref<200x892xbf16, #tpu.memory_space<vmem>>, vector<8x892xbf16>
      tpu.vector_store %arg15[%c136, %c0_74], %122 {strides = array<i32>} : memref<200x892xbf16, #tpu.memory_space<vmem>>, vector<8x892xbf16>,
      %124 = vector.extract_strided_slice %87 {offsets = [0, 99], sizes = [8, 892], strides = [1, 1]} : vector<8x1024xbf16> to vector<8x892xbf16>
      %c144 = arith.constant 144 : index
      %c0_75 = arith.constant 0 : index
      %125 = vector.load %arg15[%c144, %c0_75] : memref<200x892xbf16, #tpu.memory_space<vmem>>, vector<8x892xbf16>
      tpu.vector_store %arg15[%c144, %c0_75], %124 {strides = array<i32>} : memref<200x892xbf16, #tpu.memory_space<vmem>>, vector<8x892xbf16>,
      %126 = vector.extract_strided_slice %87 {offsets = [0, 100], sizes = [8, 892], strides = [1, 1]} : vector<8x1024xbf16> to vector<8x892xbf16>
      %c152 = arith.constant 152 : index
      %c0_76 = arith.constant 0 : index
      %127 = vector.load %arg15[%c152, %c0_76] : memref<200x892xbf16, #tpu.memory_space<vmem>>, vector<8x892xbf16>
      tpu.vector_store %arg15[%c152, %c0_76], %126 {strides = array<i32>} : memref<200x892xbf16, #tpu.memory_space<vmem>>, vector<8x892xbf16>,
      %128 = vector.extract_strided_slice %87 {offsets = [0, 128], sizes = [8, 892], strides = [1, 1]} : vector<8x1024xbf16> to vector<8x892xbf16>
      %c160 = arith.constant 160 : index
      %c0_77 = arith.constant 0 : index
      %129 = vector.load %arg15[%c160, %c0_77] : memref<200x892xbf16, #tpu.memory_space<vmem>>, vector<8x892xbf16>
      tpu.vector_store %arg15[%c160, %c0_77], %128 {strides = array<i32>} : memref<200x892xbf16, #tpu.memory_space<vmem>>, vector<8x892xbf16>,
      %130 = vector.extract_strided_slice %87 {offsets = [0, 129], sizes = [8, 892], strides = [1, 1]} : vector<8x1024xbf16> to vector<8x892xbf16>
      %c168 = arith.constant 168 : index
      %c0_78 = arith.constant 0 : index
      %131 = vector.load %arg15[%c168, %c0_78] : memref<200x892xbf16, #tpu.memory_space<vmem>>, vector<8x892xbf16>
      tpu.vector_store %arg15[%c168, %c0_78], %130 {strides = array<i32>} : memref<200x892xbf16, #tpu.memory_space<vmem>>, vector<8x892xbf16>,
      %132 = vector.extract_strided_slice %87 {offsets = [0, 130], sizes = [8, 892], strides = [1, 1]} : vector<8x1024xbf16> to vector<8x892xbf16>
      %c176 = arith.constant 176 : index
      %c0_79 = arith.constant 0 : index
      %133 = vector.load %arg15[%c176, %c0_79] : memref<200x892xbf16, #tpu.memory_space<vmem>>, vector<8x892xbf16>
      tpu.vector_store %arg15[%c176, %c0_79], %132 {strides = array<i32>} : memref<200x892xbf16, #tpu.memory_space<vmem>>, vector<8x892xbf16>,
      %134 = vector.extract_strided_slice %87 {offsets = [0, 131], sizes = [8, 892], strides = [1, 1]} : vector<8x1024xbf16> to vector<8x892xbf16>
      %c184 = arith.constant 184 : index
      %c0_80 = arith.constant 0 : index
      %135 = vector.load %arg15[%c184, %c0_80] : memref<200x892xbf16, #tpu.memory_space<vmem>>, vector<8x892xbf16>
      tpu.vector_store %arg15[%c184, %c0_80], %134 {strides = array<i32>} : memref<200x892xbf16, #tpu.memory_space<vmem>>, vector<8x892xbf16>,
      %136 = vector.extract_strided_slice %87 {offsets = [0, 132], sizes = [8, 892], strides = [1, 1]} : vector<8x1024xbf16> to vector<8x892xbf16>
      %c192 = arith.constant 192 : index
      %c0_81 = arith.constant 0 : index
      %137 = vector.load %arg15[%c192, %c0_81] : memref<200x892xbf16, #tpu.memory_space<vmem>>, vector<8x892xbf16>
      tpu.vector_store %arg15[%c192, %c0_81], %136 {strides = array<i32>} : memref<200x892xbf16, #tpu.memory_space<vmem>>, vector<8x892xbf16>,
      %c0_82 = arith.constant 0 : index
      %c0_83 = arith.constant 0 : index
      %138 = vector.load %arg2[%c0_82, %c0_83] : memref<6x200xbf16, #tpu.memory_space<vmem>>, vector<6x200xbf16>
      %c0_84 = arith.constant 0 : index
      %c0_85 = arith.constant 0 : index
      %139 = vector.load %arg15[%c0_84, %c0_85] : memref<200x892xbf16, #tpu.memory_space<vmem>>, vector<200x892xbf16>
      %cst_86 = arith.constant dense<0.000000e+00> : vector<6x892xf32>
      %140 = tpu.matmul %138, %139, %cst_86 {dimension_numbers = #tpu.dot_dimension_numbers<[1], [0], [0], [1], [0, 0, 1, 1], [], []>} : vector<6x200xbf16>, vector<200x892xbf16>, vector<6x892xf32> -> vector<6x892xf32>
      %c0_87 = arith.constant 0 : index
      %c0_88 = arith.constant 0 : index
      %141 = vector.load %arg3[%c0_87, %c0_88] : memref<6x1xf32, #tpu.memory_space<vmem>>, vector<6x1xf32>
      %142 = vector.broadcast %141 : vector<6x1xf32> to vector<6x892xf32>
      %143 = arith.addf %140, %142 : vector<6x892xf32>
      %cst_89 = arith.constant 0.000000e+00 : f32
      %144 = vector.broadcast %cst_89 : f32 to vector<6x892xf32>
      %145 = arith.maximumf %143, %144 : vector<6x892xf32>
      %146 = vector.extract_strided_slice %145 {offsets = [0, 0], sizes = [6, 891], strides = [1, 1]} : vector<6x892xf32> to vector<6x891xf32>
      %147 = vector.extract_strided_slice %145 {offsets = [0, 1], sizes = [6, 891], strides = [1, 1]} : vector<6x892xf32> to vector<6x891xf32>
      %148 = arith.maximumf %146, %147 : vector<6x891xf32>
      %149 = vector.extract_strided_slice %148 {offsets = [0, 0], sizes = [6, 859], strides = [1, 1]} : vector<6x891xf32> to vector<6x859xf32>
      %150 = vector.extract_strided_slice %148 {offsets = [0, 32], sizes = [6, 859], strides = [1, 1]} : vector<6x891xf32> to vector<6x859xf32>
      %151 = arith.maximumf %149, %150 : vector<6x859xf32>
      %c8_i32 = arith.constant 8 : i32
      %152 = arith.muli %arg21, %c8_i32 : i32
      %153 = tpu.assume_multiple %152, 8 : i32
      %154 = arith.index_cast %153 : i32 to index
      %c0_90 = arith.constant 0 : index
      %155 = vector.load %arg17[%154, %c0_90] : memref<16x859xf32, #tpu.memory_space<vmem>>, vector<6x859xf32>
      tpu.vector_store %arg17[%154, %c0_90], %151 {strides = array<i32>} : memref<16x859xf32, #tpu.memory_space<vmem>>, vector<6x859xf32>,
    }
    %c2_i32_2 = arith.constant 2 : i32
    %c0 = arith.constant 0 : index
    %c0_3 = arith.constant 0 : index
    %4 = vector.load %arg17[%c0, %c0_3] : memref<16x859xf32, #tpu.memory_space<vmem>>, vector<16x859xf32>
    %5 = arith.truncf %4 : vector<16x859xf32> to vector<16x859xbf16>
    %c0_4 = arith.constant 0 : index
    %c0_5 = arith.constant 0 : index
    %6 = vector.load %arg6[%c0_4, %c0_5] : memref<859x196xbf16, #tpu.memory_space<vmem>>, vector<859x196xbf16>
    %cst = arith.constant dense<0.000000e+00> : vector<16x196xf32>
    %7 = tpu.matmul %5, %6, %cst {dimension_numbers = #tpu.dot_dimension_numbers<[1], [0], [0], [1], [0, 0, 1, 1], [], []>} : vector<16x859xbf16>, vector<859x196xbf16>, vector<16x196xf32> -> vector<16x196xf32>
    %c0_6 = arith.constant 0 : index
    %c0_7 = arith.constant 0 : index
    %8 = vector.load %arg18[%c0_6, %c0_7] : memref<16x196xf32, #tpu.memory_space<vmem>>, vector<16x196xf32>
    tpu.vector_store %arg18[%c0_6, %c0_7], %7 {strides = array<i32>} : memref<16x196xf32, #tpu.memory_space<vmem>>, vector<16x196xf32>,
    %c0_i32_8 = arith.constant 0 : i32
    %c2_i32_9 = arith.constant 2 : i32
    %9 = arith.addi %c0_i32_8, %c2_i32_9 : i32
    %c1_i32_10 = arith.constant 1 : i32
    scf.for %arg21 = %c0_i32_8 to %9 step %c1_i32_10  : i32 {
      %c8_i32 = arith.constant 8 : i32
      %85 = arith.muli %arg21, %c8_i32 : i32
      %86 = tpu.assume_multiple %85, 8 : i32
      %87 = arith.index_cast %86 : i32 to index
      %c0_54 = arith.constant 0 : index
      %88 = vector.load %arg18[%87, %c0_54] : memref<16x196xf32, #tpu.memory_space<vmem>>, vector<8x196xf32>
      %89 = arith.truncf %88 : vector<8x196xf32> to vector<8x196xbf16>
      %90 = vector.extract_strided_slice %89 {offsets = [0, 0], sizes = [8, 136], strides = [1, 1]} : vector<8x196xbf16> to vector<8x136xbf16>
      %c0_55 = arith.constant 0 : index
      %c0_56 = arith.constant 0 : index
      %91 = vector.load %arg16[%c0_55, %c0_56] : memref<200x136xbf16, #tpu.memory_space<vmem>>, vector<8x136xbf16>
      tpu.vector_store %arg16[%c0_55, %c0_56], %90 {strides = array<i32>} : memref<200x136xbf16, #tpu.memory_space<vmem>>, vector<8x136xbf16>,
      %92 = vector.extract_strided_slice %89 {offsets = [0, 1], sizes = [8, 136], strides = [1, 1]} : vector<8x196xbf16> to vector<8x136xbf16>
      %c8 = arith.constant 8 : index
      %c0_57 = arith.constant 0 : index
      %93 = vector.load %arg16[%c8, %c0_57] : memref<200x136xbf16, #tpu.memory_space<vmem>>, vector<8x136xbf16>
      tpu.vector_store %arg16[%c8, %c0_57], %92 {strides = array<i32>} : memref<200x136xbf16, #tpu.memory_space<vmem>>, vector<8x136xbf16>,
      %94 = vector.extract_strided_slice %89 {offsets = [0, 2], sizes = [8, 136], strides = [1, 1]} : vector<8x196xbf16> to vector<8x136xbf16>
      %c16 = arith.constant 16 : index
      %c0_58 = arith.constant 0 : index
      %95 = vector.load %arg16[%c16, %c0_58] : memref<200x136xbf16, #tpu.memory_space<vmem>>, vector<8x136xbf16>
      tpu.vector_store %arg16[%c16, %c0_58], %94 {strides = array<i32>} : memref<200x136xbf16, #tpu.memory_space<vmem>>, vector<8x136xbf16>,
      %96 = vector.extract_strided_slice %89 {offsets = [0, 3], sizes = [8, 136], strides = [1, 1]} : vector<8x196xbf16> to vector<8x136xbf16>
      %c24 = arith.constant 24 : index
      %c0_59 = arith.constant 0 : index
      %97 = vector.load %arg16[%c24, %c0_59] : memref<200x136xbf16, #tpu.memory_space<vmem>>, vector<8x136xbf16>
      tpu.vector_store %arg16[%c24, %c0_59], %96 {strides = array<i32>} : memref<200x136xbf16, #tpu.memory_space<vmem>>, vector<8x136xbf16>,
      %98 = vector.extract_strided_slice %89 {offsets = [0, 4], sizes = [8, 136], strides = [1, 1]} : vector<8x196xbf16> to vector<8x136xbf16>
      %c32 = arith.constant 32 : index
      %c0_60 = arith.constant 0 : index
      %99 = vector.load %arg16[%c32, %c0_60] : memref<200x136xbf16, #tpu.memory_space<vmem>>, vector<8x136xbf16>
      tpu.vector_store %arg16[%c32, %c0_60], %98 {strides = array<i32>} : memref<200x136xbf16, #tpu.memory_space<vmem>>, vector<8x136xbf16>,
      %100 = vector.extract_strided_slice %89 {offsets = [0, 14], sizes = [8, 136], strides = [1, 1]} : vector<8x196xbf16> to vector<8x136xbf16>
      %c40 = arith.constant 40 : index
      %c0_61 = arith.constant 0 : index
      %101 = vector.load %arg16[%c40, %c0_61] : memref<200x136xbf16, #tpu.memory_space<vmem>>, vector<8x136xbf16>
      tpu.vector_store %arg16[%c40, %c0_61], %100 {strides = array<i32>} : memref<200x136xbf16, #tpu.memory_space<vmem>>, vector<8x136xbf16>,
      %102 = vector.extract_strided_slice %89 {offsets = [0, 15], sizes = [8, 136], strides = [1, 1]} : vector<8x196xbf16> to vector<8x136xbf16>
      %c48 = arith.constant 48 : index
      %c0_62 = arith.constant 0 : index
      %103 = vector.load %arg16[%c48, %c0_62] : memref<200x136xbf16, #tpu.memory_space<vmem>>, vector<8x136xbf16>
      tpu.vector_store %arg16[%c48, %c0_62], %102 {strides = array<i32>} : memref<200x136xbf16, #tpu.memory_space<vmem>>, vector<8x136xbf16>,
      %104 = vector.extract_strided_slice %89 {offsets = [0, 16], sizes = [8, 136], strides = [1, 1]} : vector<8x196xbf16> to vector<8x136xbf16>
      %c56 = arith.constant 56 : index
      %c0_63 = arith.constant 0 : index
      %105 = vector.load %arg16[%c56, %c0_63] : memref<200x136xbf16, #tpu.memory_space<vmem>>, vector<8x136xbf16>
      tpu.vector_store %arg16[%c56, %c0_63], %104 {strides = array<i32>} : memref<200x136xbf16, #tpu.memory_space<vmem>>, vector<8x136xbf16>,
      %106 = vector.extract_strided_slice %89 {offsets = [0, 17], sizes = [8, 136], strides = [1, 1]} : vector<8x196xbf16> to vector<8x136xbf16>
      %c64 = arith.constant 64 : index
      %c0_64 = arith.constant 0 : index
      %107 = vector.load %arg16[%c64, %c0_64] : memref<200x136xbf16, #tpu.memory_space<vmem>>, vector<8x136xbf16>
      tpu.vector_store %arg16[%c64, %c0_64], %106 {strides = array<i32>} : memref<200x136xbf16, #tpu.memory_space<vmem>>, vector<8x136xbf16>,
      %108 = vector.extract_strided_slice %89 {offsets = [0, 18], sizes = [8, 136], strides = [1, 1]} : vector<8x196xbf16> to vector<8x136xbf16>
      %c72 = arith.constant 72 : index
      %c0_65 = arith.constant 0 : index
      %109 = vector.load %arg16[%c72, %c0_65] : memref<200x136xbf16, #tpu.memory_space<vmem>>, vector<8x136xbf16>
      tpu.vector_store %arg16[%c72, %c0_65], %108 {strides = array<i32>} : memref<200x136xbf16, #tpu.memory_space<vmem>>, vector<8x136xbf16>,
      %110 = vector.extract_strided_slice %89 {offsets = [0, 28], sizes = [8, 136], strides = [1, 1]} : vector<8x196xbf16> to vector<8x136xbf16>
      %c80 = arith.constant 80 : index
      %c0_66 = arith.constant 0 : index
      %111 = vector.load %arg16[%c80, %c0_66] : memref<200x136xbf16, #tpu.memory_space<vmem>>, vector<8x136xbf16>
      tpu.vector_store %arg16[%c80, %c0_66], %110 {strides = array<i32>} : memref<200x136xbf16, #tpu.memory_space<vmem>>, vector<8x136xbf16>,
      %112 = vector.extract_strided_slice %89 {offsets = [0, 29], sizes = [8, 136], strides = [1, 1]} : vector<8x196xbf16> to vector<8x136xbf16>
      %c88 = arith.constant 88 : index
      %c0_67 = arith.constant 0 : index
      %113 = vector.load %arg16[%c88, %c0_67] : memref<200x136xbf16, #tpu.memory_space<vmem>>, vector<8x136xbf16>
      tpu.vector_store %arg16[%c88, %c0_67], %112 {strides = array<i32>} : memref<200x136xbf16, #tpu.memory_space<vmem>>, vector<8x136xbf16>,
      %114 = vector.extract_strided_slice %89 {offsets = [0, 30], sizes = [8, 136], strides = [1, 1]} : vector<8x196xbf16> to vector<8x136xbf16>
      %c96 = arith.constant 96 : index
      %c0_68 = arith.constant 0 : index
      %115 = vector.load %arg16[%c96, %c0_68] : memref<200x136xbf16, #tpu.memory_space<vmem>>, vector<8x136xbf16>
      tpu.vector_store %arg16[%c96, %c0_68], %114 {strides = array<i32>} : memref<200x136xbf16, #tpu.memory_space<vmem>>, vector<8x136xbf16>,
      %116 = vector.extract_strided_slice %89 {offsets = [0, 31], sizes = [8, 136], strides = [1, 1]} : vector<8x196xbf16> to vector<8x136xbf16>
      %c104 = arith.constant 104 : index
      %c0_69 = arith.constant 0 : index
      %117 = vector.load %arg16[%c104, %c0_69] : memref<200x136xbf16, #tpu.memory_space<vmem>>, vector<8x136xbf16>
      tpu.vector_store %arg16[%c104, %c0_69], %116 {strides = array<i32>} : memref<200x136xbf16, #tpu.memory_space<vmem>>, vector<8x136xbf16>,
      %118 = vector.extract_strided_slice %89 {offsets = [0, 32], sizes = [8, 136], strides = [1, 1]} : vector<8x196xbf16> to vector<8x136xbf16>
      %c112 = arith.constant 112 : index
      %c0_70 = arith.constant 0 : index
      %119 = vector.load %arg16[%c112, %c0_70] : memref<200x136xbf16, #tpu.memory_space<vmem>>, vector<8x136xbf16>
      tpu.vector_store %arg16[%c112, %c0_70], %118 {strides = array<i32>} : memref<200x136xbf16, #tpu.memory_space<vmem>>, vector<8x136xbf16>,
      %120 = vector.extract_strided_slice %89 {offsets = [0, 42], sizes = [8, 136], strides = [1, 1]} : vector<8x196xbf16> to vector<8x136xbf16>
      %c120 = arith.constant 120 : index
      %c0_71 = arith.constant 0 : index
      %121 = vector.load %arg16[%c120, %c0_71] : memref<200x136xbf16, #tpu.memory_space<vmem>>, vector<8x136xbf16>
      tpu.vector_store %arg16[%c120, %c0_71], %120 {strides = array<i32>} : memref<200x136xbf16, #tpu.memory_space<vmem>>, vector<8x136xbf16>,
      %122 = vector.extract_strided_slice %89 {offsets = [0, 43], sizes = [8, 136], strides = [1, 1]} : vector<8x196xbf16> to vector<8x136xbf16>
      %c128 = arith.constant 128 : index
      %c0_72 = arith.constant 0 : index
      %123 = vector.load %arg16[%c128, %c0_72] : memref<200x136xbf16, #tpu.memory_space<vmem>>, vector<8x136xbf16>
      tpu.vector_store %arg16[%c128, %c0_72], %122 {strides = array<i32>} : memref<200x136xbf16, #tpu.memory_space<vmem>>, vector<8x136xbf16>,
      %124 = vector.extract_strided_slice %89 {offsets = [0, 44], sizes = [8, 136], strides = [1, 1]} : vector<8x196xbf16> to vector<8x136xbf16>
      %c136 = arith.constant 136 : index
      %c0_73 = arith.constant 0 : index
      %125 = vector.load %arg16[%c136, %c0_73] : memref<200x136xbf16, #tpu.memory_space<vmem>>, vector<8x136xbf16>
      tpu.vector_store %arg16[%c136, %c0_73], %124 {strides = array<i32>} : memref<200x136xbf16, #tpu.memory_space<vmem>>, vector<8x136xbf16>,
      %126 = vector.extract_strided_slice %89 {offsets = [0, 45], sizes = [8, 136], strides = [1, 1]} : vector<8x196xbf16> to vector<8x136xbf16>
      %c144 = arith.constant 144 : index
      %c0_74 = arith.constant 0 : index
      %127 = vector.load %arg16[%c144, %c0_74] : memref<200x136xbf16, #tpu.memory_space<vmem>>, vector<8x136xbf16>
      tpu.vector_store %arg16[%c144, %c0_74], %126 {strides = array<i32>} : memref<200x136xbf16, #tpu.memory_space<vmem>>, vector<8x136xbf16>,
      %128 = vector.extract_strided_slice %89 {offsets = [0, 46], sizes = [8, 136], strides = [1, 1]} : vector<8x196xbf16> to vector<8x136xbf16>
      %c152 = arith.constant 152 : index
      %c0_75 = arith.constant 0 : index
      %129 = vector.load %arg16[%c152, %c0_75] : memref<200x136xbf16, #tpu.memory_space<vmem>>, vector<8x136xbf16>
      tpu.vector_store %arg16[%c152, %c0_75], %128 {strides = array<i32>} : memref<200x136xbf16, #tpu.memory_space<vmem>>, vector<8x136xbf16>,
      %130 = vector.extract_strided_slice %89 {offsets = [0, 56], sizes = [8, 136], strides = [1, 1]} : vector<8x196xbf16> to vector<8x136xbf16>
      %c160 = arith.constant 160 : index
      %c0_76 = arith.constant 0 : index
      %131 = vector.load %arg16[%c160, %c0_76] : memref<200x136xbf16, #tpu.memory_space<vmem>>, vector<8x136xbf16>
      tpu.vector_store %arg16[%c160, %c0_76], %130 {strides = array<i32>} : memref<200x136xbf16, #tpu.memory_space<vmem>>, vector<8x136xbf16>,
      %132 = vector.extract_strided_slice %89 {offsets = [0, 57], sizes = [8, 136], strides = [1, 1]} : vector<8x196xbf16> to vector<8x136xbf16>
      %c168 = arith.constant 168 : index
      %c0_77 = arith.constant 0 : index
      %133 = vector.load %arg16[%c168, %c0_77] : memref<200x136xbf16, #tpu.memory_space<vmem>>, vector<8x136xbf16>
      tpu.vector_store %arg16[%c168, %c0_77], %132 {strides = array<i32>} : memref<200x136xbf16, #tpu.memory_space<vmem>>, vector<8x136xbf16>,
      %134 = vector.extract_strided_slice %89 {offsets = [0, 58], sizes = [8, 136], strides = [1, 1]} : vector<8x196xbf16> to vector<8x136xbf16>
      %c176 = arith.constant 176 : index
      %c0_78 = arith.constant 0 : index
      %135 = vector.load %arg16[%c176, %c0_78] : memref<200x136xbf16, #tpu.memory_space<vmem>>, vector<8x136xbf16>
      tpu.vector_store %arg16[%c176, %c0_78], %134 {strides = array<i32>} : memref<200x136xbf16, #tpu.memory_space<vmem>>, vector<8x136xbf16>,
      %136 = vector.extract_strided_slice %89 {offsets = [0, 59], sizes = [8, 136], strides = [1, 1]} : vector<8x196xbf16> to vector<8x136xbf16>
      %c184 = arith.constant 184 : index
      %c0_79 = arith.constant 0 : index
      %137 = vector.load %arg16[%c184, %c0_79] : memref<200x136xbf16, #tpu.memory_space<vmem>>, vector<8x136xbf16>
      tpu.vector_store %arg16[%c184, %c0_79], %136 {strides = array<i32>} : memref<200x136xbf16, #tpu.memory_space<vmem>>, vector<8x136xbf16>,
      %138 = vector.extract_strided_slice %89 {offsets = [0, 60], sizes = [8, 136], strides = [1, 1]} : vector<8x196xbf16> to vector<8x136xbf16>
      %c192 = arith.constant 192 : index
      %c0_80 = arith.constant 0 : index
      %139 = vector.load %arg16[%c192, %c0_80] : memref<200x136xbf16, #tpu.memory_space<vmem>>, vector<8x136xbf16>
      tpu.vector_store %arg16[%c192, %c0_80], %138 {strides = array<i32>} : memref<200x136xbf16, #tpu.memory_space<vmem>>, vector<8x136xbf16>,
      %c0_81 = arith.constant 0 : index
      %c0_82 = arith.constant 0 : index
      %140 = vector.load %arg4[%c0_81, %c0_82] : memref<16x200xbf16, #tpu.memory_space<vmem>>, vector<16x200xbf16>
      %c0_83 = arith.constant 0 : index
      %c0_84 = arith.constant 0 : index
      %141 = vector.load %arg16[%c0_83, %c0_84] : memref<200x136xbf16, #tpu.memory_space<vmem>>, vector<200x136xbf16>
      %cst_85 = arith.constant dense<0.000000e+00> : vector<16x136xf32>
      %142 = tpu.matmul %140, %141, %cst_85 {dimension_numbers = #tpu.dot_dimension_numbers<[1], [0], [0], [1], [0, 0, 1, 1], [], []>} : vector<16x200xbf16>, vector<200x136xbf16>, vector<16x136xf32> -> vector<16x136xf32>
      %c0_86 = arith.constant 0 : index
      %c0_87 = arith.constant 0 : index
      %143 = vector.load %arg5[%c0_86, %c0_87] : memref<16x1xf32, #tpu.memory_space<vmem>>, vector<16x1xf32>
      %144 = vector.broadcast %143 : vector<16x1xf32> to vector<16x136xf32>
      %145 = arith.addf %142, %144 : vector<16x136xf32>
      %cst_88 = arith.constant 0.000000e+00 : f32
      %146 = vector.broadcast %cst_88 : f32 to vector<16x136xf32>
      %147 = arith.maximumf %145, %146 : vector<16x136xf32>
      %148 = vector.extract_strided_slice %147 {offsets = [0, 0], sizes = [16, 135], strides = [1, 1]} : vector<16x136xf32> to vector<16x135xf32>
      %149 = vector.extract_strided_slice %147 {offsets = [0, 1], sizes = [16, 135], strides = [1, 1]} : vector<16x136xf32> to vector<16x135xf32>
      %150 = arith.maximumf %148, %149 : vector<16x135xf32>
      %151 = vector.extract_strided_slice %150 {offsets = [0, 0], sizes = [16, 121], strides = [1, 1]} : vector<16x135xf32> to vector<16x121xf32>
      %152 = vector.extract_strided_slice %150 {offsets = [0, 14], sizes = [16, 121], strides = [1, 1]} : vector<16x135xf32> to vector<16x121xf32>
      %153 = arith.maximumf %151, %152 : vector<16x121xf32>
      %154 = arith.truncf %153 : vector<16x121xf32> to vector<16x121xbf16>
      %c0_89 = arith.constant 0 : index
      %c0_90 = arith.constant 0 : index
      %155 = vector.load %arg7[%c0_89, %c0_90] : memref<121x25xbf16, #tpu.memory_space<vmem>>, vector<121x25xbf16>
      %cst_91 = arith.constant dense<0.000000e+00> : vector<16x25xf32>
      %156 = tpu.matmul %154, %155, %cst_91 {dimension_numbers = #tpu.dot_dimension_numbers<[1], [0], [0], [1], [0, 0, 1, 1], [], []>} : vector<16x121xbf16>, vector<121x25xbf16>, vector<16x25xf32> -> vector<16x25xf32>
      %157 = arith.index_cast %arg21 : i32 to index
      %c0_92 = arith.constant 0 : index
      %c0_93 = arith.constant 0 : index
      %158 = vector.load %arg19[%157, %c0_92, %c0_93] : memref<2x16x25xf32, #tpu.memory_space<vmem>>, vector<1x16x25xf32>
      %159 = vector.shape_cast %158 : vector<1x16x25xf32> to vector<16x25xf32>
      %160 = vector.shape_cast %156 : vector<16x25xf32> to vector<1x16x25xf32>
      tpu.vector_store %arg19[%157, %c0_92, %c0_93], %160 {strides = array<i32>} : memref<2x16x25xf32, #tpu.memory_space<vmem>>, vector<1x16x25xf32>,
    }
    %c2_i32_11 = arith.constant 2 : i32
    %c0_12 = arith.constant 0 : index
    %c0_13 = arith.constant 0 : index
    %c0_14 = arith.constant 0 : index
    %10 = vector.load %arg19[%c0_12, %c0_13, %c0_14] : memref<2x16x25xf32, #tpu.memory_space<vmem>>, vector<2x16x25xf32>
    %11 = vector.extract_strided_slice %10 {offsets = [0, 0, 0], sizes = [2, 1, 25], strides = [1, 1, 1]} : vector<2x16x25xf32> to vector<2x1x25xf32>
    %12 = vector.shape_cast %11 : vector<2x1x25xf32> to vector<2x25xf32>
    %c0_15 = arith.constant 0 : index
    %c0_16 = arith.constant 0 : index
    %13 = vector.load %arg20[%c0_15, %c0_16] : memref<2x400xf32, #tpu.memory_space<vmem>>, vector<2x25xf32>
    tpu.vector_store %arg20[%c0_15, %c0_16], %12 {strides = array<i32>} : memref<2x400xf32, #tpu.memory_space<vmem>>, vector<2x25xf32>,
    %14 = vector.extract_strided_slice %10 {offsets = [0, 1, 0], sizes = [2, 1, 25], strides = [1, 1, 1]} : vector<2x16x25xf32> to vector<2x1x25xf32>
    %15 = vector.shape_cast %14 : vector<2x1x25xf32> to vector<2x25xf32>
    %c0_17 = arith.constant 0 : index
    %c25 = arith.constant 25 : index
    %16 = vector.load %arg20[%c0_17, %c25] : memref<2x400xf32, #tpu.memory_space<vmem>>, vector<2x25xf32>
    tpu.vector_store %arg20[%c0_17, %c25], %15 {strides = array<i32>} : memref<2x400xf32, #tpu.memory_space<vmem>>, vector<2x25xf32>,
    %17 = vector.extract_strided_slice %10 {offsets = [0, 2, 0], sizes = [2, 1, 25], strides = [1, 1, 1]} : vector<2x16x25xf32> to vector<2x1x25xf32>
    %18 = vector.shape_cast %17 : vector<2x1x25xf32> to vector<2x25xf32>
    %c0_18 = arith.constant 0 : index
    %c50 = arith.constant 50 : index
    %19 = vector.load %arg20[%c0_18, %c50] : memref<2x400xf32, #tpu.memory_space<vmem>>, vector<2x25xf32>
    tpu.vector_store %arg20[%c0_18, %c50], %18 {strides = array<i32>} : memref<2x400xf32, #tpu.memory_space<vmem>>, vector<2x25xf32>,
    %20 = vector.extract_strided_slice %10 {offsets = [0, 3, 0], sizes = [2, 1, 25], strides = [1, 1, 1]} : vector<2x16x25xf32> to vector<2x1x25xf32>
    %21 = vector.shape_cast %20 : vector<2x1x25xf32> to vector<2x25xf32>
    %c0_19 = arith.constant 0 : index
    %c75 = arith.constant 75 : index
    %22 = vector.load %arg20[%c0_19, %c75] : memref<2x400xf32, #tpu.memory_space<vmem>>, vector<2x25xf32>
    tpu.vector_store %arg20[%c0_19, %c75], %21 {strides = array<i32>} : memref<2x400xf32, #tpu.memory_space<vmem>>, vector<2x25xf32>,
    %23 = vector.extract_strided_slice %10 {offsets = [0, 4, 0], sizes = [2, 1, 25], strides = [1, 1, 1]} : vector<2x16x25xf32> to vector<2x1x25xf32>
    %24 = vector.shape_cast %23 : vector<2x1x25xf32> to vector<2x25xf32>
    %c0_20 = arith.constant 0 : index
    %c100 = arith.constant 100 : index
    %25 = vector.load %arg20[%c0_20, %c100] : memref<2x400xf32, #tpu.memory_space<vmem>>, vector<2x25xf32>
    tpu.vector_store %arg20[%c0_20, %c100], %24 {strides = array<i32>} : memref<2x400xf32, #tpu.memory_space<vmem>>, vector<2x25xf32>,
    %26 = vector.extract_strided_slice %10 {offsets = [0, 5, 0], sizes = [2, 1, 25], strides = [1, 1, 1]} : vector<2x16x25xf32> to vector<2x1x25xf32>
    %27 = vector.shape_cast %26 : vector<2x1x25xf32> to vector<2x25xf32>
    %c0_21 = arith.constant 0 : index
    %c125 = arith.constant 125 : index
    %28 = vector.load %arg20[%c0_21, %c125] : memref<2x400xf32, #tpu.memory_space<vmem>>, vector<2x25xf32>
    tpu.vector_store %arg20[%c0_21, %c125], %27 {strides = array<i32>} : memref<2x400xf32, #tpu.memory_space<vmem>>, vector<2x25xf32>,
    %29 = vector.extract_strided_slice %10 {offsets = [0, 6, 0], sizes = [2, 1, 25], strides = [1, 1, 1]} : vector<2x16x25xf32> to vector<2x1x25xf32>
    %30 = vector.shape_cast %29 : vector<2x1x25xf32> to vector<2x25xf32>
    %c0_22 = arith.constant 0 : index
    %c150 = arith.constant 150 : index
    %31 = vector.load %arg20[%c0_22, %c150] : memref<2x400xf32, #tpu.memory_space<vmem>>, vector<2x25xf32>
    tpu.vector_store %arg20[%c0_22, %c150], %30 {strides = array<i32>} : memref<2x400xf32, #tpu.memory_space<vmem>>, vector<2x25xf32>,
    %32 = vector.extract_strided_slice %10 {offsets = [0, 7, 0], sizes = [2, 1, 25], strides = [1, 1, 1]} : vector<2x16x25xf32> to vector<2x1x25xf32>
    %33 = vector.shape_cast %32 : vector<2x1x25xf32> to vector<2x25xf32>
    %c0_23 = arith.constant 0 : index
    %c175 = arith.constant 175 : index
    %34 = vector.load %arg20[%c0_23, %c175] : memref<2x400xf32, #tpu.memory_space<vmem>>, vector<2x25xf32>
    tpu.vector_store %arg20[%c0_23, %c175], %33 {strides = array<i32>} : memref<2x400xf32, #tpu.memory_space<vmem>>, vector<2x25xf32>,
    %35 = vector.extract_strided_slice %10 {offsets = [0, 8, 0], sizes = [2, 1, 25], strides = [1, 1, 1]} : vector<2x16x25xf32> to vector<2x1x25xf32>
    %36 = vector.shape_cast %35 : vector<2x1x25xf32> to vector<2x25xf32>
    %c0_24 = arith.constant 0 : index
    %c200 = arith.constant 200 : index
    %37 = vector.load %arg20[%c0_24, %c200] : memref<2x400xf32, #tpu.memory_space<vmem>>, vector<2x25xf32>
    tpu.vector_store %arg20[%c0_24, %c200], %36 {strides = array<i32>} : memref<2x400xf32, #tpu.memory_space<vmem>>, vector<2x25xf32>,
    %38 = vector.extract_strided_slice %10 {offsets = [0, 9, 0], sizes = [2, 1, 25], strides = [1, 1, 1]} : vector<2x16x25xf32> to vector<2x1x25xf32>
    %39 = vector.shape_cast %38 : vector<2x1x25xf32> to vector<2x25xf32>
    %c0_25 = arith.constant 0 : index
    %c225 = arith.constant 225 : index
    %40 = vector.load %arg20[%c0_25, %c225] : memref<2x400xf32, #tpu.memory_space<vmem>>, vector<2x25xf32>
    tpu.vector_store %arg20[%c0_25, %c225], %39 {strides = array<i32>} : memref<2x400xf32, #tpu.memory_space<vmem>>, vector<2x25xf32>,
    %41 = vector.extract_strided_slice %10 {offsets = [0, 10, 0], sizes = [2, 1, 25], strides = [1, 1, 1]} : vector<2x16x25xf32> to vector<2x1x25xf32>
    %42 = vector.shape_cast %41 : vector<2x1x25xf32> to vector<2x25xf32>
    %c0_26 = arith.constant 0 : index
    %c250 = arith.constant 250 : index
    %43 = vector.load %arg20[%c0_26, %c250] : memref<2x400xf32, #tpu.memory_space<vmem>>, vector<2x25xf32>
    tpu.vector_store %arg20[%c0_26, %c250], %42 {strides = array<i32>} : memref<2x400xf32, #tpu.memory_space<vmem>>, vector<2x25xf32>,
    %44 = vector.extract_strided_slice %10 {offsets = [0, 11, 0], sizes = [2, 1, 25], strides = [1, 1, 1]} : vector<2x16x25xf32> to vector<2x1x25xf32>
    %45 = vector.shape_cast %44 : vector<2x1x25xf32> to vector<2x25xf32>
    %c0_27 = arith.constant 0 : index
    %c275 = arith.constant 275 : index
    %46 = vector.load %arg20[%c0_27, %c275] : memref<2x400xf32, #tpu.memory_space<vmem>>, vector<2x25xf32>
    tpu.vector_store %arg20[%c0_27, %c275], %45 {strides = array<i32>} : memref<2x400xf32, #tpu.memory_space<vmem>>, vector<2x25xf32>,
    %47 = vector.extract_strided_slice %10 {offsets = [0, 12, 0], sizes = [2, 1, 25], strides = [1, 1, 1]} : vector<2x16x25xf32> to vector<2x1x25xf32>
    %48 = vector.shape_cast %47 : vector<2x1x25xf32> to vector<2x25xf32>
    %c0_28 = arith.constant 0 : index
    %c300 = arith.constant 300 : index
    %49 = vector.load %arg20[%c0_28, %c300] : memref<2x400xf32, #tpu.memory_space<vmem>>, vector<2x25xf32>
    tpu.vector_store %arg20[%c0_28, %c300], %48 {strides = array<i32>} : memref<2x400xf32, #tpu.memory_space<vmem>>, vector<2x25xf32>,
    %50 = vector.extract_strided_slice %10 {offsets = [0, 13, 0], sizes = [2, 1, 25], strides = [1, 1, 1]} : vector<2x16x25xf32> to vector<2x1x25xf32>
    %51 = vector.shape_cast %50 : vector<2x1x25xf32> to vector<2x25xf32>
    %c0_29 = arith.constant 0 : index
    %c325 = arith.constant 325 : index
    %52 = vector.load %arg20[%c0_29, %c325] : memref<2x400xf32, #tpu.memory_space<vmem>>, vector<2x25xf32>
    tpu.vector_store %arg20[%c0_29, %c325], %51 {strides = array<i32>} : memref<2x400xf32, #tpu.memory_space<vmem>>, vector<2x25xf32>,
    %53 = vector.extract_strided_slice %10 {offsets = [0, 14, 0], sizes = [2, 1, 25], strides = [1, 1, 1]} : vector<2x16x25xf32> to vector<2x1x25xf32>
    %54 = vector.shape_cast %53 : vector<2x1x25xf32> to vector<2x25xf32>
    %c0_30 = arith.constant 0 : index
    %c350 = arith.constant 350 : index
    %55 = vector.load %arg20[%c0_30, %c350] : memref<2x400xf32, #tpu.memory_space<vmem>>, vector<2x25xf32>
    tpu.vector_store %arg20[%c0_30, %c350], %54 {strides = array<i32>} : memref<2x400xf32, #tpu.memory_space<vmem>>, vector<2x25xf32>,
    %56 = vector.extract_strided_slice %10 {offsets = [0, 15, 0], sizes = [2, 1, 25], strides = [1, 1, 1]} : vector<2x16x25xf32> to vector<2x1x25xf32>
    %57 = vector.shape_cast %56 : vector<2x1x25xf32> to vector<2x25xf32>
    %c0_31 = arith.constant 0 : index
    %c375 = arith.constant 375 : index
    %58 = vector.load %arg20[%c0_31, %c375] : memref<2x400xf32, #tpu.memory_space<vmem>>, vector<2x25xf32>
    tpu.vector_store %arg20[%c0_31, %c375], %57 {strides = array<i32>} : memref<2x400xf32, #tpu.memory_space<vmem>>, vector<2x25xf32>,
    %c0_32 = arith.constant 0 : index
    %c0_33 = arith.constant 0 : index
    %59 = vector.load %arg20[%c0_32, %c0_33] : memref<2x400xf32, #tpu.memory_space<vmem>>, vector<2x400xf32>
    %60 = arith.truncf %59 : vector<2x400xf32> to vector<2x400xbf16>
    %c0_34 = arith.constant 0 : index
    %c0_35 = arith.constant 0 : index
    %61 = vector.load %arg8[%c0_34, %c0_35] : memref<400x120xbf16, #tpu.memory_space<vmem>>, vector<400x120xbf16>
    %cst_36 = arith.constant dense<0.000000e+00> : vector<2x120xf32>
    %62 = tpu.matmul %60, %61, %cst_36 {dimension_numbers = #tpu.dot_dimension_numbers<[1], [0], [0], [1], [0, 0, 1, 1], [], []>} : vector<2x400xbf16>, vector<400x120xbf16>, vector<2x120xf32> -> vector<2x120xf32>
    %c0_37 = arith.constant 0 : index
    %c0_38 = arith.constant 0 : index
    %63 = vector.load %arg9[%c0_37, %c0_38] : memref<1x120xf32, #tpu.memory_space<vmem>>, vector<1x120xf32>
    %64 = vector.broadcast %63 : vector<1x120xf32> to vector<2x120xf32>
    %65 = arith.addf %62, %64 : vector<2x120xf32>
    %cst_39 = arith.constant 0.000000e+00 : f32
    %66 = vector.broadcast %cst_39 : f32 to vector<2x120xf32>
    %67 = arith.maximumf %65, %66 : vector<2x120xf32>
    %68 = arith.truncf %67 : vector<2x120xf32> to vector<2x120xbf16>
    %c0_40 = arith.constant 0 : index
    %c0_41 = arith.constant 0 : index
    %69 = vector.load %arg10[%c0_40, %c0_41] : memref<120x84xbf16, #tpu.memory_space<vmem>>, vector<120x84xbf16>
    %cst_42 = arith.constant dense<0.000000e+00> : vector<2x84xf32>
    %70 = tpu.matmul %68, %69, %cst_42 {dimension_numbers = #tpu.dot_dimension_numbers<[1], [0], [0], [1], [0, 0, 1, 1], [], []>} : vector<2x120xbf16>, vector<120x84xbf16>, vector<2x84xf32> -> vector<2x84xf32>
    %c0_43 = arith.constant 0 : index
    %c0_44 = arith.constant 0 : index
    %71 = vector.load %arg11[%c0_43, %c0_44] : memref<1x84xf32, #tpu.memory_space<vmem>>, vector<1x84xf32>
    %72 = vector.broadcast %71 : vector<1x84xf32> to vector<2x84xf32>
    %73 = arith.addf %70, %72 : vector<2x84xf32>
    %cst_45 = arith.constant 0.000000e+00 : f32
    %74 = vector.broadcast %cst_45 : f32 to vector<2x84xf32>
    %75 = arith.maximumf %73, %74 : vector<2x84xf32>
    %76 = arith.truncf %75 : vector<2x84xf32> to vector<2x84xbf16>
    %c0_46 = arith.constant 0 : index
    %c0_47 = arith.constant 0 : index
    %77 = vector.load %arg12[%c0_46, %c0_47] : memref<84x128xbf16, #tpu.memory_space<vmem>>, vector<84x128xbf16>
    %cst_48 = arith.constant dense<0.000000e+00> : vector<2x128xf32>
    %78 = tpu.matmul %76, %77, %cst_48 {dimension_numbers = #tpu.dot_dimension_numbers<[1], [0], [0], [1], [0, 0, 1, 1], [], []>} : vector<2x84xbf16>, vector<84x128xbf16>, vector<2x128xf32> -> vector<2x128xf32>
    %c0_49 = arith.constant 0 : index
    %c0_50 = arith.constant 0 : index
    %79 = vector.load %arg13[%c0_49, %c0_50] : memref<1x128xf32, #tpu.memory_space<vmem>>, vector<1x128xf32>
    %80 = vector.broadcast %79 : vector<1x128xf32> to vector<2x128xf32>
    %81 = arith.addf %78, %80 : vector<2x128xf32>
    %c0_51 = arith.constant 0 : index
    %c0_52 = arith.constant 0 : index
    %c0_53 = arith.constant 0 : index
    %82 = vector.load %arg14[%c0_51, %c0_52, %c0_53] : memref<1x2x128xf32, #tpu.memory_space<vmem>>, vector<1x2x128xf32>
    %83 = vector.shape_cast %82 : vector<1x2x128xf32> to vector<2x128xf32>
    %84 = vector.shape_cast %81 : vector<2x128xf32> to vector<1x2x128xf32>
    tpu.vector_store %arg14[%c0_51, %c0_52, %c0_53], %84 {strides = array<i32>} : memref<1x2x128xf32, #tpu.memory_space<vmem>>, vector<1x2x128xf32>,
    return
  }
  func.func @transform_0(%arg0: i32) -> (i32, i32, i32) {
    %c0_i32 = arith.constant 0 : i32
    %c0_i32_0 = arith.constant 0 : i32
    %c0_i32_1 = arith.constant 0 : i32
    return %arg0, %c0_i32, %c0_i32_0 : i32, i32, i32
  }
  func.func @transform_1(%arg0: i32) -> (i32, i32) {
    %c0_i32 = arith.constant 0 : i32
    %c0_i32_0 = arith.constant 0 : i32
    %c0_i32_1 = arith.constant 0 : i32
    return %c0_i32, %c0_i32_0 : i32, i32
  }
  func.func @transform_2(%arg0: i32) -> (i32, i32) {
    %c0_i32 = arith.constant 0 : i32
    %c0_i32_0 = arith.constant 0 : i32
    %c0_i32_1 = arith.constant 0 : i32
    return %c0_i32, %c0_i32_0 : i32, i32
  }
  func.func @transform_3(%arg0: i32) -> (i32, i32) {
    %c0_i32 = arith.constant 0 : i32
    %c0_i32_0 = arith.constant 0 : i32
    %c0_i32_1 = arith.constant 0 : i32
    return %c0_i32, %c0_i32_0 : i32, i32
  }
  func.func @transform_4(%arg0: i32) -> (i32, i32) {
    %c0_i32 = arith.constant 0 : i32
    %c0_i32_0 = arith.constant 0 : i32
    %c0_i32_1 = arith.constant 0 : i32
    return %c0_i32, %c0_i32_0 : i32, i32
  }
  func.func @transform_5(%arg0: i32) -> (i32, i32) {
    %c0_i32 = arith.constant 0 : i32
    %c0_i32_0 = arith.constant 0 : i32
    %c0_i32_1 = arith.constant 0 : i32
    return %c0_i32, %c0_i32_0 : i32, i32
  }
  func.func @transform_6(%arg0: i32) -> (i32, i32) {
    %c0_i32 = arith.constant 0 : i32
    %c0_i32_0 = arith.constant 0 : i32
    %c0_i32_1 = arith.constant 0 : i32
    return %c0_i32, %c0_i32_0 : i32, i32
  }
  func.func @transform_7(%arg0: i32) -> (i32, i32) {
    %c0_i32 = arith.constant 0 : i32
    %c0_i32_0 = arith.constant 0 : i32
    %c0_i32_1 = arith.constant 0 : i32
    return %c0_i32, %c0_i32_0 : i32, i32
  }
  func.func @transform_8(%arg0: i32) -> (i32, i32) {
    %c0_i32 = arith.constant 0 : i32
    %c0_i32_0 = arith.constant 0 : i32
    %c0_i32_1 = arith.constant 0 : i32
    return %c0_i32, %c0_i32_0 : i32, i32
  }
  func.func @transform_9(%arg0: i32) -> (i32, i32) {
    %c0_i32 = arith.constant 0 : i32
    %c0_i32_0 = arith.constant 0 : i32
    %c0_i32_1 = arith.constant 0 : i32
    return %c0_i32, %c0_i32_0 : i32, i32
  }
  func.func @transform_10(%arg0: i32) -> (i32, i32) {
    %c0_i32 = arith.constant 0 : i32
    %c0_i32_0 = arith.constant 0 : i32
    %c0_i32_1 = arith.constant 0 : i32
    return %c0_i32, %c0_i32_0 : i32, i32
  }
  func.func @transform_11(%arg0: i32) -> (i32, i32) {
    %c0_i32 = arith.constant 0 : i32
    %c0_i32_0 = arith.constant 0 : i32
    %c0_i32_1 = arith.constant 0 : i32
    return %c0_i32, %c0_i32_0 : i32, i32
  }
  func.func @transform_12(%arg0: i32) -> (i32, i32) {
    %c0_i32 = arith.constant 0 : i32
    %c0_i32_0 = arith.constant 0 : i32
    %c0_i32_1 = arith.constant 0 : i32
    return %c0_i32, %c0_i32_0 : i32, i32
  }
  func.func @transform_13(%arg0: i32) -> (i32, i32, i32) {
    %c0_i32 = arith.constant 0 : i32
    %c0_i32_0 = arith.constant 0 : i32
    %c0_i32_1 = arith.constant 0 : i32
    return %arg0, %c0_i32, %c0_i32_0 : i32, i32, i32
  }
}

</mosaic_0001>

<bundles_post_ra>
// kernel: net_forward_pallas.1
= control target key start
LH: loop header
LB: loop body
LE: loop exit
PB: predicated region body
PF: predicated region fallthrough
CT: control target
= control target key end

     0   :  { %s6844_s0 = inlined_call_operand.vmem [shape: bf16[4,8,1024], index: 0, kind: input, shape index: {}]   ;;  %s6845_s1 = inlined_call_operand.vmem [shape: bf16[6,200], index: 1, kind: input, shape index: {}]   ;;  %s6846_s2 = inlined_call_operand.vmem [shape: f32[6,1], index: 2, kind: input, shape index: {}]   ;;  %s6847_s3 = inlined_call_operand.vmem [shape: bf16[16,200], index: 3, kind: input, shape index: {}]   ;;  %s6848_s4 = inlined_call_operand.vmem [shape: f32[16,1], index: 4, kind: input, shape index: {}]   ;;  %s6849_s5 = inlined_call_operand.vmem [shape: bf16[859,196], index: 5, kind: input, shape index: {}]   ;;  %s6850_s6 = inlined_call_operand.vmem [shape: bf16[121,25], index: 6, kind: input, shape index: {}]   ;;  %s6851_s7 = inlined_call_operand.vmem [shape: bf16[400,120], index: 7, kind: input, shape index: {}]   ;;  %s6852_s8 = inlined_call_operand.vmem [shape: f32[1,120], index: 8, kind: input, shape index: {}]   ;;  %s6853_s9 = inlined_call_operand.vmem [shape: bf16[120,84], index: 9, kind: input, shape index: {}]   ;;  %s6854_s10 = inlined_call_operand.vmem [shape: f32[1,84], index: 10, kind: input, shape index: {}]   ;;  %s6855_s11 = inlined_call_operand.vmem [shape: bf16[84,128], index: 11, kind: input, shape index: {}]   ;;  %s6856_s12 = inlined_call_operand.vmem [shape: f32[1,128], index: 12, kind: input, shape index: {}]   ;;  %s6857_s13 = inlined_call_operand.hbm [shape: f32[2,2,128], index: 13, kind: output, shape index: {}]  }
   0x1   :  { %6889 = sst [smem:[#allocation12_spill]] %s6844_s0 }
   0x2   :  { %6890 = sst [smem:[#allocation13_spill]] %s6845_s1 }
   0x3   :  { %6891 = sst [smem:[#allocation14_spill]] %s6846_s2 }
   0x4   :  { %6892 = sst [smem:[#allocation15_spill]] %s6849_s5 }
   0x5   :  { %18 = vsyncpa [#allocation9], 0 }
   0x6   :  { %20 = vsyncpa [#allocation9 + $0x1], 0  ;;  %s5337_s25 = smov 0   ;;  %s5339_s26 = smov 0  }
   0x7   :  { %s5341_s27 = smov 0   ;;  %s5343_s28 = smov 0  }
   0x8 LB: > { %s5358_s29 = sadd.s32 4294967295, %s5187_s28   ;;  %s4288_s30 = sadd.s32 4294967294, %s5187_s28   ;;  %s5187_s28 = sphi %s5343_s28, %s6960_s28   ;;  %s5183_s27 = sphi %s5341_s27, %s6959_s27   ;;  %s5179_s26 = sphi %s5339_s26, %s6958_s26   ;;  %s5175_s25 = sphi %s5337_s25, %s6957_s25  }
   0x9   : > { %s5362_s14 = sadd.s32 1, %s5187_s28   ;;  %s311_s15 = sadd.s32 1, %s5183_s27 }
   0xa   : > { %s308_s16 = ssub.s32 %s5187_s28, %s5362_s14  ;;  %p321_p0 = scmp.ne.s32.totalorder %s5183_s27, %s5179_s26 }
   0xb   : > { %p309_p1 = scmp.eq.s32.totalorder %s308_s16, 0  ;;  %p322_p2 = scmp.eq.s32.totalorder %s5358_s29, 1 }
   0xc   : > { %p327_p3 = scmp.ne.s32.totalorder %s5179_s26, %s5175_s25  ;;  %p328_p4 = scmp.eq.s32.totalorder %s4288_s30, 1 }
   0xd   : > { %s5373_s17 = scalar_select %p309_p1, %s5183_s27, %s311_s15  }
   0xe   : > { %p5375_p5 = por %p322_p2, %p321_p0  ;;  %p5379_p6 = por %p328_p4, %p327_p3 }
   0xf   : > { %6893 = sst [smem:[#allocation11_spill]] %s5373_s17  ;;  %p4291_p7 = scmp.ge.s32.totalorder %s5187_s28, 1 }
  0x10   : > { %p392_p8 = scmp.lt.s32.totalorder %s5187_s28, 3 }
  0x12   : > { %p393_p9 = pnand %p4291_p7, %p392_p8 }
  0x13   : > { %s6858_s20 = sand.u32 (!%p393_p9), 1, %s5179_s26   ;;  %s4293_s21 = sshll.u32 (!%p393_p9), %s5358_s29, 1 }
  0x14   : > { %396 = sbr.rel (%p393_p9) target bundleno = 2687 (0xa7f), region = 72  ;;  %s5389_s22 = sshll.u32 (!%p393_p9), %s6858_s20, 1 }
  0x15   : > { %p438_p10 = scmp.lt.s32.totalorder (!%p393_p9), %s4293_s21, 3  ;;  %s6896_s0 = sld [smem:[#allocation12_spill]] (!%p393_p9) }
  0x16   : > { %p4296_p11 = scmp.ne.s32.totalorder (!%p393_p9), %s5358_s29, 0 }
  0x19   : > { %s6962_s21 = smov (!%p438_p10, %s4293_s21), 3  ;;  %448 = sbr.rel (%p4296_p11) target bundleno = 38 (0x26), region = 76 }
  0x1a   : > { %s4602_s23 = sshll.u32 %s6962_s21, 5 }
  0x1b   : > { %s5394_s15 = scalar_lea.vmem %s6896_s0, %s4602_s23 }
  0x1e   : > { %vm455_vm0 = vcmask 744448   ;;  %v5197_v0 = vmov 0.0  }
  0x1f   : > { %449 = vst [vmem:[#allocation4] sm:$0xff] %v5197_v0  ;;  %450 = vst [vmem:[#allocation4 + $0x8] sm:$0xff] %v5197_v0 }
  0x20   : > { %451 = vst [vmem:[#allocation4 + $0x10] sm:$0xff] %v5197_v0  ;;  %452 = vst [vmem:[#allocation4 + $0x18] sm:$0xff] %v5197_v0 }
  0x21   : > { %453 = vst [vmem:[#allocation4 + $0x20] sm:$0xff] %v5197_v0  ;;  %454 = vst [vmem:[#allocation4 + $0x28] sm:$0xff] %v5197_v0 }
  0x22   : > { %457 = vst [vmem:[#allocation4 + $0x38] sm:$0xff] %v5197_v0  ;;  %458 = vst [vmem:[#allocation4 + $0x40] sm:$0xff] %v5197_v0 }
  0x23   : > { %459 = vst [vmem:[#allocation4 + $0x48] sm:$0xff] %v5197_v0  ;;  %460 = vst [vmem:[#allocation4 + $0x50] sm:$0xff] %v5197_v0 }
  0x24   : > { %461 = vst [vmem:[#allocation4 + $0x58] sm:$0xff] %v5197_v0  ;;  %462 = vst [vmem:[#allocation4 + $0x60] sm:$0xff] %v5197_v0 }
  0x25   : > { %456 = vst.msk [vmem:[#allocation4 + $0x30] sm:$0xff] %vm455_vm0, %v5197_v0  ;;  %463 = vst.msk [vmem:[#allocation4 + $0x68] sm:$0xff] %vm455_vm0, %v5197_v0 }
  0x26 PF: > { %s5398_s21 = smov 0  }
  0x27 LB: >> { %s4603_s23 = sshll.u32 %s5191_s21, 5  ;;  %s6859_s30 = smov 32   ;;  %vm498_vm1 = vcmask 1043456   ;;  %vm480_vm2 = vcmask 1010688   ;;  %vm1637_vm3 = vcmask 588800   ;;  %v5217_v14 = vmov 0   ;;  %s5191_s21 = sphi %s5398_s21, %s469_s21  }
  0x28   : >> { %s5405_s24 = scalar_lea.vmem %s5394_s15, %s4603_s23  ;;  %s6860_s20 = smov 60   ;;  %4834 = vset.pattern.permute.xlu0 %v5217_v14  ;;  %vm888_vm4 = vcmask 261120   ;;  %vm860_vm5 = vcmask 490496   ;;  %vm804_vm6 = vcmask 506880   ;;  %vm832_vm7 = vcmask 498688  }
  0x29   : >> { %v5408_v1 = vld [vmem:[%s5405_s24] sm:$0xff]  ;;  %v5411_v2 = vld [vmem:[%s5405_s24 + $0x8] sm:$0xff]  ;;  %v5414_v3 = vld [vmem:[%s5405_s24 + $0x10] sm:$0xff]  ;;  %s6862_s23 = smov 62   ;;  %s6861_s16 = smov 61   ;;  %vm748_vm8 = vcmask 523264  }
  0x2a   : >> { %875 = vrot.lane.b32.xlu1 %v5408_v1, %s6859_s30  ;;  %847 = vrot.lane.b32.xlu0 %v5408_v1, %s6860_s20  ;;  %479 = vst [vmem:[#allocation2 + $0x10] sm:$0xff] %v5414_v3  ;;  %v1015_v4 = vrot.slane %v5408_v1, 4  ;;  %v1016_v5 = vrot.slane %v5411_v2, 4  ;;  %v1017_v7 = vrot.slane %v5414_v3, 4  ;;  %s5214_s0 = smov 28   ;;  %v5529_v9 = vld [vmem:[%s5405_s24 + $0x18] sm:$0xff] }
  0x2b   : >> { %481 = vst.msk [vmem:[#allocation2 + $0x18] sm:$0xf] %vm480_vm2, %v5529_v9  ;;  %s6897_s1 = sld [smem:[#allocation13_spill]]  ;;  %s5216_s24 = smov 30   ;;  %v1018_v47 = vrot.slane %v5529_v9, 4  ;;  %vm776_vm9 = vcmask 515072  }
  0x2c   : >> { %v5496_v6 = vsel %vm498_vm1, %v1015_v4, %v1016_v5  ;;  %v5506_v8 = vsel %vm498_vm1, %v1016_v5, %v1017_v7  ;;  %vm692_vm10 = vcmask 760832   ;;  %vm720_vm11 = vcmask 752640   ;;  %s6915_s2 = sld [smem:[#allocation14_spill]] }
  0x2d   : >> { %v1021_v49 = vsel %vm498_vm1, %v1017_v7, %v1018_v47  ;;  %1029 = vst.msk [vmem:[#allocation2 + $0x248] sm:$0xf] %vm480_vm2, %v1018_v47  ;;  %vm636_vm12 = vcmask 777216   ;;  %vm664_vm13 = vcmask 769024   ;;  %vm6879_vm14 = vcmask 1014784  }
  0x2e   : >> { %877 = vrot.lane.b32.xlu1 %v5411_v2, %s6859_s30  ;;  %849 = vrot.lane.b32.xlu0 %v5411_v2, %s6860_s20  ;;  %1028 = vst [vmem:[#allocation2 + $0x240] sm:$0xff] %v1021_v49  ;;  %vm6878_vm15 = vcmask 785408   ;;  %vm527_vm0 = vcmask 1031168  }
  0x31   : >> { %v5540_v10 = vld [vmem:[%s6897_s1] sm:$0x77] }
  0x32   : >> { %879 = vrot.lane.b32.xlu1 %v5414_v3, %s6859_s30  ;;  %851 = vrot.lane.b32.xlu0 %v5414_v3, %s6860_s20  ;;  %s6864_s30 = smov 64   ;;  %s6863_s20 = smov 63   ;;  %v5544_v11 = vcombine.high %v5540_v10, %v5540_v10 }
  0x34   : >> { %4393 = vmatprep.mubr.msk.bf16.mxu0 %vm1637_vm3, %v5544_v11  ;;  %4395 = vmatprep.mubr.msk.bf16.mxu1 %vm1637_vm3, %v5544_v11 }
  0x36   : >> { %793 = vrot.lane.b32.xlu1 %v5411_v2, %s6862_s23  ;;  %791 = vrot.lane.b32.xlu0 %v5408_v1, %s6862_s23 }
  0x3a   : >> { %821 = vrot.lane.b32.xlu1 %v5411_v2, %s6861_s16  ;;  %819 = vrot.lane.b32.xlu0 %v5408_v1, %s6861_s16 }
  0x3e   : >> { %823 = vrot.lane.b32.xlu1 %v5414_v3, %s6861_s16  ;;  %795 = vrot.lane.b32.xlu0 %v5414_v3, %s6862_s23  ;;  %s6866_s16 = smov 93   ;;  %s6865_s23 = smov 92  }
  0x42   : >> { %737 = vrot.lane.b32.xlu1 %v5411_v2, %s6864_s30  ;;  %735 = vrot.lane.b32.xlu0 %v5408_v1, %s6864_s30 }
  0x46   : >> { %765 = vrot.lane.b32.xlu1 %v5411_v2, %s6863_s20  ;;  %763 = vrot.lane.b32.xlu0 %v5408_v1, %s6863_s20 }
  0x4a   : >> { %767 = vrot.lane.b32.xlu1 %v5414_v3, %s6863_s20  ;;  %739 = vrot.lane.b32.xlu0 %v5414_v3, %s6864_s30  ;;  %s6868_s20 = smov 95   ;;  %s6867_s30 = smov 94  }
  0x4e   : >> { %681 = vrot.lane.b32.xlu1 %v5411_v2, %s6866_s16  ;;  %679 = vrot.lane.b32.xlu0 %v5408_v1, %s6866_s16 }
  0x52   : >> { %709 = vrot.lane.b32.xlu1 %v5411_v2, %s6865_s23  ;;  %707 = vrot.lane.b32.xlu0 %v5408_v1, %s6865_s23 }
  0x56   : >> { %711 = vrot.lane.b32.xlu1 %v5414_v3, %s6865_s23  ;;  %683 = vrot.lane.b32.xlu0 %v5414_v3, %s6866_s16  ;;  %s6871_s23 = smov 124   ;;  %s6869_s16 = smov 96  }
  0x5a   : >> { %625 = vrot.lane.b32.xlu1 %v5411_v2, %s6868_s20  ;;  %623 = vrot.lane.b32.xlu0 %v5408_v1, %s6868_s20 }
  0x5e   : >> { %653 = vrot.lane.b32.xlu1 %v5411_v2, %s6867_s30  ;;  %651 = vrot.lane.b32.xlu0 %v5408_v1, %s6867_s30 }
  0x62   : >> { %655 = vrot.lane.b32.xlu1 %v5414_v3, %s6867_s30  ;;  %627 = vrot.lane.b32.xlu0 %v5414_v3, %s6868_s20  ;;  %s6875_s30 = smov 126   ;;  %s6872_s20 = smov 125  }
  0x66   : >> { %570 = vrot.lane.b32.xlu1 %v5411_v2, %s6871_s23  ;;  %568 = vrot.lane.b32.xlu0 %v5408_v1, %s6871_s23 }
  0x6a   : >> { %597 = vrot.lane.b32.xlu1 %v5411_v2, %s6869_s16  ;;  %595 = vrot.lane.b32.xlu0 %v5408_v1, %s6869_s16 }
  0x6e   : >> { %599 = vrot.lane.b32.xlu1 %v5414_v3, %s6869_s16  ;;  %572 = vrot.lane.b32.xlu0 %v5414_v3, %s6871_s23  ;;  %s6873_s16 = smov 127   ;;  %s6876_s23 = smov 29  }
  0x72   : >> { %516 = vrot.lane.b32.xlu1 %v5411_v2, %s6875_s30  ;;  %514 = vrot.lane.b32.xlu0 %v5408_v1, %s6875_s30 }
  0x76   : >> { %543 = vrot.lane.b32.xlu1 %v5411_v2, %s6872_s20  ;;  %541 = vrot.lane.b32.xlu0 %v5408_v1, %s6872_s20 }
  0x7a   : >> { %545 = vrot.lane.b32.xlu1 %v5414_v3, %s6872_s20  ;;  %518 = vrot.lane.b32.xlu0 %v5414_v3, %s6875_s30  ;;  %s6877_s20 = smov 31   ;;  %s6899_s30 = smov 62  }
  0x7e   : >> { %488 = vrot.lane.b32.xlu1 %v5411_v2, %s6873_s16  ;;  %486 = vrot.lane.b32.xlu0 %v5408_v1, %s6873_s16 }
  0x82   : >> { %959 = vrot.lane.b32.xlu1 %v5408_v1, %s6876_s23  ;;  %490 = vrot.lane.b32.xlu0 %v5414_v3, %s6873_s16  ;;  %s6898_s16 = smov 60  }
  0x86   : >> { %987 = vrot.lane.b32.xlu1 %v5408_v1, %s5214_s0  ;;  %961 = vrot.lane.b32.xlu0 %v5411_v2, %s6876_s23 }
  0x8a   : >> { %963 = vrot.lane.b32.xlu1 %v5414_v3, %s6876_s23  ;;  %989 = vrot.lane.b32.xlu0 %v5411_v2, %s5214_s0  ;;  %s6900_s23 = smov 32  }
  0x8e   : >> { %903 = vrot.lane.b32.xlu1 %v5408_v1, %s6877_s20  ;;  %991 = vrot.lane.b32.xlu0 %v5414_v3, %s5214_s0 }
  0x92   : >> { %931 = vrot.lane.b32.xlu1 %v5408_v1, %s5216_s24  ;;  %905 = vrot.lane.b32.xlu0 %v5411_v2, %s6877_s20 }
  0x96   : >> { %907 = vrot.lane.b32.xlu1 %v5414_v3, %s6877_s20  ;;  %933 = vrot.lane.b32.xlu0 %v5411_v2, %s5216_s24  ;;  %s6902_s20 = smov 61  }
  0x9a   : >> { %853 = vrot.lane.b32.xlu1 %v5529_v9, %s6898_s16  ;;  %935 = vrot.lane.b32.xlu0 %v5414_v3, %s5216_s24  ;;  %s6901_s16 = smov 64  }
  0x9c   : >> { %v876_v12 = vpop.permute.xlu1 %875  ;;  %v848_v13 = vpop.permute.xlu0 %847 }
  0x9d   : >> { %v883_v15 = vrot.slane %v876_v12, 4  ;;  %v855_v18 = vrot.slane %v848_v13, 4 }
  0x9e   : >> { %797 = vrot.lane.b32.xlu1 %v5529_v9, %s6899_s30  ;;  %881 = vrot.lane.b32.xlu0 %v5529_v9, %s6900_s23  ;;  %s6903_s23 = smov 93   ;;  %s6905_s30 = smov 95  }
  0xa0   : >> { %v878_v16 = vpop.permute.xlu1 %877  ;;  %v850_v17 = vpop.permute.xlu0 %849 }
  0xa1   : >> { %v884_v19 = vrot.slane %v878_v16, 4  ;;  %v856_v20 = vrot.slane %v850_v17, 4 }
  0xa2   : >> { %741 = vrot.lane.b32.xlu1 %v5529_v9, %s6901_s16  ;;  %825 = vrot.lane.b32.xlu0 %v5529_v9, %s6902_s20  ;;  %s6904_s20 = smov 63   ;;  %s6906_s16 = smov 92  }
  0xa3   : >> { %v887_v21 = vsel %vm498_vm1, %v883_v15, %v884_v19  ;;  %v859_v22 = vsel %vm498_vm1, %v855_v18, %v856_v20 }
  0xa4   : >> { %v889_v23 = vsel %vm888_vm4, %v876_v12, %v887_v21  ;;  %v861_v24 = vsel %vm860_vm5, %v848_v13, %v859_v22  ;;  %v5575_v25 = vpop.permute.xlu1 %879  ;;  %v5577_v26 = vpop.permute.xlu0 %851 }
  0xa5   : >> { %v885_v27 = vrot.slane %v5575_v25, 4  ;;  %v857_v28 = vrot.slane %v5577_v26, 4  ;;  %v4351_v29 = vcombine.high %v861_v24, %v889_v23  ;;  %v4350_v30 = vcombine.low %v861_v24, %v889_v23 }
  0xa6   : >> { %685 = vrot.lane.b32.xlu1 %v5529_v9, %s6903_s23  ;;  %769 = vrot.lane.b32.xlu0 %v5529_v9, %s6904_s20  ;;  %s6907_s23 = smov 124   ;;  %s6908_s20 = smov 94  }
  0xa7   : >> { %v890_v31 = vsel %vm498_vm1, %v884_v19, %v885_v27  ;;  %v862_v32 = vsel %vm498_vm1, %v856_v20, %v857_v28  ;;  %1663 = vmatprep.subr.bf16.mxu0 %v4351_v29 }
  0xa8   : >> { %v891_v33 = vsel %vm888_vm4, %v878_v16, %v890_v31  ;;  %v863_v34 = vsel %vm860_vm5, %v850_v17, %v862_v32  ;;  %v794_v35 = vpop.permute.xlu1 %793  ;;  %v792_v36 = vpop.permute.xlu0 %791  ;;  %1664 = vmatpush1.bf16.msra.mxu0 %v4350_v30 }
  0xa9   : >> { %v800_v37 = vrot.slane %v794_v35, 4  ;;  %v799_v38 = vrot.slane %v792_v36, 4  ;;  %v4353_v39 = vcombine.high %v863_v34, %v891_v33  ;;  %v4352_v40 = vcombine.low %v863_v34, %v891_v33 }
  0xaa   : >> { %629 = vrot.lane.b32.xlu1 %v5529_v9, %s6905_s30  ;;  %713 = vrot.lane.b32.xlu0 %v5529_v9, %s6906_s16  ;;  %s6909_s30 = smov 126   ;;  %s6910_s16 = smov 96  }
  0xab   : >> { %v803_v41 = vsel %vm498_vm1, %v799_v38, %v800_v37  ;;  %1704 = vmatprep.subr.bf16.mxu1 %v4353_v39 }
  0xac   : >> { %v805_v42 = vsel %vm804_vm6, %v792_v36, %v803_v41  ;;  %v822_v43 = vpop.permute.xlu1 %821  ;;  %v820_v44 = vpop.permute.xlu0 %819  ;;  %1705 = vmatpush1.bf16.msra.mxu1 %v4352_v40 }
  0xad   : >> { %v828_v45 = vrot.slane %v822_v43, 4  ;;  %v827_v46 = vrot.slane %v820_v44, 4 }
  0xae   : >> { %574 = vrot.lane.b32.xlu1 %v5529_v9, %s6907_s23  ;;  %657 = vrot.lane.b32.xlu0 %v5529_v9, %s6908_s20  ;;  %s6911_s23 = smov 127   ;;  %s6912_s20 = smov 125  }
  0xaf   : >> { %v831_v48 = vsel %vm498_vm1, %v827_v46, %v828_v45 }
  0xb0   : >> { %v833_v50 = vsel %vm832_vm7, %v820_v44, %v831_v48  ;;  %v5610_v51 = vpop.permute.xlu1 %823  ;;  %v5612_v52 = vpop.permute.xlu0 %795 }
  0xb1   : >> { %v829_v53 = vrot.slane %v5610_v51, 4  ;;  %v801_v54 = vrot.slane %v5612_v52, 4  ;;  %v4344_v55 = vcombine.high %v805_v42, %v833_v50  ;;  %v4343_v56 = vcombine.low %v805_v42, %v833_v50 }
  0xb2   : >> { %520 = vrot.lane.b32.xlu1 %v5529_v9, %s6909_s30  ;;  %601 = vrot.lane.b32.xlu0 %v5529_v9, %s6910_s16  ;;  %s6913_s30 = smov 29  }
  0xb3   : >> { %v834_v57 = vsel %vm498_vm1, %v828_v45, %v829_v53  ;;  %v806_v58 = vsel %vm498_vm1, %v800_v37, %v801_v54  ;;  %1665 = vmatprep.subr.bf16.mxu0 %v4344_v55 }
  0xb4   : >> { %v835_v59 = vsel %vm832_vm7, %v822_v43, %v834_v57  ;;  %v807_v60 = vsel %vm804_vm6, %v794_v35, %v806_v58  ;;  %v738_v61 = vpop.permute.xlu1 %737  ;;  %v736_v62 = vpop.permute.xlu0 %735  ;;  %1666 = vmatpush1.bf16.msra.mxu0 %v4343_v56 }
  0xb5   : >> { %v744_v63 = vrot.slane %v738_v61, 4  ;;  %v743_v0 = vrot.slane %v736_v62, 4  ;;  %v4346_v3 = vcombine.high %v807_v60, %v835_v59  ;;  %v4345_v4 = vcombine.low %v807_v60, %v835_v59 }
  0xb6   : >> { %492 = vrot.lane.b32.xlu1 %v5529_v9, %s6911_s23  ;;  %547 = vrot.lane.b32.xlu0 %v5529_v9, %s6912_s20 }
  0xb7   : >> { %v747_v5 = vsel %vm498_vm1, %v743_v0, %v744_v63  ;;  %1706 = vmatprep.subr.bf16.mxu1 %v4346_v3 }
  0xb8   : >> { %v749_v7 = vsel %vm748_vm8, %v736_v62, %v747_v5  ;;  %v766_v12 = vpop.permute.xlu1 %765  ;;  %v764_v13 = vpop.permute.xlu0 %763  ;;  %1707 = vmatpush1.bf16.msra.mxu1 %v4345_v4 }
  0xb9   : >> { %v772_v15 = vrot.slane %v766_v12, 4  ;;  %v771_v16 = vrot.slane %v764_v13, 4 }
  0xba   : >> { %993 = vrot.lane.b32.xlu1 %v5529_v9, %s5214_s0  ;;  %965 = vrot.lane.b32.xlu0 %v5529_v9, %s6913_s30  ;;  %s6914_s0 = smov 31  }
  0xbb   : >> { %v775_v17 = vsel %vm498_vm1, %v771_v16, %v772_v15 }
  0xbc   : >> { %v777_v18 = vsel %vm776_vm9, %v764_v13, %v775_v17  ;;  %v5640_v19 = vpop.permute.xlu1 %767  ;;  %v5642_v20 = vpop.permute.xlu0 %739  ;;  %v1175_v13 = vld [vmem:[%s6915_s2] sm:$0x3f] }
  0xbd   : >> { %v773_v21 = vrot.slane %v5640_v19, 4  ;;  %v745_v22 = vrot.slane %v5642_v20, 4  ;;  %v4337_v23 = vcombine.high %v749_v7, %v777_v18  ;;  %v4336_v24 = vcombine.low %v749_v7, %v777_v18 }
  0xbe   : >> { %937 = vrot.lane.b32.xlu1 %v5529_v9, %s5216_s24  ;;  %909 = vrot.lane.b32.xlu0 %v5529_v9, %s6914_s0 }
  0xbf   : >> { %v778_v29 = vsel %vm498_vm1, %v772_v15, %v773_v21  ;;  %v750_v30 = vsel %vm498_vm1, %v744_v63, %v745_v22  ;;  %1667 = vmatprep.subr.bf16.mxu0 %v4337_v23 }
  0xc0   : >> { %v779_v31 = vsel %vm776_vm9, %v766_v12, %v778_v29  ;;  %v751_v32 = vsel %vm748_vm8, %v738_v61, %v750_v30  ;;  %v682_v33 = vpop.permute.xlu1 %681  ;;  %v680_v34 = vpop.permute.xlu0 %679  ;;  %1668 = vmatpush1.bf16.msra.mxu0 %v4336_v24 }
  0xc1   : >> { %v688_v35 = vrot.slane %v682_v33, 4  ;;  %v687_v36 = vrot.slane %v680_v34, 4  ;;  %v4339_v9 = vcombine.high %v751_v32, %v779_v31  ;;  %v4338_v37 = vcombine.low %v751_v32, %v779_v31 }
  0xc2   : >> { %1178 = vperm.xlu0 %4834, %v1175_v13  }
  0xc3   : >> { %v691_v38 = vsel %vm498_vm1, %v687_v36, %v688_v35  ;;  %1708 = vmatprep.subr.bf16.mxu1 %v4339_v9 }
  0xc4   : >> { %v693_v39 = vsel %vm692_vm10, %v680_v34, %v691_v38  ;;  %v710_v40 = vpop.permute.xlu1 %709  ;;  %v708_v41 = vpop.permute.xlu0 %707  ;;  %1709 = vmatpush1.bf16.msra.mxu1 %v4338_v37 }
  0xc5   : >> { %v716_v42 = vrot.slane %v710_v40, 4  ;;  %v715_v43 = vrot.slane %v708_v41, 4 }
  0xc7   : >> { %v719_v44 = vsel %vm498_vm1, %v715_v43, %v716_v42 }
  0xc8   : >> { %v721_v45 = vsel %vm720_vm11, %v708_v41, %v719_v44  ;;  %v5662_v46 = vpop.permute.xlu1 %711  ;;  %v5664_v47 = vpop.permute.xlu0 %683 }
  0xc9   : >> { %v717_v48 = vrot.slane %v5662_v46, 4  ;;  %v689_v49 = vrot.slane %v5664_v47, 4  ;;  %v4330_v50 = vcombine.high %v693_v39, %v721_v45  ;;  %v4329_v55 = vcombine.low %v693_v39, %v721_v45 }
  0xcb   : >> { %v722_v56 = vsel %vm498_vm1, %v716_v42, %v717_v48  ;;  %v694_v57 = vsel %vm498_vm1, %v688_v35, %v689_v49  ;;  %1669 = vmatprep.subr.bf16.mxu0 %v4330_v50 }
  0xcc   : >> { %v723_v58 = vsel %vm720_vm11, %v710_v40, %v722_v56  ;;  %v695_v59 = vsel %vm692_vm10, %v682_v33, %v694_v57  ;;  %v626_v60 = vpop.permute.xlu1 %625  ;;  %v624_v61 = vpop.permute.xlu0 %623  ;;  %1670 = vmatpush1.bf16.msra.mxu0 %v4329_v55 }
  0xcd   : >> { %v632_v62 = vrot.slane %v626_v60, 4  ;;  %v631_v63 = vrot.slane %v624_v61, 4  ;;  %v4332_v0 = vcombine.high %v695_v59, %v723_v58  ;;  %v4331_v3 = vcombine.low %v695_v59, %v723_v58 }
  0xcf   : >> { %v635_v4 = vsel %vm498_vm1, %v631_v63, %v632_v62  ;;  %1710 = vmatprep.subr.bf16.mxu1 %v4332_v0 }
  0xd0   : >> { %v637_v5 = vsel %vm636_vm12, %v624_v61, %v635_v4  ;;  %v654_v7 = vpop.permute.xlu1 %653  ;;  %v652_v12 = vpop.permute.xlu0 %651  ;;  %1711 = vmatpush1.bf16.msra.mxu1 %v4331_v3 }
  0xd1   : >> { %v660_v15 = vrot.slane %v654_v7, 4  ;;  %v659_v16 = vrot.slane %v652_v12, 4 }
  0xd3   : >> { %v663_v17 = vsel %vm498_vm1, %v659_v16, %v660_v15 }
  0xd4   : >> { %v665_v18 = vsel %vm664_vm13, %v652_v12, %v663_v17  ;;  %v5683_v23 = vpop.permute.xlu1 %655  ;;  %v5685_v24 = vpop.permute.xlu0 %627 }
  0xd5   : >> { %v661_v29 = vrot.slane %v5683_v23, 4  ;;  %v633_v30 = vrot.slane %v5685_v24, 4  ;;  %v4323_v31 = vcombine.high %v637_v5, %v665_v18  ;;  %v4322_v32 = vcombine.low %v637_v5, %v665_v18 }
  0xd7   : >> { %v666_v33 = vsel %vm498_vm1, %v660_v15, %v661_v29  ;;  %v638_v34 = vsel %vm498_vm1, %v632_v62, %v633_v30  ;;  %1671 = vmatprep.subr.bf16.mxu0 %v4323_v31 }
  0xd8   : >> { %v667_v35 = vsel %vm664_vm13, %v654_v7, %v666_v33  ;;  %v639_v36 = vsel %vm636_vm12, %v626_v60, %v638_v34  ;;  %v571_v9 = vpop.permute.xlu1 %570  ;;  %v569_v37 = vpop.permute.xlu0 %568  ;;  %1672 = vmatpush1.bf16.msra.mxu0 %v4322_v32 }
  0xd9   : >> { %v577_v38 = vrot.slane %v571_v9, 4  ;;  %v576_v39 = vrot.slane %v569_v37, 4  ;;  %v4325_v40 = vcombine.high %v639_v36, %v667_v35  ;;  %v4324_v41 = vcombine.low %v639_v36, %v667_v35 }
  0xdb   : >> { %v580_v42 = vsel %vm498_vm1, %v576_v39, %v577_v38  ;;  %1712 = vmatprep.subr.bf16.mxu1 %v4325_v40 }
  0xdc   : >> { %v582_v43 = vsel %vm6879_vm14, %v569_v37, %v580_v42  ;;  %v5700_v44 = vsel %vm6879_vm14, %v580_v42, %v571_v9  ;;  %v598_v45 = vpop.permute.xlu1 %597  ;;  %v596_v50 = vpop.permute.xlu0 %595  ;;  %1713 = vmatpush1.bf16.msra.mxu1 %v4324_v41 }
  0xdd   : >> { %v604_v55 = vrot.slane %v598_v45, 4  ;;  %v603_v56 = vrot.slane %v596_v50, 4 }
  0xdf   : >> { %v607_v57 = vsel %vm498_vm1, %v603_v56, %v604_v55 }
  0xe0   : >> { %v609_v58 = vsel %vm6878_vm15, %v596_v50, %v607_v57  ;;  %v5704_v59 = vpop.permute.xlu1 %599  ;;  %v5706_v60 = vpop.permute.xlu0 %572 }
  0xe1   : >> { %v605_v61 = vrot.slane %v5704_v59, 4  ;;  %v578_v62 = vrot.slane %v5706_v60, 4  ;;  %v4316_v63 = vcombine.high %v582_v43, %v609_v58  ;;  %v4315_v0 = vcombine.low %v582_v43, %v609_v58 }
  0xe3   : >> { %v610_v3 = vsel %vm498_vm1, %v604_v55, %v605_v61  ;;  %v583_v4 = vsel %vm498_vm1, %v577_v38, %v578_v62  ;;  %1673 = vmatprep.subr.bf16.mxu0 %v4316_v63 }
  0xe4   : >> { %v611_v5 = vsel %vm6878_vm15, %v598_v45, %v610_v3  ;;  %v584_v7 = vsel %vm6879_vm14, %v571_v9, %v583_v4  ;;  %v5720_v12 = vsel %vm6879_vm14, %v583_v4, %v5706_v60  ;;  %v517_v13 = vpop.permute.xlu1 %516  ;;  %v515_v15 = vpop.permute.xlu0 %514  ;;  %1674 = vmatpush1.bf16.msra.mxu0 %v4315_v0  ;;  %vm6880_vm15 = vcmask 1022976  }
  0xe5   : >> { %v523_v16 = vrot.slane %v517_v13, 4  ;;  %v522_v17 = vrot.slane %v515_v15, 4  ;;  %v4318_v18 = vcombine.high %v584_v7, %v611_v5  ;;  %v4317_v31 = vcombine.low %v584_v7, %v611_v5 }
  0xe6   : >> { %vm6881_vm14 = vcmask 1039360  }
  0xe7   : >> { %v526_v32 = vsel %vm498_vm1, %v522_v17, %v523_v16  ;;  %1714 = vmatprep.subr.bf16.mxu1 %v4318_v18 }
  0xe8   : >> { %v528_v33 = vsel %vm527_vm0, %v515_v15, %v526_v32  ;;  %v5725_v34 = vsel %vm527_vm0, %v526_v32, %v517_v13  ;;  %v544_v35 = vpop.permute.xlu1 %543  ;;  %v542_v36 = vpop.permute.xlu0 %541  ;;  %1715 = vmatpush1.bf16.msra.mxu1 %v4317_v31 }
  0xe9   : >> { %v550_v9 = vrot.slane %v544_v35, 4  ;;  %v549_v37 = vrot.slane %v542_v36, 4 }
  0xeb   : >> { %v553_v38 = vsel %vm498_vm1, %v549_v37, %v550_v9  ;;  %v4385_v37 = vcombine.low %v5700_v44, %v5700_v44 }
  0xec   : >> { %v555_v39 = vsel %vm6880_vm15, %v542_v36, %v553_v38  ;;  %v5730_v40 = vsel %vm6880_vm15, %v553_v38, %v544_v35  ;;  %v5732_v41 = vpop.permute.xlu1 %545  ;;  %v5734_v42 = vpop.permute.xlu0 %518 }
  0xed   : >> { %v551_v43 = vrot.slane %v5732_v41, 4  ;;  %v524_v45 = vrot.slane %v5734_v42, 4  ;;  %v4309_v50 = vcombine.high %v528_v33, %v555_v39  ;;  %v4308_v55 = vcombine.low %v528_v33, %v555_v39 }
  0xef   : >> { %v556_v56 = vsel %vm498_vm1, %v550_v9, %v551_v43  ;;  %v529_v57 = vsel %vm498_vm1, %v523_v16, %v524_v45  ;;  %1675 = vmatprep.subr.bf16.mxu0 %v4309_v50  ;;  %v4386_v50 = vcombine.high %v5700_v44, %v5700_v44  ;;  %v4387_v44 = vcombine.low %v5720_v12, %v5720_v12 }
  0xf0   : >> { %v557_v58 = vsel %vm6880_vm15, %v544_v35, %v556_v56  ;;  %v5747_v63 = vsel %vm6880_vm15, %v556_v56, %v5732_v41  ;;  %v530_v0 = vsel %vm527_vm0, %v517_v13, %v529_v57  ;;  %v5752_v3 = vsel %vm527_vm0, %v529_v57, %v5734_v42  ;;  %v489_v4 = vpop.permute.xlu1 %488  ;;  %v487_v5 = vpop.permute.xlu0 %486  ;;  %1676 = vmatpush1.bf16.msra.mxu0 %v4308_v55 }
  0xf1   : >> { %v495_v7 = vrot.slane %v489_v4, 4  ;;  %v494_v15 = vrot.slane %v487_v5, 4  ;;  %v4311_v16 = vcombine.high %v530_v0, %v557_v58  ;;  %v4310_v17 = vcombine.low %v530_v0, %v557_v58 }
  0xf2   : >> { %vm6882_vm15 = vcmask 236544  }
  0xf3   : >> { %v499_v18 = vsel %vm498_vm1, %v494_v15, %v495_v7  ;;  %1716 = vmatprep.subr.bf16.mxu1 %v4311_v16  ;;  %v4379_v16 = vcombine.high %v5725_v34, %v5730_v40 }
  0xf4   : >> { %v501_v31 = vsel %vm6881_vm14, %v487_v5, %v499_v18  ;;  %v5757_v32 = vsel %vm6881_vm14, %v499_v18, %v489_v4  ;;  %v960_v13 = vpop.permute.xlu1 %959  ;;  %v5759_v33 = vpop.permute.xlu0 %490  ;;  %1717 = vmatpush1.bf16.msra.mxu1 %v4310_v17  ;;  %v4388_v17 = vcombine.high %v5720_v12, %v5720_v12 }
  0xf5   : >> { %v496_v35 = vrot.slane %v5759_v33, 4  ;;  %v4302_v36 = vcombine.high %v5408_v1, %v501_v31  ;;  %v4301_v9 = vcombine.low %v5408_v1, %v501_v31  ;;  %v967_v38 = vrot.slane %v960_v13, 4 }
  0xf7   : >> { %v502_v39 = vsel %vm498_vm1, %v495_v7, %v496_v35  ;;  %1677 = vmatprep.subr.bf16.mxu0 %v4302_v36  ;;  %v1643_v7 = vsel %vm498_vm1, %v4385_v37, 0  ;;  %v1649_v37 = vsel %vm498_vm1, %v4387_v44, 0 }
  0xf8   : >> { %v503_v55 = vsel %vm6881_vm14, %v489_v4, %v502_v39  ;;  %v5774_v56 = vsel %vm6881_vm14, %v502_v39, %v5759_v33  ;;  %v988_v57 = vpop.permute.xlu1 %987  ;;  %v962_v1 = vpop.permute.xlu0 %961  ;;  %1678 = vmatpush1.bf16.msra.mxu0 %v4301_v9  ;;  %vm6883_vm14 = vcmask 228352   ;;  %v4372_v39 = vcombine.high %v5496_v6, %v5757_v32 }
  0xf9   : >> { %v968_v58 = vrot.slane %v962_v1, 4  ;;  %4392 = vmatprep.subr.msk.bf16.mxu0 %vm498_vm1, %v4386_v50  ;;  %v4304_v0 = vcombine.high %v5411_v2, %v503_v55  ;;  %v4303_v5 = vcombine.low %v5411_v2, %v503_v55  ;;  %v995_v4 = vrot.slane %v988_v57, 4 }
  0xfa   : >> { %v4381_v50 = vcombine.high %v5752_v3, %v5747_v63 }
  0xfb   : >> { %v971_v15 = vsel %vm498_vm1, %v967_v38, %v968_v58  ;;  %1718 = vmatprep.subr.bf16.mxu1 %v4304_v0  ;;  %v4378_v38 = vcombine.low %v5725_v34, %v5730_v40  ;;  %v4380_v40 = vcombine.low %v5752_v3, %v5747_v63 }
  0xfc   : >> { %v973_v18 = vsel %vm6882_vm15, %v960_v13, %v971_v15  ;;  %v5788_v31 = vpop.permute.xlu1 %963  ;;  %v990_v2 = vpop.permute.xlu0 %989  ;;  %1719 = vmatpush1.bf16.msra.mxu1 %v4303_v5  ;;  %1686 = vmatpush2.bf16.msra.mxu0 %v1643_v7 }
  0xfd   : >> { %v969_v36 = vrot.slane %v5788_v31, 4  ;;  %v996_v9 = vrot.slane %v990_v2, 4  ;;  %1687 = vmatprep.subr.bf16.mxu0 %v4379_v16  ;;  %4394 = vmatprep.subr.msk.bf16.mxu1 %vm498_vm1, %v4388_v17 }
  0xff   : >> { %v974_v12 = vsel %vm498_vm1, %v968_v58, %v969_v36  ;;  %v999_v13 = vsel %vm498_vm1, %v995_v4, %v996_v9  ;;  %v4371_v58 = vcombine.low %v5496_v6, %v5757_v32  ;;  %v4374_v4 = vcombine.high %v5506_v8, %v5774_v56 }
 0x100   : >> { %v975_v55 = vsel %vm6882_vm15, %v962_v1, %v974_v12  ;;  %v1001_v0 = vsel %vm6883_vm14, %v988_v57, %v999_v13  ;;  %v904_v5 = vpop.permute.xlu1 %903  ;;  %v5805_v7 = vpop.permute.xlu0 %991  ;;  %1727 = vmatpush2.bf16.msra.mxu1 %v1649_v37  ;;  %1688 = vmatpush2.bf16.msra.mxu0 %v4378_v38  ;;  %vm916_vm15 = vcmask 252928   ;;  %v4373_v6 = vcombine.low %v5506_v8, %v5774_v56 }
 0x101   : >> { %v997_v34 = vrot.slane %v5805_v7, 4  ;;  %1689 = vmatprep.subr.bf16.mxu0 %v4372_v39  ;;  %1728 = vmatprep.subr.bf16.mxu1 %v4381_v50  ;;  %v911_v44 = vrot.slane %v904_v5, 4  ;;  %v4365_v1 = vcombine.high %v973_v18, %v1001_v0  ;;  %v4364_v3 = vcombine.low %v973_v18, %v1001_v0 }
 0x103   : >> { %v1002_v57 = vsel %vm498_vm1, %v996_v9, %v997_v34 }
 0x104   : >> { %v1003_v15 = vsel %vm6883_vm14, %v990_v2, %v1002_v57  ;;  %v932_v16 = vpop.permute.xlu1 %931  ;;  %v906_v17 = vpop.permute.xlu0 %905  ;;  %1729 = vmatpush2.bf16.msra.mxu1 %v4380_v40  ;;  %1690 = vmatpush2.bf16.msra.mxu0 %v4371_v58  ;;  %vm944_vm14 = vcmask 244736  }
 0x105   : >> { %v912_v63 = vrot.slane %v906_v17, 4  ;;  %1691 = vmatprep.subr.bf16.mxu0 %v4365_v1  ;;  %1730 = vmatprep.subr.bf16.mxu1 %v4374_v4  ;;  %v939_v32 = vrot.slane %v932_v16, 4  ;;  %v4367_v37 = vcombine.high %v975_v55, %v1003_v15  ;;  %v4366_v50 = vcombine.low %v975_v55, %v1003_v15 }
 0x107   : >> { %v915_v9 = vsel %vm498_vm1, %v911_v44, %v912_v63 }
 0x108   : >> { %v917_v38 = vsel %vm916_vm15, %v904_v5, %v915_v9  ;;  %v5822_v12 = vpop.permute.xlu1 %907  ;;  %v934_v2 = vpop.permute.xlu0 %933  ;;  %1731 = vmatpush2.bf16.msra.mxu1 %v4373_v6  ;;  %1692 = vmatpush2.bf16.msra.mxu0 %v4364_v3 }
 0x109   : >> { %v913_v13 = vrot.slane %v5822_v12, 4  ;;  %v940_v39 = vrot.slane %v934_v2, 4  ;;  %1732 = vmatprep.subr.bf16.mxu1 %v4367_v37 }
 0x10b   : >> { %v918_v8 = vsel %vm498_vm1, %v912_v63, %v913_v13  ;;  %v943_v56 = vsel %vm498_vm1, %v939_v32, %v940_v39 }
 0x10c   : >> { %v919_v18 = vsel %vm916_vm15, %v906_v17, %v918_v8  ;;  %v945_v0 = vsel %vm944_vm14, %v932_v16, %v943_v56  ;;  %v854_v5 = vpop.permute.xlu1 %853  ;;  %v5831_v40 = vpop.permute.xlu0 %935  ;;  %1733 = vmatpush2.bf16.msra.mxu1 %v4366_v50  ;;  %v5843_v16 = vcombine.low %v5540_v10, %v5540_v10 }
 0x10d   : >> { %v858_v58 = vrot.slane %v854_v5, 4  ;;  %v941_v44 = vrot.slane %v5831_v40, 4  ;;  %v4358_v57 = vcombine.high %v917_v38, %v945_v0  ;;  %v4357_v1 = vcombine.low %v917_v38, %v945_v0 }
 0x10f   : >> { %v864_v55 = vsel %vm498_vm1, %v857_v28, %v858_v58  ;;  %v866_v4 = vsel %vm860_vm5, %v854_v5, %v858_v58  ;;  %v946_v15 = vsel %vm498_vm1, %v940_v39, %v941_v44  ;;  %1693 = vmatprep.subr.bf16.mxu0 %v4358_v57 }
 0x110   : >> { %v865_v17 = vsel %vm860_vm5, %v5577_v26, %v864_v55  ;;  %874 = vst.msk [vmem:[#allocation2 + $0x1a0] sm:$0xf] %vm480_vm2, %v866_v4  ;;  %v947_v63 = vsel %vm944_vm14, %v934_v2, %v946_v15  ;;  %v798_v6 = vpop.permute.xlu1 %797  ;;  %v882_v28 = vpop.permute.xlu0 %881  ;;  %1694 = vmatpush2.bf16.msra.mxu0 %v4357_v1 }
 0x111   : >> { %v802_v3 = vrot.slane %v798_v6, 4  ;;  %v886_v32 = vrot.slane %v882_v28, 4  ;;  %v4360_v9 = vcombine.high %v919_v18, %v947_v63  ;;  %v4359_v37 = vcombine.low %v919_v18, %v947_v63 }
 0x113   : >> { %v808_v38 = vsel %vm498_vm1, %v801_v54, %v802_v3  ;;  %v810_v10 = vsel %vm804_vm6, %v798_v6, %v802_v3  ;;  %v892_v26 = vsel %vm498_vm1, %v885_v27, %v886_v32  ;;  %v894_v39 = vsel %vm888_vm4, %v882_v28, %v886_v32  ;;  %1696 = vmatmul.mubr.bf16.vlgmr.msra.gmra.mxu0 %v5843_v16 }
 0x114   : >> { %v809_v2 = vsel %vm804_vm6, %v5612_v52, %v808_v38  ;;  %818 = vst.msk [vmem:[#allocation2 + $0x168] sm:$0xf] %vm480_vm2, %v810_v10  ;;  %v893_v50 = vsel %vm888_vm4, %v5575_v25, %v892_v26  ;;  %902 = vst.msk [vmem:[#allocation2 + $0x1bc] sm:$0xf] %vm480_vm2, %v894_v39  ;;  %v742_v54 = vpop.permute.xlu1 %741  ;;  %v826_v8 = vpop.permute.xlu0 %825  ;;  %1734 = vmatprep.subr.bf16.mxu1 %v4360_v9  ;;  %4397 = vmatprep.mubr.msk.bf16.mxu0 %vm1637_vm3, %v5544_v11  ;;  %vm6916_vm4 = vcmask 1014784   ;;  %vm6918_vm6 = vcmask 785408  }
 0x115   : >> { %v746_v27 = vrot.slane %v742_v54, 4  ;;  %v830_v56 = vrot.slane %v826_v8, 4  ;;  %1735 = vmatpush2.bf16.msra.mxu1 %v4359_v37  ;;  %v4354_v18 = vcombine.low %v865_v17, %v893_v50  ;;  %v4355_v0 = vcombine.high %v865_v17, %v893_v50  ;;  %vm6917_vm5 = vmmov %vm6916_vm4 }
 0x116   : >> { %1786 = vmatprep.subr.bf16.mxu1 %v5217_v14 }
 0x117   : >> { %v752_v52 = vsel %vm498_vm1, %v745_v22, %v746_v27  ;;  %v754_v25 = vsel %vm748_vm8, %v742_v54, %v746_v27  ;;  %v836_v5 = vsel %vm498_vm1, %v829_v53, %v830_v56  ;;  %v838_v58 = vsel %vm832_vm7, %v826_v8, %v830_v56  ;;  %1745 = vmatprep.subr.bf16.mxu0 %v4355_v0 }
 0x118   : >> { %v753_v57 = vsel %vm748_vm8, %v5642_v20, %v752_v52  ;;  %762 = vst.msk [vmem:[#allocation2 + $0x130] sm:$0xf] %vm480_vm2, %v754_v25  ;;  %v837_v1 = vsel %vm832_vm7, %v5610_v51, %v836_v5  ;;  %846 = vst.msk [vmem:[#allocation2 + $0x184] sm:$0xf] %vm480_vm2, %v838_v58  ;;  %v686_v22 = vpop.permute.xlu1 %685  ;;  %v770_v55 = vpop.permute.xlu0 %769  ;;  %1737 = vmatmul.mubr.bf16.vlgmr.msra.gmra.mxu1 %v5843_v16  ;;  %1746 = vmatpush1.bf16.msra.mxu0 %v4354_v18  ;;  %vm6920_vm8 = vcmask 1039360  }
 0x119   : >> { %v690_v4 = vrot.slane %v686_v22, 4  ;;  %v774_v53 = vrot.slane %v770_v55, 4  ;;  %v4347_v15 = vcombine.low %v809_v2, %v837_v1  ;;  %v4348_v17 = vcombine.high %v809_v2, %v837_v1  ;;  %4398 = vmatprep.mubr.msk.bf16.mxu1 %vm1637_vm3, %v5544_v11  ;;  %vm6919_vm7 = vmmov %vm6918_vm6 }
 0x11b   : >> { %v696_v20 = vsel %vm498_vm1, %v689_v49, %v690_v4  ;;  %v698_v51 = vsel %vm692_vm10, %v686_v22, %v690_v4  ;;  %v780_v63 = vsel %vm498_vm1, %v773_v21, %v774_v53  ;;  %v782_v6 = vsel %vm776_vm9, %v770_v55, %v774_v53  ;;  %v4837_v28 = vld [vmem:[#allocation2 + $0x1a0] ss:$28 sps:$4 sm:$0xff]   ;;  %1747 = vmatprep.subr.bf16.mxu0 %v4348_v17 }
 0x11c   : >> { %v697_v3 = vsel %vm692_vm10, %v5664_v47, %v696_v20  ;;  %706 = vst.msk [vmem:[#allocation2 + $0xf8] sm:$0xf] %vm480_vm2, %v698_v51  ;;  %v781_v11 = vsel %vm776_vm9, %v5640_v19, %v780_v63  ;;  %790 = vst.msk [vmem:[#allocation2 + $0x14c] sm:$0xf] %vm480_vm2, %v782_v6  ;;  %v630_v49 = vpop.permute.xlu1 %629  ;;  %v714_v32 = vpop.permute.xlu0 %713  ;;  %1748 = vmatpush1.bf16.msra.mxu0 %v4347_v15  ;;  %1787 = vmatpush1.bf16.msra.mxu1 %v4837_v28  ;;  %vm6922_vm10 = vcmask 1022976  }
 0x11d   : >> { %v634_v9 = vrot.slane %v630_v49, 4  ;;  %v718_v37 = vrot.slane %v714_v32, 4  ;;  %v4340_v21 = vcombine.low %v753_v57, %v781_v11  ;;  %v4341_v38 = vcombine.high %v753_v57, %v781_v11  ;;  %1788 = vmatprep.subr.bf16.mxu1 %v5217_v14  ;;  %vm6921_vm9 = vmmov %vm6920_vm8 }
 0x11f   : >> { %v640_v47 = vsel %vm498_vm1, %v633_v30, %v634_v9  ;;  %v642_v10 = vsel %vm636_vm12, %v630_v49, %v634_v9  ;;  %v724_v19 = vsel %vm498_vm1, %v717_v48, %v718_v37  ;;  %v726_v26 = vsel %vm720_vm11, %v714_v32, %v718_v37  ;;  %v4838_v39 = vld [vmem:[#allocation2 + $0x168] ss:$28 sps:$4 sm:$0xff]   ;;  %1749 = vmatprep.subr.bf16.mxu0 %v4341_v38 }
 0x120   : >> { %v641_v2 = vsel %vm636_vm12, %v5685_v24, %v640_v47  ;;  %650 = vst.msk [vmem:[#allocation2 + $0xc0] sm:$0xf] %vm480_vm2, %v642_v10  ;;  %v725_v50 = vsel %vm720_vm11, %v5662_v46, %v724_v19  ;;  %734 = vst.msk [vmem:[#allocation2 + $0x114] sm:$0xf] %vm480_vm2, %v726_v26  ;;  %v575_v30 = vpop.permute.xlu1 %574  ;;  %v658_v54 = vpop.permute.xlu0 %657  ;;  %1750 = vmatpush1.bf16.msra.mxu0 %v4340_v21  ;;  %1789 = vmatpush1.bf16.msra.mxu1 %v4838_v39  ;;  %vm6924_vm12 = vcmask 228352  }
 0x121   : >> { %v579_v8 = vrot.slane %v575_v30, 4  ;;  %594 = vst.msk [vmem:[#allocation2 + $0x88] sm:$0xf] %vm480_vm2, %v575_v30  ;;  %v662_v48 = vrot.slane %v658_v54, 4  ;;  %v4333_v27 = vcombine.low %v697_v3, %v725_v50  ;;  %v4334_v56 = vcombine.high %v697_v3, %v725_v50  ;;  %1790 = vmatprep.subr.bf16.mxu1 %v5217_v14  ;;  %v1077_v3 = vld [vmem:[#allocation2 + $0x10] sm:$0xff]  ;;  %vm6923_vm11 = vmmov %vm6922_vm10 }
 0x123   : >> { %v585_v24 = vsel %vm498_vm1, %v578_v62, %v579_v8  ;;  %1073 = vst.msk [vmem:[#allocation2 + $0x2b8] sm:$0xf] %vm480_vm2, %v579_v8  ;;  %v668_v46 = vsel %vm498_vm1, %v661_v29, %v662_v48  ;;  %v670_v18 = vsel %vm664_vm13, %v658_v54, %v662_v48  ;;  %v4839_v0 = vld [vmem:[#allocation2 + $0x130] ss:$28 sps:$4 sm:$0xff]   ;;  %1751 = vmatprep.subr.bf16.mxu0 %v4334_v56 }
 0x124   : >> { %v586_v52 = vsel %vm6916_vm4, %v5706_v60, %v585_v24  ;;  %v5926_v25 = vsel %vm6917_vm5, %v585_v24, %v575_v30  ;;  %v669_v5 = vsel %vm664_vm13, %v5683_v23, %v668_v46  ;;  %678 = vst.msk [vmem:[#allocation2 + $0xdc] sm:$0xf] %vm480_vm2, %v670_v18  ;;  %v521_v62 = vpop.permute.xlu1 %520  ;;  %v602_v58 = vpop.permute.xlu0 %601  ;;  %1752 = vmatpush1.bf16.msra.mxu0 %v4333_v27  ;;  %vm6925_vm13 = vcmask 236544   ;;  %vm6926_vm4 = vmmov %vm6924_vm12 }
 0x125   : >> { %v525_v57 = vrot.slane %v521_v62, 4  ;;  %540 = vst.msk [vmem:[#allocation2 + $0x50] sm:$0xf] %vm480_vm2, %v521_v62  ;;  %v606_v29 = vrot.slane %v602_v58, 4  ;;  %1791 = vmatpush1.bf16.msra.mxu1 %v4839_v0  ;;  %v4326_v1 = vcombine.low %v641_v2, %v669_v5  ;;  %v4327_v22 = vcombine.high %v641_v2, %v669_v5  ;;  %vm6927_vm5 = vmmov %vm6925_vm13 }
 0x126   : >> { %1792 = vmatprep.subr.bf16.mxu1 %v5217_v14 }
 0x127   : >> { %v531_v60 = vsel %vm498_vm1, %v524_v45, %v525_v57  ;;  %1051 = vst.msk [vmem:[#allocation2 + $0x280] sm:$0xf] %vm480_vm2, %v525_v57  ;;  %v612_v23 = vsel %vm498_vm1, %v605_v61, %v606_v29  ;;  %v614_v55 = vsel %vm6918_vm6, %v602_v58, %v606_v29  ;;  %v4840_v4 = vld [vmem:[#allocation2 + $0xf8] ss:$28 sps:$4 sm:$0xff]   ;;  %1753 = vmatprep.subr.bf16.mxu0 %v4327_v22 }
 0x128   : >> { %v532_v53 = vsel %vm527_vm0, %v5734_v42, %v531_v60  ;;  %v5944_v15 = vsel %vm527_vm0, %v531_v60, %v521_v62  ;;  %v613_v17 = vsel %vm6919_vm7, %v5704_v59, %v612_v23  ;;  %622 = vst.msk [vmem:[#allocation2 + $0xa4] sm:$0xf] %vm480_vm2, %v614_v55  ;;  %v493_v45 = vpop.permute.xlu1 %492  ;;  %v548_v20 = vpop.permute.xlu0 %547  ;;  %1754 = vmatpush1.bf16.msra.mxu0 %v4326_v1 }
 0x129   : >> { %v497_v51 = vrot.slane %v493_v45, 4  ;;  %513 = vst.msk [vmem:[#allocation2 + $0x34] sm:$0xf] %vm480_vm2, %v493_v45  ;;  %v552_v61 = vrot.slane %v548_v20, 4  ;;  %567 = vst.msk [vmem:[#allocation2 + $0x6c] sm:$0xf] %vm480_vm2, %v548_v20  ;;  %1793 = vmatpush1.bf16.msra.mxu1 %v4840_v4  ;;  %v4319_v63 = vcombine.low %v586_v52, %v613_v17  ;;  %v4320_v42 = vcombine.high %v586_v52, %v613_v17 }
 0x12a   : >> { %1794 = vmatprep.subr.bf16.mxu1 %v5217_v14  ;;  %v4845_v5 = vld [vmem:[#allocation2 + $0x2b8] ss:$0 sps:$4 sm:$0xff]  }
 0x12b   : >> { %v504_v59 = vsel %vm498_vm1, %v496_v35, %v497_v51  ;;  %1040 = vst.msk [vmem:[#allocation2 + $0x264] sm:$0xf] %vm480_vm2, %v497_v51  ;;  %v558_v6 = vsel %vm498_vm1, %v551_v43, %v552_v61  ;;  %1062 = vst.msk [vmem:[#allocation2 + $0x29c] sm:$0xf] %vm480_vm2, %v552_v61  ;;  %v4841_v28 = vld [vmem:[#allocation2 + $0xc0] ss:$28 sps:$4 sm:$0xff]   ;;  %1755 = vmatprep.subr.bf16.mxu0 %v4320_v42 }
 0x12c   : >> { %v505_v11 = vsel %vm6920_vm8, %v5759_v33, %v504_v59  ;;  %v5963_v49 = vsel %vm6921_vm9, %v504_v59, %v493_v45  ;;  %v559_v35 = vsel %vm6922_vm10, %v5732_v41, %v558_v6  ;;  %v1054_v32 = vsel %vm6923_vm11, %v558_v6, %v548_v20  ;;  %v994_v9 = vpop.permute.xlu1 %993  ;;  %v966_v37 = vpop.permute.xlu0 %965  ;;  %1756 = vmatpush1.bf16.msra.mxu0 %v4319_v63 }
 0x12d   : >> { %v998_v43 = vrot.slane %v994_v9, 4  ;;  %v970_v21 = vrot.slane %v966_v37, 4  ;;  %1795 = vmatpush1.bf16.msra.mxu1 %v4841_v28  ;;  %v4312_v38 = vcombine.low %v532_v53, %v559_v35  ;;  %v4313_v47 = vcombine.high %v532_v53, %v559_v35 }
 0x12e   : >> { %1796 = vmatprep.subr.bf16.mxu1 %v5217_v14  ;;  %v4306_v10 = vcombine.high %v1077_v3, %v505_v11  ;;  %v4382_v33 = vcombine.low %v5944_v15, %v1054_v32  ;;  %v4383_v8 = vcombine.high %v5944_v15, %v1054_v32  ;;  %v4305_v27 = vcombine.low %v1077_v3, %v505_v11 }
 0x12f   : >> { %v1004_v19 = vsel %vm498_vm1, %v997_v34, %v998_v43  ;;  %v1006_v41 = vsel %vm6924_vm12, %v994_v9, %v998_v43  ;;  %v976_v26 = vsel %vm498_vm1, %v969_v36, %v970_v21  ;;  %v978_v39 = vsel %vm6925_vm13, %v966_v37, %v970_v21  ;;  %v4842_v2 = vld [vmem:[#allocation2 + $0x88] ss:$28 sps:$4 sm:$0xff]   ;;  %1757 = vmatprep.subr.bf16.mxu0 %v4313_v47 }
 0x130   : >> { %v1005_v50 = vsel %vm6926_vm4, %v5805_v7, %v1004_v19  ;;  %1014 = vst.msk [vmem:[#allocation2 + $0x22c] sm:$0xf] %vm480_vm2, %v1006_v41  ;;  %v977_v30 = vsel %vm6927_vm5, %v5788_v31, %v976_v26  ;;  %986 = vst.msk [vmem:[#allocation2 + $0x210] sm:$0xf] %vm480_vm2, %v978_v39  ;;  %v938_v34 = vpop.permute.xlu1 %937  ;;  %v910_v54 = vpop.permute.xlu0 %909  ;;  %1758 = vmatpush1.bf16.msra.mxu0 %v4312_v38  ;;  %v4390_v7 = vcombine.high %v5926_v25, %v5926_v25  ;;  %v4843_v0 = vld [vmem:[#allocation2 + $0x50] ss:$28 sps:$4 sm:$0xff]  }
 0x131   : >> { %v942_v36 = vrot.slane %v938_v34, 4  ;;  %v914_v48 = vrot.slane %v910_v54, 4  ;;  %1797 = vmatpush1.bf16.msra.mxu1 %v4842_v2  ;;  %1759 = vmatprep.subr.bf16.mxu0 %v4306_v10  ;;  %v4389_v31 = vcombine.low %v5926_v25, %v5926_v25  ;;  %v1661_v62 = vsel %vm498_vm1, %v4845_v5, 0 }
 0x132   : >> { %1798 = vmatprep.subr.bf16.mxu1 %v5217_v14  ;;  %v4846_v57 = vld [vmem:[#allocation2 + $0x280] ss:$28 sps:$4 sm:$0xff]   ;;  %v4369_v29 = vcombine.high %v977_v30, %v1005_v50  ;;  %v4368_v1 = vcombine.low %v977_v30, %v1005_v50  ;;  %v4847_v22 = vld [vmem:[#allocation2 + $0x248] ss:$28 sps:$4 sm:$0xff]   ;;  %vm6934_vm9 = vcmask 785408   ;;  %vm1928_vm4 = vcmask 742400  }
 0x133   : >> { %v948_v56 = vsel %vm498_vm1, %v941_v44, %v942_v36  ;;  %v950_v24 = vsel %vm944_vm14, %v938_v34, %v942_v36  ;;  %v920_v46 = vsel %vm498_vm1, %v913_v13, %v914_v48  ;;  %v922_v18 = vsel %vm916_vm15, %v910_v54, %v914_v48  ;;  %v4844_v44 = vld [vmem:[#allocation2 + $0x18] ss:$28 sps:$4 sm:$0xff]   ;;  %vm6935_vm10 = vmmov %vm6934_vm9 }
 0x134   : >> { %v949_v52 = vsel %vm944_vm14, %v5831_v40, %v948_v56  ;;  %958 = vst.msk [vmem:[#allocation2 + $0x1f4] sm:$0xf] %vm480_vm2, %v950_v24  ;;  %v921_v25 = vsel %vm916_vm15, %v5822_v12, %v920_v46  ;;  %930 = vst.msk [vmem:[#allocation2 + $0x1d8] sm:$0xf] %vm480_vm2, %v922_v18  ;;  %1760 = vmatpush1.bf16.msra.mxu0 %v4305_v27  ;;  %v1655_v13 = vsel %vm498_vm1, %v4389_v31, 0  ;;  %v4850_v40 = vld [vmem:[#allocation2 + $0x240] sm:$0xff] }
 0x135   : >> { %1799 = vmatpush1.bf16.msra.mxu1 %v4843_v0  ;;  %4396 = vmatprep.subr.msk.bf16.mxu0 %vm498_vm1, %v4390_v7  ;;  %v4376_v12 = vcombine.high %v4850_v40, %v5963_v49  ;;  %v4375_v58 = vcombine.low %v4850_v40, %v5963_v49  ;;  %v4362_v60 = vcombine.high %v921_v25, %v949_v52  ;;  %vm6928_vm2 = vmmov %vm6920_vm8 }
 0x136   : >> { %1800 = vmatprep.subr.bf16.mxu1 %v5217_v14  ;;  %v4361_v23 = vcombine.low %v921_v25, %v949_v52  ;;  %vm6929_vm14 = vmmov %vm6928_vm2 }
 0x137   : >> { %v4848_v55 = vld [vmem:[#allocation2 + $0x210] ss:$28 sps:$4 sm:$0xff]   ;;  %vm6930_vm15 = vmmov %vm6928_vm2 }
 0x138   : >> { %1768 = vmatpush2.bf16.msra.mxu0 %v1655_v13  ;;  %vm6931_vm6 = vmmov %vm6928_vm2 }
 0x139   : >> { %1801 = vmatpush1.bf16.msra.mxu1 %v4844_v44  ;;  %1769 = vmatprep.subr.bf16.mxu0 %v4383_v8  ;;  %vm6932_vm7 = vmmov %vm6928_vm2 }
 0x13a   : >> { %1808 = vmatprep.subr.bf16.mxu1 %v5217_v14  ;;  %vm6933_vm8 = vmmov %vm6928_vm2 }
 0x13b   : >> { %v4849_v4 = vld [vmem:[#allocation2 + $0x1d8] ss:$28 sps:$4 sm:$0xff]   ;;  %vm6936_vm11 = vmmov %vm6934_vm9 }
 0x13c   : >> { %1770 = vmatpush2.bf16.msra.mxu0 %v4382_v33  ;;  %vm6937_vm12 = vmmov %vm6934_vm9 }
 0x13d   : >> { %1809 = vmatpush2.bf16.msra.mxu1 %v1661_v62  ;;  %1771 = vmatprep.subr.bf16.mxu0 %v4376_v12  ;;  %v1179_v53 = vpop.permute.xlu0 %1178  ;;  %vm6938_vm13 = vmmov %vm6934_vm9 }
 0x13e   : >> { %1810 = vmatprep.subr.bf16.mxu1 %v5217_v14  ;;  %vm6939_vm5 = vmmov %vm6934_vm9 }
 0x140   : >> { %1772 = vmatpush2.bf16.msra.mxu0 %v4375_v58 }
 0x141   : >> { %1811 = vmatpush2.bf16.msra.mxu1 %v4846_v57  ;;  %1773 = vmatprep.subr.bf16.mxu0 %v4369_v29 }
 0x142   : >> { %1812 = vmatprep.subr.bf16.mxu1 %v5217_v14 }
 0x144   : >> { %1774 = vmatpush2.bf16.msra.mxu0 %v4368_v1 }
 0x145   : >> { %1813 = vmatpush2.bf16.msra.mxu1 %v4847_v22  ;;  %1775 = vmatprep.subr.bf16.mxu0 %v4362_v60 }
 0x146   : >> { %1814 = vmatprep.subr.bf16.mxu1 %v5217_v14 }
 0x148   : >> { %1776 = vmatpush2.bf16.msra.mxu0 %v4361_v23 }
 0x149   : >> { %1815 = vmatpush2.bf16.msra.mxu1 %v4848_v55 }
 0x14a   : >> { %1816 = vmatprep.subr.bf16.mxu1 %v5217_v14 }
 0x14b   : >> { %1778 = vmatmul.mubr.bf16.vlgmr.msra.gmra.mxu0 %v5843_v16 }
 0x14d   : >> { %1817 = vmatpush2.bf16.msra.mxu1 %v4849_v4 }
 0x150   : >> { %1819 = vmatmul.mubr.bf16.vlgmr.msra.gmra.mxu1 %v5843_v16 }
 0x1d3   : >> { %v1697_v15 = vpop.f32.mrf.mxu0 }
 0x1d4   : >> { %v1698_v17 = vadd.f32 %v1697_v15, %v1179_v53 }
 0x1d5   : >> { %v1699_v45 = vpop.f32.mrf.mxu0 }
 0x1d6   : >> { %v1826_v20 = vmax.f32 %v1698_v17, 0.0  ;;  %v1700_v51 = vadd.f32 %v1699_v45, %v1179_v53 }
 0x1d7   : >> { %v1701_v61 = vpop.f32.mrf.mxu0 }
 0x1d8   : >> { %v1827_v63 = vmax.f32 %v1700_v51, 0.0  ;;  %v1738_v42 = vpop.f32.mrf.mxu1  ;;  %1840 = vrot.lane.b32.xlu1 %v1826_v20, %s6911_s23 }
 0x1d9   : >> { %v1739_v59 = vadd.f32 %v1738_v42, %v1179_v53  ;;  %v1702_v6 = vpop.f32.mrf.mxu0 }
 0x1da   : >> { %v1740_v14 = vpop.f32.mrf.mxu1 }
 0x1db   : >> { %v1828_v28 = vmax.f32 %v1739_v59, 0.0  ;;  %v1741_v3 = vadd.f32 %v1740_v14, %v1179_v53 }
 0x1dc   : >> { %v1742_v11 = vpop.f32.mrf.mxu1  ;;  %1842 = vrot.lane.b32.xlu1 %v1827_v63, %s6911_s23 }
 0x1dd   : >> { %v1829_v16 = vmax.f32 %v1741_v3, 0.0  ;;  %1844 = vrot.lane.b32.xlu0 %v1828_v28, %s6911_s23 }
 0x1de   : >> { %v1743_v49 = vpop.f32.mrf.mxu1 }
 0x1e0   : >> { %1846 = vrot.lane.b32.xlu1 %v1829_v16, %s6911_s23 }
 0x20b   : >> { %v1779_v35 = vpop.f32.mrf.mxu0 }
 0x20c   : >> { %v1780_v32 = vadd.f32 %v1779_v35, %v1179_v53 }
 0x20d   : >> { %v1781_v9 = vpop.f32.mrf.mxu0 }
 0x20e   : >> { %v1830_v37 = vmax.f32 %v1780_v32, 0.0  ;;  %v1782_v43 = vadd.f32 %v1781_v9, %v1179_v53 }
 0x20f   : >> { %v1783_v21 = vpop.f32.mrf.mxu0 }
 0x210   : >> { %v1820_v38 = vpop.f32.mrf.mxu1  ;;  %v1831_v47 = vmax.f32 %v1782_v43, 0.0  ;;  %1848 = vrot.lane.b32.xlu0 %v1830_v37, %s6911_s23 }
 0x211   : >> { %v1821_v10 = vadd.f32 %v1820_v38, %v1179_v53  ;;  %v1784_v33 = vpop.f32.mrf.mxu0 }
 0x212   : >> { %v1822_v19 = vpop.f32.mrf.mxu1  ;;  %1850 = vrot.lane.b32.xlu1 %v1831_v47, %s6911_s23 }
 0x213   : >> { %v1832_v41 = vmax.f32 %v1821_v10, 0.0 }
 0x214   : >> { %v1823_v26 = vpop.f32.mrf.mxu1 }
 0x215   : >> { %1852 = vrot.lane.b32.xlu0 %v1832_v41, %s6911_s23  ;;  %s4297_s23 = sshll.u32 %s5191_s21, 3  ;;  %s469_s21 = sadd.s32 1, %s5191_s21  }
 0x216   : >> { %v1824_v39 = vpop.f32.mrf.mxu1  ;;  %s1917_s30 = sshra.s32 %s4297_s23, 3  ;;  %p466_p12 = scmp.ge.s32.totalorder %s469_s21, 2  }
 0x217   : >> { %s4604_s0 = smul.u32 56, %s1917_s30  ;;  %s6940_s5 = sld [smem:[#allocation15_spill]] (%p466_p12) }
 0x218   : > { %s6376_s17 = smov (%p466_p12), 0  }
 0x219   : >> { %s1921_s24 = scalar_lea.vmem [#allocation4], %s4604_s0 }
 0x21d   : > { %v4853_v42 = vld [vmem:[%s6940_s5 + $0x174] ss:$8 sps:$4 sm:$0xff] (%p466_p12)   ;;  %v4855_v59 = vld [vmem:[%s6940_s5 + $0x70] ss:$8 sps:$4 sm:$0xff] (%p466_p12)   ;;  %v4857_v14 = vld [vmem:[%s6940_s5 + $0x64] ss:$8 sps:$4 sm:$0xff] (%p466_p12)  }
 0x21e   : > { %v4856_v6 = vld [vmem:[%s6940_s5 + $0x170] ss:$8 sps:$4 sm:$0xff] (%p466_p12)   ;;  %2654 = vmatprep.subr.bf16.mxu1 (%p466_p12), %v4853_v42  ;;  %v4861_v3 = vld [vmem:[%s6940_s5 + $0x60] ss:$8 sps:$4 sm:$0xff] (%p466_p12)   ;;  %v4865_v49 = vld [vmem:[%s6940_s5 + $0x154] ss:$8 sps:$4 sm:$0xff] (%p466_p12)  }
 0x21f   : > { %2655 = vmatpush1.bf16.msra.mxu1 (%p466_p12), %v4856_v6  ;;  %v4862_v11 = vld [vmem:[%s6940_s5 + $0x160] ss:$8 sps:$4 sm:$0xff] (%p466_p12)   ;;  %v4867_v35 = vld [vmem:[%s6940_s5 + $0x50] ss:$8 sps:$4 sm:$0xff] (%p466_p12)   ;;  %v4869_v9 = vld [vmem:[%s6940_s5 + $0x44] ss:$8 sps:$4 sm:$0xff] (%p466_p12)  }
 0x220   : > { %v4868_v32 = vld [vmem:[%s6940_s5 + $0x150] ss:$8 sps:$4 sm:$0xff] (%p466_p12)   ;;  %v4873_v43 = vld [vmem:[%s6940_s5 + $0x40] ss:$8 sps:$4 sm:$0xff] (%p466_p12)   ;;  %v4875_v38 = vld [vmem:[%s6940_s5 + $0x34] ss:$8 sps:$4 sm:$0xff] (%p466_p12)  }
 0x221   : > { %v4874_v21 = vld [vmem:[%s6940_s5 + $0x140] ss:$8 sps:$4 sm:$0xff] (%p466_p12)   ;;  %v4879_v10 = vld [vmem:[%s6940_s5 + $0x30] ss:$8 sps:$4 sm:$0xff] (%p466_p12)   ;;  %v4881_v19 = vld [vmem:[%s6940_s5 + $0x24] ss:$8 sps:$4 sm:$0xff] (%p466_p12)  }
 0x222   : > { %v4880_v33 = vld [vmem:[%s6940_s5 + $0x130] ss:$8 sps:$4 sm:$0xff] (%p466_p12)   ;;  %v4885_v26 = vld [vmem:[%s6940_s5 + $0x20] ss:$8 sps:$4 sm:$0xff] (%p466_p12)  }
 0x223   : > { %v4886_v39 = vld [vmem:[%s6940_s5 + $0x120] ss:$8 sps:$4 sm:$0xff] (%p466_p12)   ;;  %v4940_v42 = vld [vmem:[%s6940_s5 + $0x190] ss:$8 sps:$4 sm:$0xff] (%p466_p12)  }
 0x24a   : >> { %v1841_v2 = vpop.permute.xlu1 %1840 }
 0x24e   : >> { %v1843_v50 = vpop.permute.xlu1 %1842 }
 0x24f   : >> { %v1845_v30 = vpop.permute.xlu0 %1844  ;;  %v1855_v34 = vsel %vm6928_vm2, %v1841_v2, %v1843_v50  ;;  %v4887_v2 = vld [vmem:[%s6940_s5 + $0x14] ss:$8 sps:$4 sm:$0xff] (%p466_p12)   ;;  %vm2601_vm2 = vcmask (%p466_p12), 1044480  }
 0x250   : >> { %v1856_v54 = vsel %vm6929_vm14, %v1843_v50, %v1845_v30  ;;  %v1868_v8 = vmax.f32 %v1826_v20, %v1855_v34  ;;  %v4889_v50 = vld [vmem:[%s6940_s5 + $0x114] ss:$8 sps:$4 sm:$0xff] (%p466_p12)   ;;  %v4892_v34 = vld [vmem:[%s6940_s5 + $0x110] ss:$8 sps:$4 sm:$0xff] (%p466_p12)   ;;  %vm2602_vm14 = vcmask (%p466_p12), 1045504  }
 0x251   : >> { %v1869_v36 = vmax.f32 %v1827_v63, %v1856_v54  ;;  %v4851_v63 = vld [vmem:[%s6940_s5 + $0x74] ss:$8 sps:$4 sm:$0xff] (%p466_p12)   ;;  %v4893_v54 = vld [vmem:[%s6940_s5 + $0x4] ss:$8 sps:$4 sm:$0xff] (%p466_p12)  }
 0x252   : >> { %1882 = vrot.lane.b32.xlu1 %v1868_v8, %s6910_s16  ;;  %v1847_v48 = vpop.permute.xlu1 %1846  ;;  %2611 = vmatprep.subr.bf16.mxu0 (%p466_p12), %v4851_v63  ;;  %v4939_v63 = vld [vmem:[%s6940_s5 + $0x90] ss:$8 sps:$4 sm:$0xff] (%p466_p12)  }
 0x253   : >> { %1884 = vrot.lane.b32.xlu0 %v1869_v36, %s6910_s16  ;;  %v1857_v27 = vsel %vm6930_vm15, %v1845_v30, %v1847_v48  ;;  %2612 = vmatpush1.bf16.msra.mxu0 (%p466_p12), %v4855_v59  ;;  %v4891_v30 = vld [vmem:[%s6940_s5 + $0x10] ss:$8 sps:$4 sm:$0xff] (%p466_p12)   ;;  %v5218_v59 = vmov (%p466_p12), 65535   ;;  %vm2597_vm15 = vcmask (%p466_p12), 744448  }
 0x254   : >> { %v1870_v7 = vmax.f32 %v1828_v28, %v1857_v27  ;;  %v4859_v28 = vld [vmem:[%s6940_s5 + $0x164] ss:$8 sps:$4 sm:$0xff] (%p466_p12)   ;;  %2613 = vmatprep.subr.bf16.mxu0 (%p466_p12), %v4857_v14  ;;  %v4899_v27 = vld [vmem:[%s6940_s5 + $0xf4] ss:$8 sps:$4 sm:$0xff] (%p466_p12)   ;;  %v2603_v6 = vsel (%p466_p12), %vm2601_vm2, 4294967295, %v5218_v59 }
 0x255   : > { %2656 = vmatprep.subr.bf16.mxu1 (%p466_p12), %v4859_v28  ;;  %v4941_v14 = vld [vmem:[%s6940_s5 + $0x84] ss:$8 sps:$4 sm:$0xff] (%p466_p12)  }
 0x256   : >> { %1886 = vrot.lane.b32.xlu1 %v1870_v7, %s6910_s16  ;;  %2657 = vmatpush1.bf16.msra.mxu1 (%p466_p12), %v4862_v11  ;;  %v4943_v28 = vld [vmem:[%s6940_s5 + $0x184] ss:$8 sps:$4 sm:$0xff] (%p466_p12)   ;;  %v4946_v11 = vld [vmem:[%s6940_s5 + $0x180] ss:$8 sps:$4 sm:$0xff] (%p466_p12)  }
 0x257   : > { %2614 = vmatpush1.bf16.msra.mxu0 (%p466_p12), %v4861_v3  ;;  %2658 = vmatprep.subr.bf16.mxu1 (%p466_p12), %v4865_v49  ;;  %v4945_v3 = vld [vmem:[%s6940_s5 + $0x80] ss:$8 sps:$4 sm:$0xff] (%p466_p12)   ;;  %v5012_v59 = vld [vmem:[%s6940_s5 + $0x284] ss:$8 sps:$4 sm:$0xff] (%p466_p12)  }
 0x25a   : > { %2659 = vmatpush1.bf16.msra.mxu1 (%p466_p12), %v4868_v32  ;;  %v2604_v32 = vsel (%p466_p12), %vm2602_vm14, %v2603_v6, 0  ;;  %v5010_v6 = vld [vmem:[%s6940_s5 + $0x280] ss:$8 sps:$4 sm:$0xff] (%p466_p12)  }
 0x282   : >> { %v1849_v31 = vpop.permute.xlu0 %1848 }
 0x283   : >> { %v1858_v56 = vsel %vm6931_vm6, %v1847_v48, %v1849_v31  ;;  %v4898_v48 = vld [vmem:[%s6940_s5 + $0x100] ss:$8 sps:$4 sm:$0xff] (%p466_p12)   ;;  %vm2784_vm6 = vcmask (%p466_p12), 556032  }
 0x284   : >> { %v1871_v24 = vmax.f32 %v1829_v16, %v1858_v56  ;;  %v1851_v46 = vpop.permute.xlu1 %1850  ;;  %v4863_v16 = vld [vmem:[%s6940_s5 + $0x54] ss:$8 sps:$4 sm:$0xff] (%p466_p12)   ;;  %v4904_v56 = vld [vmem:[%s6940_s5 + $0x1f0] ss:$8 sps:$4 sm:$0xff] (%p466_p12)  }
 0x285   : >> { %v1859_v18 = vsel %vm6932_vm7, %v1849_v31, %v1851_v46  ;;  %2615 = vmatprep.subr.bf16.mxu0 (%p466_p12), %v4863_v16  ;;  %v4903_v31 = vld [vmem:[%s6940_s5 + $0xf0] ss:$8 sps:$4 sm:$0xff] (%p466_p12)  }
 0x286   : >> { %v1872_v0 = vmax.f32 %v1830_v37, %v1859_v18  ;;  %1888 = vrot.lane.b32.xlu0 %v1871_v24, %s6910_s16  ;;  %v4871_v37 = vld [vmem:[%s6940_s5 + $0x144] ss:$8 sps:$4 sm:$0xff] (%p466_p12)   ;;  %2616 = vmatpush1.bf16.msra.mxu0 (%p466_p12), %v4867_v35  ;;  %v4909_v18 = vld [vmem:[%s6940_s5 + $0xe0] ss:$8 sps:$4 sm:$0xff] (%p466_p12)  }
 0x287   : >> { %v1853_v52 = vpop.permute.xlu0 %1852  ;;  %2617 = vmatprep.subr.bf16.mxu0 (%p466_p12), %v4869_v9  ;;  %2660 = vmatprep.subr.bf16.mxu1 (%p466_p12), %v4871_v37  ;;  %v4977_v9 = vld [vmem:[%s6940_s5 + $0x350] ss:$8 sps:$4 sm:$0x3f] (%p466_p12)  }
 0x288   : >> { %v1860_v25 = vsel %vm6933_vm8, %v1851_v46, %v1853_v52  ;;  %1890 = vrot.lane.b32.xlu1 %v1872_v0, %s6910_s16  ;;  %v1874_v44 = vmax.f32 %v1832_v41, %v1853_v52  ;;  %2661 = vmatpush1.bf16.msra.mxu1 (%p466_p12), %v4874_v21  ;;  %v4883_v41 = vld [vmem:[%s6940_s5 + $0x124] ss:$8 sps:$4 sm:$0xff] (%p466_p12)   ;;  %v4911_v52 = vld [vmem:[%s6940_s5 + $0xd4] ss:$8 sps:$4 sm:$0xff] (%p466_p12)  }
 0x289   : >> { %v1873_v13 = vmax.f32 %v1831_v47, %v1860_v25  ;;  %v4877_v47 = vld [vmem:[%s6940_s5 + $0x134] ss:$8 sps:$4 sm:$0xff] (%p466_p12)   ;;  %v4907_v46 = vld [vmem:[%s6940_s5 + $0x1e4] ss:$8 sps:$4 sm:$0xff] (%p466_p12)  }
 0x28a   : > { %2618 = vmatpush1.bf16.msra.mxu0 (%p466_p12), %v4873_v43  ;;  %2662 = vmatprep.subr.bf16.mxu1 (%p466_p12), %v4877_v47  ;;  %v4913_v25 = vld [vmem:[%s6940_s5 + $0x1d4] ss:$8 sps:$4 sm:$0xff] (%p466_p12)  }
 0x28b   : >> { %1892 = vrot.lane.b32.xlu0 %v1873_v13, %s6910_s16  ;;  %2619 = vmatprep.subr.bf16.mxu0 (%p466_p12), %v4875_v38  ;;  %v4979_v43 = vld [vmem:[%s6940_s5 + $0x354] ss:$8 sps:$4 sm:$0x3f] (%p466_p12)  }
 0x28c   : >> { %1894 = vrot.lane.b32.xlu1 %v1874_v44, %s6910_s16  ;;  %2663 = vmatpush1.bf16.msra.mxu1 (%p466_p12), %v4880_v33  ;;  %v4949_v21 = vld [vmem:[%s6940_s5 + $0x274] ss:$8 sps:$4 sm:$0xff] (%p466_p12)   ;;  %v2609_v38 = vand.u32 (%p466_p12), %v4979_v43, %v2604_v32  ;;  %v4947_v33 = vld [vmem:[%s6940_s5 + $0x270] ss:$8 sps:$4 sm:$0xff] (%p466_p12)  }
 0x28d   : > { %2664 = vmatprep.subr.bf16.mxu1 (%p466_p12), %v4883_v41  ;;  %v2606_v41 = vand.u32 (%p466_p12), %v4977_v9, %v2604_v32 }
 0x28e   : > { %2620 = vmatpush1.bf16.msra.mxu0 (%p466_p12), %v4879_v10 }
 0x28f   : > { %2621 = vmatprep.subr.bf16.mxu0 (%p466_p12), %v4881_v19  ;;  %v4952_v19 = vld [vmem:[%s6940_s5 + $0x264] ss:$8 sps:$4 sm:$0xff] (%p466_p12)  }
 0x290   : > { %2665 = vmatpush1.bf16.msra.mxu1 (%p466_p12), %v4886_v39  ;;  %v4950_v39 = vld [vmem:[%s6940_s5 + $0x260] ss:$8 sps:$4 sm:$0xff] (%p466_p12)  }
 0x291   : > { %2666 = vmatprep.subr.bf16.mxu1 (%p466_p12), %v4889_v50  ;;  %v4983_v50 = vld [vmem:[%s6940_s5 + $0x340] ss:$8 sps:$4 sm:$0xff] (%p466_p12)  }
 0x292   : > { %2622 = vmatpush1.bf16.msra.mxu0 (%p466_p12), %v4885_v26  ;;  %v4985_v26 = vld [vmem:[%s6940_s5 + $0x344] ss:$8 sps:$4 sm:$0xff] (%p466_p12)  }
 0x293   : > { %2623 = vmatprep.subr.bf16.mxu0 (%p466_p12), %v4887_v2  ;;  %v4955_v2 = vld [vmem:[%s6940_s5 + $0x254] ss:$8 sps:$4 sm:$0xff] (%p466_p12)  }
 0x294   : > { %2667 = vmatpush1.bf16.msra.mxu1 (%p466_p12), %v4892_v34  ;;  %v5219_v34 = vmov (%p466_p12), 0  }
 0x296   : > { %2624 = vmatpush1.bf16.msra.mxu0 (%p466_p12), %v4891_v30  ;;  %v4991_v30 = vld [vmem:[%s6940_s5 + $0x334] ss:$8 sps:$4 sm:$0xff] (%p466_p12)  }
 0x297   : > { %2625 = vmatprep.subr.bf16.mxu0 (%p466_p12), %v4893_v54  ;;  %v4953_v54 = vld [vmem:[%s6940_s5 + $0x250] ss:$8 sps:$4 sm:$0xff] (%p466_p12)  }
 0x2c4   : >> { %v1883_v5 = vpop.permute.xlu1 %1882 }
 0x2c5   : >> { %v1885_v40 = vpop.permute.xlu0 %1884 }
 0x2c6   : >> { %v1897_v12 = vsel %vm6934_vm9, %v1883_v5, %v1885_v40  ;;  %v4917_v5 = vld [vmem:[%s6940_s5 + $0xc4] ss:$8 sps:$4 sm:$0xff] (%p466_p12)  }
 0x2c7   : >> { %v1910_v62 = vmax.f32 %v1868_v8, %v1897_v12  ;;  %v4895_v8 = vld [vmem:[%s6940_s5 + $0x104] ss:$8 sps:$4 sm:$0xff] (%p466_p12)  }
 0x2c8   : >> { %v1887_v58 = vpop.permute.xlu1 %1886  ;;  %2668 = vmatprep.subr.bf16.mxu1 (%p466_p12), %v4895_v8  ;;  %v4958_v8 = vld [vmem:[%s6940_s5 + $0x244] ss:$8 sps:$4 sm:$0xff] (%p466_p12)  }
 0x2c9   : >> { %1922 = vst [vmem:[%s1921_s24] sm:$0x3f] %v1910_v62  ;;  %v1898_v57 = vsel %vm6935_vm10, %v1885_v40, %v1887_v58  ;;  %2669 = vmatpush1.bf16.msra.mxu1 (%p466_p12), %v4898_v48  ;;  %v4919_v40 = vld [vmem:[%s6940_s5 + $0x1c4] ss:$8 sps:$4 sm:$0xff] (%p466_p12)  }
 0x2ca   : >> { %v1911_v29 = vmax.f32 %v1869_v36, %v1898_v57  ;;  %v4897_v36 = vld [vmem:[%s6940_s5] ss:$8 sps:$4 sm:$0xff] (%p466_p12)   ;;  %v4997_v48 = vld [vmem:[%s6940_s5 + $0x324] ss:$8 sps:$4 sm:$0xff] (%p466_p12)  }
 0x2cb   : > { %2626 = vmatpush1.bf16.msra.mxu0 (%p466_p12), %v4897_v36  ;;  %v4989_v36 = vld [vmem:[%s6940_s5 + $0x330] ss:$8 sps:$4 sm:$0xff] (%p466_p12)  }
 0x2cc   : >> { %1923 = vst [vmem:[%s1921_s24 + $0x8] sm:$0x3f] %v1911_v29  ;;  %2627 = vmatprep.subr.bf16.mxu0 (%p466_p12), %v4899_v27  ;;  %v4921_v29 = vld [vmem:[%s6940_s5 + $0xc0] ss:$8 sps:$4 sm:$0xff] (%p466_p12)  }
 0x2cf   : > { %2628 = vmatpush2.bf16.msra.mxu0 (%p466_p12), %v4903_v31  ;;  %v4956_v31 = vld [vmem:[%s6940_s5 + $0x240] ss:$8 sps:$4 sm:$0xff] (%p466_p12)  }
 0x2f8   : >> { %v1889_v1 = vpop.permute.xlu0 %1888 }
 0x2f9   : >> { %v1899_v22 = vsel %vm6936_vm11, %v1887_v58, %v1889_v1 }
 0x2fa   : >> { %v1912_v60 = vmax.f32 %v1870_v7, %v1899_v22  ;;  %v1891_v23 = vpop.permute.xlu1 %1890  ;;  %v4901_v7 = vld [vmem:[%s6940_s5 + $0x1f4] ss:$8 sps:$4 sm:$0xff] (%p466_p12)  }
 0x2fb   : >> { %v1900_v55 = vsel %vm6937_vm12, %v1889_v1, %v1891_v23  ;;  %2670 = vmatprep.subr.bf16.mxu1 (%p466_p12), %v4901_v7  ;;  %v4922_v1 = vld [vmem:[%s6940_s5 + $0x1c0] ss:$8 sps:$4 sm:$0xff] (%p466_p12)   ;;  %v4923_v22 = vld [vmem:[%s6940_s5 + $0xb4] ss:$8 sps:$4 sm:$0xff] (%p466_p12)  }
 0x2fc   : >> { %1924 = vst [vmem:[%s1921_s24 + $0x10] sm:$0x3f] %v1912_v60  ;;  %v1913_v4 = vmax.f32 %v1871_v24, %v1900_v55  ;;  %v4905_v24 = vld [vmem:[%s6940_s5 + $0xe4] ss:$8 sps:$4 sm:$0xff] (%p466_p12)   ;;  %2671 = vmatpush2.bf16.msra.mxu1 (%p466_p12), %v4904_v56  ;;  %v4925_v55 = vld [vmem:[%s6940_s5 + $0x1b4] ss:$8 sps:$4 sm:$0xff] (%p466_p12)  }
 0x2fd   : >> { %v1893_v53 = vpop.permute.xlu0 %1892  ;;  %2629 = vmatprep.subr.bf16.mxu0 (%p466_p12), %v4905_v24  ;;  %2672 = vmatprep.subr.bf16.mxu1 (%p466_p12), %v4907_v46  ;;  %v4995_v56 = vld [vmem:[%s6940_s5 + $0x320] ss:$8 sps:$4 sm:$0xff] (%p466_p12)   ;;  %v4961_v46 = vld [vmem:[%s6940_s5 + $0x234] ss:$8 sps:$4 sm:$0xff] (%p466_p12)  }
 0x2fe   : >> { %1925 = vst [vmem:[%s1921_s24 + $0x18] sm:$0x3f] %v1913_v4  ;;  %v1901_v15 = vsel %vm6938_vm13, %v1891_v23, %v1893_v53  ;;  %v1895_v17 = vpop.permute.xlu1 %1894  ;;  %468 = sbr.rel (!%p466_p12) target bundleno = 39 (0x27), region = 129  ;;  %2630 = vmatpush2.bf16.msra.mxu0 (%p466_p12), %v4909_v18  ;;  %v4927_v4 = vld [vmem:[%s6940_s5 + $0xb0] ss:$8 sps:$4 sm:$0xff] (%p466_p12)  }
 0x2ff   : >> { %v1914_v45 = vmax.f32 %v1872_v0, %v1901_v15  ;;  %v1902_v20 = vsel %vm6939_vm5, %v1893_v53, %v1895_v17  ;;  %v1916_v51 = vmax.f32 %v1874_v44, %v1895_v17  ;;  %v4910_v0 = vld [vmem:[%s6940_s5 + $0x1e0] ss:$8 sps:$4 sm:$0xff] (%p466_p12)   ;;  %v4916_v44 = vld [vmem:[%s6940_s5 + $0x1d0] ss:$8 sps:$4 sm:$0xff] (%p466_p12)   ;;  %2631 = vmatprep.subr.bf16.mxu0 (%p466_p12), %v4911_v52  ;;  %v4929_v15 = vld [vmem:[%s6940_s5 + $0xa4] ss:$8 sps:$4 sm:$0xff] (%p466_p12)  }
 0x300   : >> { %v1915_v61 = vmax.f32 %v1873_v13, %v1902_v20  ;;  %v4915_v13 = vld [vmem:[%s6940_s5 + $0xd0] ss:$8 sps:$4 sm:$0xff] (%p466_p12)   ;;  %2673 = vmatpush2.bf16.msra.mxu1 (%p466_p12), %v4910_v0  ;;  %v4931_v17 = vld [vmem:[%s6940_s5 + $0x1a4] ss:$8 sps:$4 sm:$0xff] (%p466_p12)   ;;  %v4934_v20 = vld [vmem:[%s6940_s5 + $0x1a0] ss:$8 sps:$4 sm:$0xff] (%p466_p12)  }
 0x301   : >> { %1926 = vst [vmem:[%s1921_s24 + $0x20] sm:$0x3f] %v1914_v45  ;;  %1929 = vst.msk [vmem:[%s1921_s24 + $0x30] sm:$0x3f] %vm1928_vm4, %v1916_v51  ;;  %2674 = vmatprep.subr.bf16.mxu1 (%p466_p12), %v4913_v25  ;;  %v4928_v53 = vld [vmem:[%s6940_s5 + $0x1b0] ss:$8 sps:$4 sm:$0xff] (%p466_p12)  }
 0x302   : >> { %1927 = vst [vmem:[%s1921_s24 + $0x28] sm:$0x3f] %v1915_v61  ;;  %2632 = vmatpush2.bf16.msra.mxu0 (%p466_p12), %v4915_v13  ;;  %v4933_v45 = vld [vmem:[%s6940_s5 + $0xa0] ss:$8 sps:$4 sm:$0xff] (%p466_p12)   ;;  %v4935_v51 = vld [vmem:[%s6940_s5 + $0x94] ss:$8 sps:$4 sm:$0xff] (%p466_p12)  }
 0x303   : > { %2633 = vmatprep.subr.bf16.mxu0 %v4917_v5  ;;  %v4937_v61 = vld [vmem:[%s6940_s5 + $0x194] ss:$8 sps:$4 sm:$0xff]   ;;  %v4959_v0 = vld [vmem:[%s6940_s5 + $0x230] ss:$8 sps:$4 sm:$0xff]   ;;  %v4964_v25 = vld [vmem:[%s6940_s5 + $0x224] ss:$8 sps:$4 sm:$0xff]  }
 0x304   : > { %2675 = vmatpush2.bf16.msra.mxu1 %v4916_v44  ;;  %v5003_v18 = vld [vmem:[%s6940_s5 + $0x314] ss:$8 sps:$4 sm:$0xff]   ;;  %v5001_v52 = vld [vmem:[%s6940_s5 + $0x310] ss:$8 sps:$4 sm:$0xff]   ;;  %v5009_v13 = vld [vmem:[%s6940_s5 + $0x304] ss:$8 sps:$4 sm:$0xff]  }
 0x305   : > { %2676 = vmatprep.subr.bf16.mxu1 %v4919_v40  ;;  %v4962_v44 = vld [vmem:[%s6940_s5 + $0x220] ss:$8 sps:$4 sm:$0xff]  }
 0x306   : > { %2634 = vmatpush2.bf16.msra.mxu0 %v4921_v29  ;;  %v5007_v5 = vld [vmem:[%s6940_s5 + $0x300] ss:$8 sps:$4 sm:$0xff]   ;;  %v4970_v29 = vld [vmem:[%s6940_s5 + $0x204] ss:$8 sps:$4 sm:$0xff]  }
 0x307   : > { %2635 = vmatprep.subr.bf16.mxu0 %v4923_v22  ;;  %v4973_v22 = vld [vmem:[%s6940_s5 + $0x2f4] ss:$8 sps:$4 sm:$0xff]  }
 0x308   : > { %2677 = vmatpush2.bf16.msra.mxu1 %v4922_v1  ;;  %v4968_v1 = vld [vmem:[%s6940_s5 + $0x200] ss:$8 sps:$4 sm:$0xff]  }
 0x309   : > { %v1931_v12 = vld [vmem:[#allocation4 + $0x8] sm:$0xff]  ;;  %v1938_v62 = vld [vmem:[#allocation4 + $0x40] sm:$0xff]  ;;  %v1933_v58 = vld [vmem:[#allocation4 + $0x18] sm:$0xff]  ;;  %2678 = vmatprep.subr.bf16.mxu1 %v4925_v55 }
 0x30a   : > { %v1940_v57 = vld [vmem:[#allocation4 + $0x50] sm:$0xff]  ;;  %v1945_v60 = vpack.c.bf16 %v1938_v62, %v1931_v12  ;;  %2636 = vmatpush2.bf16.msra.mxu0 %v4927_v4  ;;  %v1930_v16 = vld [vmem:[#allocation4] sm:$0xff]  ;;  %v1937_v49 = vld [vmem:[#allocation4 + $0x38] sm:$0xff] }
 0x30b   : > { %v1947_v23 = vpack.c.bf16 %v1940_v57, %v1933_v58  ;;  %2637 = vmatprep.subr.bf16.mxu0 %v4929_v15  ;;  %v1932_v35 = vld [vmem:[#allocation4 + $0x10] sm:$0xff]  ;;  %v1939_v37 = vld [vmem:[#allocation4 + $0x48] sm:$0xff]  ;;  %v1944_v47 = vpack.c.bf16 %v1937_v49, %v1930_v16  ;;  %v1942_v7 = vld [vmem:[#allocation4 + $0x60] sm:$0xff] }
 0x30c   : > { %2643 = vmatprep.mubr.bf16.mxu0 %v1945_v60  ;;  %2679 = vmatpush2.bf16.msra.mxu1 %v4928_v53  ;;  %v1946_v10 = vpack.c.bf16 %v1939_v37, %v1932_v35  ;;  %v1935_v27 = vld [vmem:[#allocation4 + $0x28] sm:$0xff]  ;;  %v1936_v40 = vld [vmem:[#allocation4 + $0x30] sm:$0xff]  ;;  %v4974_v55 = vld [vmem:[%s6940_s5 + $0x2e0] ss:$8 sps:$4 sm:$0xff]  }
 0x30d   : > { %2686 = vmatprep.mubr.bf16.mxu1 %v1947_v23  ;;  %2680 = vmatprep.subr.bf16.mxu1 %v4931_v17  ;;  %v1949_v24 = vpack.c.bf16 %v1942_v7, %v1935_v27  ;;  %v1943_v12 = vld [vmem:[#allocation4 + $0x68] sm:$0xff]  ;;  %v4967_v62 = vld [vmem:[%s6940_s5 + $0x214] ss:$8 sps:$4 sm:$0xff]   ;;  %v4986_v17 = vld [vmem:[%s6940_s5 + $0x2c0] ss:$8 sps:$4 sm:$0xff]  }
 0x30e   : > { %2638 = vmatpush2.bf16.msra.mxu0 %v4933_v45  ;;  %v1950_v58 = vpack.c.bf16 %v1943_v12, %v1936_v40  ;;  %v4965_v57 = vld [vmem:[%s6940_s5 + $0x210] ss:$8 sps:$4 sm:$0xff]   ;;  %v4976_v23 = vld [vmem:[%s6940_s5 + $0x2e4] ss:$8 sps:$4 sm:$0xff]   ;;  %v4982_v4 = vld [vmem:[%s6940_s5 + $0x2d4] ss:$8 sps:$4 sm:$0xff]  }
 0x30f   : > { %2639 = vmatprep.subr.bf16.mxu0 %v4935_v51  ;;  %v4971_v60 = vld [vmem:[%s6940_s5 + $0x2f0] ss:$8 sps:$4 sm:$0xff]   ;;  %v4988_v15 = vld [vmem:[%s6940_s5 + $0x2c4] ss:$8 sps:$4 sm:$0xff]   ;;  %v4994_v45 = vld [vmem:[%s6940_s5 + $0x2b4] ss:$8 sps:$4 sm:$0xff]  }
 0x310   : > { %2681 = vmatpush2.bf16.msra.mxu1 %v4934_v20  ;;  %v4980_v53 = vld [vmem:[%s6940_s5 + $0x2d0] ss:$8 sps:$4 sm:$0xff]   ;;  %v5000_v51 = vld [vmem:[%s6940_s5 + $0x2a4] ss:$8 sps:$4 sm:$0xff]  }
 0x311   : > { %2682 = vmatprep.subr.bf16.mxu1 %v4937_v61  ;;  %v4992_v20 = vld [vmem:[%s6940_s5 + $0x2b0] ss:$8 sps:$4 sm:$0xff]   ;;  %v4998_v61 = vld [vmem:[%s6940_s5 + $0x2a0] ss:$8 sps:$4 sm:$0xff]  }
 0x312   : > { %2640 = vmatpush2.bf16.msra.mxu0 %v4939_v63  ;;  %v5006_v63 = vld [vmem:[%s6940_s5 + $0x294] ss:$8 sps:$4 sm:$0xff]  }
 0x313   : > { %2641 = vmatprep.subr.bf16.mxu0 %v4941_v14  ;;  %v1934_v14 = vld [vmem:[#allocation4 + $0x20] sm:$0xff] }
 0x314   : > { %2683 = vmatpush2.bf16.msra.mxu1 %v4940_v42  ;;  %v5004_v42 = vld [vmem:[%s6940_s5 + $0x290] ss:$8 sps:$4 sm:$0xff]  }
 0x315   : > { %2684 = vmatprep.subr.bf16.mxu1 %v4943_v28  ;;  %v1941_v28 = vld [vmem:[#allocation4 + $0x58] sm:$0xff] }
 0x316   : > { %2642 = vmatpush2.bf16.msra.mxu0 %v4945_v3  ;;  %v1948_v3 = vpack.c.bf16 %v1941_v28, %v1934_v14 }
 0x317   : > { %2697 = vmatprep.subr.bf16.mxu0 %v4949_v21 }
 0x318   : > { %2685 = vmatpush2.bf16.msra.mxu1 %v4946_v11 }
 0x319   : > { %2744 = vmatprep.subr.bf16.mxu1 %v2609_v38  ;;  %2644 = vmatmul.mubr.bf16.vlgmr.msra.gmra.mxu0 %v1944_v47 }
 0x31a   : > { %2698 = vmatpush1.bf16.msra.mxu0 %v4947_v33  ;;  %2729 = vmatprep.mubr.bf16.mxu0 %v1949_v24 }
 0x31b   : > { %2687 = vmatmul.mubr.bf16.vlgmr.msra.gmra.mxu1 %v1946_v10  ;;  %2699 = vmatprep.subr.bf16.mxu0 %v4952_v19 }
 0x31c   : > { %2745 = vmatpush1.bf16.msra.mxu1 %v2606_v41  ;;  %2772 = vmatprep.mubr.bf16.mxu1 %v5219_v34 }
 0x31d   : > { %2746 = vmatprep.subr.bf16.mxu1 %v4985_v26 }
 0x31e   : > { %2700 = vmatpush1.bf16.msra.mxu0 %v4950_v39 }
 0x31f   : > { %2701 = vmatprep.subr.bf16.mxu0 %v4955_v2 }
 0x320   : > { %2747 = vmatpush1.bf16.msra.mxu1 %v4983_v50 }
 0x321   : > { %2748 = vmatprep.subr.bf16.mxu1 %v4991_v30 }
 0x322   : > { %2702 = vmatpush1.bf16.msra.mxu0 %v4953_v54 }
 0x323   : > { %2703 = vmatprep.subr.bf16.mxu0 %v4958_v8 }
 0x324   : > { %2749 = vmatpush1.bf16.msra.mxu1 %v4989_v36 }
 0x325   : > { %2750 = vmatprep.subr.bf16.mxu1 %v4997_v48 }
 0x326   : > { %2704 = vmatpush1.bf16.msra.mxu0 %v4956_v31 }
 0x327   : > { %2705 = vmatprep.subr.bf16.mxu0 %v4961_v46 }
 0x328   : > { %2751 = vmatpush1.bf16.msra.mxu1 %v4995_v56 }
 0x329   : > { %2752 = vmatprep.subr.bf16.mxu1 %v5003_v18 }
 0x32a   : > { %2706 = vmatpush1.bf16.msra.mxu0 %v4959_v0 }
 0x32b   : > { %2707 = vmatprep.subr.bf16.mxu0 %v4964_v25 }
 0x32c   : > { %2753 = vmatpush1.bf16.msra.mxu1 %v5001_v52 }
 0x32d   : > { %2754 = vmatprep.subr.bf16.mxu1 %v5009_v13 }
 0x32e   : > { %2708 = vmatpush1.bf16.msra.mxu0 %v4962_v44 }
 0x32f   : > { %2709 = vmatprep.subr.bf16.mxu0 %v4967_v62 }
 0x330   : > { %2755 = vmatpush1.bf16.msra.mxu1 %v5007_v5 }
 0x332   : > { %2710 = vmatpush1.bf16.msra.mxu0 %v4965_v57 }
 0x333   : > { %4508 = vmatmul.mubr.msk.bf16.vlgmr.msra.gmra.mxu1 %vm2597_vm15, %v1950_v58  ;;  %2711 = vmatprep.subr.bf16.mxu0 %v4970_v29 }
 0x336   : > { %2712 = vmatpush1.bf16.msra.mxu0 %v4968_v1 }
 0x337   : > { %2713 = vmatprep.subr.bf16.mxu0 %v4973_v22 }
 0x33a   : > { %2714 = vmatpush2.bf16.msra.mxu0 %v4971_v60 }
 0x33b   : > { %2715 = vmatprep.subr.bf16.mxu0 %v4976_v23 }
 0x33e   : > { %2716 = vmatpush2.bf16.msra.mxu0 %v4974_v55 }
 0x33f   : > { %2717 = vmatprep.subr.bf16.mxu0 %v4982_v4 }
 0x342   : > { %2718 = vmatpush2.bf16.msra.mxu0 %v4980_v53 }
 0x343   : > { %2719 = vmatprep.subr.bf16.mxu0 %v4988_v15 }
 0x346   : > { %2720 = vmatpush2.bf16.msra.mxu0 %v4986_v17 }
 0x347   : > { %2721 = vmatprep.subr.bf16.mxu0 %v4994_v45 }
 0x34a   : > { %2722 = vmatpush2.bf16.msra.mxu0 %v4992_v20 }
 0x34b   : > { %2723 = vmatprep.subr.bf16.mxu0 %v5000_v51 }
 0x34e   : > { %2724 = vmatpush2.bf16.msra.mxu0 %v4998_v61 }
 0x34f   : > { %2725 = vmatprep.subr.bf16.mxu0 %v5006_v63 }
 0x352   : > { %2726 = vmatpush2.bf16.msra.mxu0 %v5004_v42 }
 0x353   : > { %2727 = vmatprep.subr.bf16.mxu0 %v5012_v59 }
 0x356   : > { %2728 = vmatpush2.bf16.msra.mxu0 %v5010_v6 }
 0x359   : > { %2730 = vmatmul.mubr.bf16.vlgmr.msra.gmra.mxu0 %v1948_v3 }
 0x3d9   : > { %v2645_v16 = vpop.f32.mrf.mxu0 }
 0x3db   : > { %v2688_v11 = vpop.f32.mrf.mxu1  ;;  %v2647_v35 = vpop.f32.mrf.mxu0 }
 0x3dc   : > { %v2689_v38 = vadd.f32 %v2688_v11, %v2645_v16 }
 0x3dd   : > { %v2690_v49 = vpop.f32.mrf.mxu1  ;;  %v2649_v9 = vpop.f32.mrf.mxu0 }
 0x3de   : > { %v2691_v33 = vadd.f32 %v2690_v49, %v2647_v35 }
 0x3df   : > { %v2692_v32 = vpop.f32.mrf.mxu1  ;;  %v2651_v21 = vpop.f32.mrf.mxu0 }
 0x3e0   : > { %v2693_v26 = vadd.f32 %v2692_v32, %v2649_v9 }
 0x3e1   : > { %v2694_v37 = vpop.f32.mrf.mxu1 }
 0x3e2   : > { %v2695_v54 = vadd.f32 %v2694_v37, %v2651_v21 }
 0x3f3   : > { %v2774_v43 = vpop.f32.mrf.mxu1 }
 0x3f5   : > { %v2776_v47 = vpop.f32.mrf.mxu1 }
 0x3f7   : > { %v2778_v50 = vpop.f32.mrf.mxu1 }
 0x3f9   : > { %v2780_v31 = vpop.f32.mrf.mxu1 }
 0x419   : > { %v2731_v10 = vpop.f32.mrf.mxu0 }
 0x41a   : > { %v2732_v19 = vadd.f32 %v2731_v10, %v2689_v38 }
 0x41b   : > { %v2733_v41 = vpop.f32.mrf.mxu0 }
 0x41c   : > { %v2775_v39 = vadd.f32 %v2774_v43, %v2732_v19  ;;  %v2734_v2 = vadd.f32 %v2733_v41, %v2691_v33 }
 0x41d   : > { %v2735_v30 = vpop.f32.mrf.mxu0 }
 0x41e   : > { %2783 = vst [vmem:[#allocation5] sm:$0xff] %v2775_v39  ;;  %v2777_v8 = vadd.f32 %v2776_v47, %v2734_v2  ;;  %v2736_v36 = vadd.f32 %v2735_v30, %v2693_v26 }
 0x41f   : > { %v2737_v48 = vpop.f32.mrf.mxu0 }
 0x420   : > { %2785 = vst.msk [vmem:[#allocation5 + $0x8] sm:$0xff] %vm2784_vm6, %v2777_v8  ;;  %v2779_v27 = vadd.f32 %v2778_v50, %v2736_v36  ;;  %v2738_v7 = vadd.f32 %v2737_v48, %v2695_v54 }
 0x422   : > { %2786 = vst [vmem:[#allocation5 + $0x10] sm:$0xff] %v2779_v27  ;;  %v2781_v56 = vadd.f32 %v2780_v31, %v2738_v7 }
 0x424   : > { %2787 = vst.msk [vmem:[#allocation5 + $0x18] sm:$0xff] %vm2784_vm6, %v2781_v56 }
 0x425 LB: >> { %s4509_s24 = sshll.u32 %s5195_s17, 3  ;;  %vm2811_vm7 = vcmask 64516   ;;  %s5220_s20 = smov 98   ;;  %v5066_v52 = vld [vmem:[%s6847_s3 + $0x4] ss:$8 sps:$4 sm:$0xff]   ;;  %v5244_v44 = vmov 0   ;;  %s5195_s17 = sphi %s6376_s17, %s2793_s17  }
 0x426   : >> { %s2795_s21 = sshra.s32 %s4509_s24, 3  ;;  %vm6383_vm8 = vmor %vm2811_vm7, %vm498_vm1  ;;  %s5221_s23 = smov 96   ;;  %4542 = vmatprep.mubr.msk.bf16.mxu0 %vm1637_vm3, %v5066_v52  ;;  %v3009_v25 = vld [vmem:[%s6848_s4] sm:$0xff]  ;;  %v3010_v13 = vld [vmem:[%s6848_s4 + $0x8] sm:$0xff]  ;;  %5013 = vset.pattern.permute.xlu0 %v5244_v44  ;;  %vm2894_vm9 = vcmask 801792   ;;  %vm6943_vm10 = vcmask 785408  }
 0x427   : >> { %s4605_s15 = sshll.u32 %s2795_s21, 4  ;;  %s5222_s1 = smov 97   ;;  %5014 = vset.pattern.permute.xlu1 %v5244_v44  ;;  %vm2901_vm11 = vcmask 793600   ;;  %vm2915_vm12 = vcmask 703488   ;;  %vm2887_vm13 = vcmask 809984   ;;  %vm2880_vm4 = vcmask 818176  }
 0x428   : >> { %s2799_s16 = scalar_lea.vmem [#allocation5], %s4605_s15  ;;  %s5223_s30 = smov 86   ;;  %vm2873_vm5 = vcmask 900096   ;;  %vm2866_vm14 = vcmask 908288   ;;  %vm2859_vm15 = vcmask 916480   ;;  %vm2852_vm7 = vcmask 924672  }
 0x429   : >> { %s5224_s2 = smov 99   ;;  %s5225_s0 = smov 100   ;;  %v5064_v0 = vld [vmem:[%s6847_s3] ss:$8 sps:$4 sm:$0xff]  }
 0x42a   : >> { %s5226_s24 = smov 110   ;;  %s5227_s21 = smov 111  }
 0x42b   : >> { %v2800_v24 = vld [vmem:[%s2799_s16] sm:$0xff]  ;;  %v2801_v46 = vld [vmem:[%s2799_s16 + $0x8] sm:$0xff]  ;;  %s5228_s15 = smov 112   ;;  %s5229_s16 = smov 113  }
 0x42c   : >> { %v4606_v18 = vpack.c.bf16 %v2801_v46, %v2800_v24 }
 0x42e   : >> { %2891 = vrot.lane.b32.xlu1 %v4606_v18, %s5220_s20  ;;  %2905 = vrot.lane.b32.xlu0 %v4606_v18, %s5221_s23  ;;  %2813 = vst.msk [vmem:[#allocation3] sm:$0xff] %vm6383_vm8, %v4606_v18  ;;  %s6884_s20 = smov 114   ;;  %s5231_s23 = smov 124  }
 0x432   : >> { %2898 = vrot.lane.b32.xlu1 %v4606_v18, %s5222_s1  ;;  %2912 = vrot.lane.b32.xlu0 %v4606_v18, %s5223_s30  ;;  %s5232_s1 = smov 125   ;;  %s5233_s30 = smov 126  }
 0x436   : >> { %2884 = vrot.lane.b32.xlu1 %v4606_v18, %s5224_s2  ;;  %2877 = vrot.lane.b32.xlu0 %v4606_v18, %s5225_s0  ;;  %s6886_s2 = smov 127   ;;  %s5235_s0 = smov 68  }
 0x43a   : >> { %2870 = vrot.lane.b32.xlu1 %v4606_v18, %s5226_s24  ;;  %2863 = vrot.lane.b32.xlu0 %v4606_v18, %s5227_s21  ;;  %s5236_s24 = smov 69   ;;  %s5237_s21 = smov 70  }
 0x43e   : >> { %2856 = vrot.lane.b32.xlu1 %v4606_v18, %s5228_s15  ;;  %2849 = vrot.lane.b32.xlu0 %v4606_v18, %s5229_s16  ;;  %s5238_s15 = smov 71   ;;  %s5239_s16 = smov 72  }
 0x442   : >> { %2842 = vrot.lane.b32.xlu1 %v4606_v18, %s6884_s20  ;;  %2835 = vrot.lane.b32.xlu0 %v4606_v18, %s5231_s23  ;;  %s5240_s20 = smov 82   ;;  %s5241_s23 = smov 83  }
 0x446   : >> { %2828 = vrot.lane.b32.xlu1 %v4606_v18, %s5232_s1  ;;  %2821 = vrot.lane.b32.xlu0 %v4606_v18, %s5233_s30  ;;  %s5242_s1 = smov 84   ;;  %s5243_s30 = smov 85  }
 0x44a   : >> { %2814 = vrot.lane.b32.xlu0 %v4606_v18, %s6886_s2  ;;  %2975 = vrot.lane.b32.xlu1 %v4606_v18, %s5235_s0 }
 0x44e   : >> { %2968 = vrot.lane.b32.xlu1 %v4606_v18, %s5236_s24  ;;  %2961 = vrot.lane.b32.xlu0 %v4606_v18, %s5237_s21  ;;  %s6950_s24 = smov 114   ;;  %s4552_s21 = sshll.u32 %s5195_s17, 4 }
 0x44f   : >> { %s2793_s17 = sadd.s32 1, %s5195_s17  }
 0x450   : >> { %p2790_p13 = scmp.ge.s32.totalorder %s2793_s17, 2  }
 0x451   : > { %s5252_s2 = smov (%p2790_p13), 97   ;;  %s5261_s17 = smov (%p2790_p13), 119  }
 0x452   : >> { %2954 = vrot.lane.b32.xlu1 %v4606_v18, %s5238_s15  ;;  %2947 = vrot.lane.b32.xlu0 %v4606_v18, %s5239_s16  ;;  %s3369_s15 = scalar_lea.vmem [#allocation6], %s4552_s21  ;;  %s5253_s21 = smov (%p2790_p13), 72  }
 0x453   : > { %s5262_s5 = smov (%p2790_p13), 69   ;;  %s6953_s16 = scalar_lea.vmem (%p2790_p13), [#allocation8], %s5389_s22 }
 0x456   : >> { %2940 = vrot.lane.b32.xlu1 %v4606_v18, %s5240_s20  ;;  %2933 = vrot.lane.b32.xlu0 %v4606_v18, %s5241_s23  ;;  %s6947_s23 = smov 127   ;;  %s5251_s20 = smov (%p2790_p13), 100  }
 0x45a   : >> { %2926 = vrot.lane.b32.xlu1 %v4606_v18, %s5242_s1  ;;  %2919 = vrot.lane.b32.xlu0 %v4606_v18, %s5243_s30  ;;  %s5249_s1 = smov (%p2790_p13), 25   ;;  %s5250_s30 = smov (%p2790_p13), 125  }
 0x45e   : >> { %3013 = vperm.xlu0 %5013, %v3009_v25   ;;  %3018 = vperm.xlu1 %5014, %v3010_v13  }
 0x4a0   : >> { %v2892_v5 = vpop.permute.xlu1 %2891  ;;  %v2906_v40 = vpop.permute.xlu0 %2905 }
 0x4a1   : >> { %v2893_v12 = vrot.slane %v2892_v5, 4  ;;  %v2907_v62 = vrot.slane %v2906_v40, 4 }
 0x4a3   : >> { %v2895_v58 = vsel %vm2894_vm9, %v2892_v5, %v2893_v12  ;;  %v2909_v57 = vsel %vm6943_vm10, %v2906_v40, %v2907_v62  ;;  %vm2845_vm9 = vcmask 932864   ;;  %vm6944_vm10 = vcmask 1014784  }
 0x4a4   : >> { %2897 = vst.msk [vmem:[#allocation3 + $0x60] sm:$0xff] %vm6383_vm8, %v2895_v58  ;;  %2911 = vst.msk [vmem:[#allocation3 + $0x70] sm:$0xff] %vm6383_vm8, %v2909_v57  ;;  %v2899_v29 = vpop.permute.xlu1 %2898  ;;  %v2913_v1 = vpop.permute.xlu0 %2912 }
 0x4a5   : >> { %v2900_v22 = vrot.slane %v2899_v29, 4  ;;  %v2914_v60 = vrot.slane %v2913_v1, 4 }
 0x4a7   : >> { %v2902_v23 = vsel %vm2901_vm11, %v2899_v29, %v2900_v22  ;;  %v2916_v55 = vsel %vm2915_vm12, %v2913_v1, %v2914_v60  ;;  %vm6945_vm11 = vcmask 1022976   ;;  %vm6946_vm12 = vcmask 1039360  }
 0x4a8   : >> { %2904 = vst.msk [vmem:[#allocation3 + $0x68] sm:$0xff] %vm6383_vm8, %v2902_v23  ;;  %2918 = vst.msk [vmem:[#allocation3 + $0x78] sm:$0xff] %vm6383_vm8, %v2916_v55  ;;  %v2885_v4 = vpop.permute.xlu1 %2884  ;;  %v2878_v53 = vpop.permute.xlu0 %2877 }
 0x4a9   : >> { %v2886_v15 = vrot.slane %v2885_v4, 4  ;;  %v2879_v17 = vrot.slane %v2878_v53, 4 }
 0x4ab   : >> { %v2888_v45 = vsel %vm2887_vm13, %v2885_v4, %v2886_v15  ;;  %v2881_v20 = vsel %vm2880_vm4, %v2878_v53, %v2879_v17  ;;  %v2998_v14 = vld [vmem:[#allocation3 + $0x70] sm:$0xff]  ;;  %v2996_v38 = vld [vmem:[#allocation3 + $0x60] sm:$0xff]  ;;  %vm2971_vm13 = vcmask 564224   ;;  %vm2964_vm4 = vcmask 572416  }
 0x4ac   : >> { %2890 = vst.msk [vmem:[#allocation3 + $0x58] sm:$0xff] %vm6383_vm8, %v2888_v45  ;;  %2883 = vst.msk [vmem:[#allocation3 + $0x50] sm:$0xff] %vm6383_vm8, %v2881_v20  ;;  %v2871_v51 = vpop.permute.xlu1 %2870  ;;  %v2864_v61 = vpop.permute.xlu0 %2863 }
 0x4ad   : >> { %v2872_v63 = vrot.slane %v2871_v51, 4  ;;  %v2865_v42 = vrot.slane %v2864_v61, 4 }
 0x4af   : >> { %v2874_v59 = vsel %vm2873_vm5, %v2871_v51, %v2872_v63  ;;  %v2867_v6 = vsel %vm2866_vm14, %v2864_v61, %v2865_v42  ;;  %v2999_v28 = vld [vmem:[#allocation3 + $0x78] sm:$0xff]  ;;  %v2997_v9 = vld [vmem:[#allocation3 + $0x68] sm:$0xff]  ;;  %vm2957_vm5 = vcmask 580608   ;;  %vm2943_vm14 = vcmask 670720  }
 0x4b0   : >> { %v5035_v3 = vld [vmem:[#allocation3 + $0x74] ss:$8 sps:$4 sm:$0xff]   ;;  %2876 = vst.msk [vmem:[#allocation3 + $0x48] sm:$0xff] %vm6383_vm8, %v2874_v59  ;;  %2869 = vst.msk [vmem:[#allocation3 + $0x40] sm:$0xff] %vm6383_vm8, %v2867_v6  ;;  %v2857_v11 = vpop.permute.xlu1 %2856  ;;  %v2850_v16 = vpop.permute.xlu0 %2849  ;;  %v4529_v49 = vcombine.low %v2998_v14, %v2999_v28  ;;  %v5037_v37 = vld [vmem:[#allocation3 + $0x64] ss:$8 sps:$4 sm:$0xff]   ;;  %v4527_v19 = vcombine.low %v2996_v38, %v2997_v9 }
 0x4b1   : >> { %v2858_v35 = vrot.slane %v2857_v11, 4  ;;  %3165 = vmatprep.subr.bf16.mxu0 %v5035_v3  ;;  %v2851_v32 = vrot.slane %v2850_v16, 4 }
 0x4b2   : >> { %3166 = vmatpush1.bf16.msra.mxu0 %v4529_v49 }
 0x4b3   : >> { %v2860_v43 = vsel %vm2859_vm15, %v2857_v11, %v2858_v35  ;;  %v2853_v21 = vsel %vm2852_vm7, %v2850_v16, %v2851_v32  ;;  %3167 = vmatprep.subr.bf16.mxu0 %v5037_v37  ;;  %v5039_v47 = vld [vmem:[#allocation3 + $0x54] ss:$8 sps:$4 sm:$0xff]   ;;  %vm2936_vm15 = vcmask 678912   ;;  %v2984_v35 = vld [vmem:[#allocation3] sm:$0xff]  ;;  %vm6888_vm7 = vcmask 687104  }
 0x4b4   : >> { %2862 = vst.msk [vmem:[#allocation3 + $0x38] sm:$0xff] %vm6383_vm8, %v2860_v43  ;;  %2855 = vst.msk [vmem:[#allocation3 + $0x30] sm:$0xff] %vm6383_vm8, %v2853_v21  ;;  %v2843_v10 = vpop.permute.xlu1 %2842  ;;  %v2836_v33 = vpop.permute.xlu0 %2835  ;;  %v2994_v39 = vld [vmem:[#allocation3 + $0x50] sm:$0xff]  ;;  %v2995_v2 = vld [vmem:[#allocation3 + $0x58] sm:$0xff] }
 0x4b5   : >> { %v2844_v41 = vrot.slane %v2843_v10, 4  ;;  %v2837_v26 = vrot.slane %v2836_v33, 4  ;;  %v4525_v48 = vcombine.low %v2994_v39, %v2995_v2 }
 0x4b6   : >> { %3168 = vmatpush1.bf16.msra.mxu0 %v4527_v19 }
 0x4b7   : >> { %v2846_v50 = vsel %vm2845_vm9, %v2843_v10, %v2844_v41  ;;  %v2839_v30 = vsel %vm6944_vm10, %v2836_v33, %v2837_v26  ;;  %3169 = vmatprep.subr.bf16.mxu0 %v5039_v47  ;;  %v5041_v54 = vld [vmem:[#allocation3 + $0x44] ss:$8 sps:$4 sm:$0xff]   ;;  %vm2922_vm10 = vcmask 695296  }
 0x4b8   : >> { %2848 = vst.msk [vmem:[#allocation3 + $0x28] sm:$0xff] %vm6383_vm8, %v2846_v50  ;;  %2841 = vst.msk [vmem:[#allocation3 + $0x20] sm:$0xff] %vm6383_vm8, %v2839_v30  ;;  %v2829_v8 = vpop.permute.xlu1 %2828  ;;  %v2822_v36 = vpop.permute.xlu0 %2821  ;;  %v2992_v31 = vld [vmem:[#allocation3 + $0x40] sm:$0xff]  ;;  %v2993_v56 = vld [vmem:[#allocation3 + $0x48] sm:$0xff] }
 0x4b9   : >> { %v2830_v27 = vrot.slane %v2829_v8, 4  ;;  %v2823_v7 = vrot.slane %v2822_v36, 4  ;;  %v4523_v25 = vcombine.low %v2992_v31, %v2993_v56 }
 0x4ba   : >> { %3170 = vmatpush1.bf16.msra.mxu0 %v4525_v48 }
 0x4bb   : >> { %v2832_v24 = vsel %vm6945_vm11, %v2829_v8, %v2830_v27  ;;  %v2825_v46 = vsel %vm527_vm0, %v2822_v36, %v2823_v7  ;;  %3171 = vmatprep.subr.bf16.mxu0 %v5041_v54  ;;  %v5043_v18 = vld [vmem:[#allocation3 + $0x34] ss:$8 sps:$4 sm:$0xff]   ;;  %vm5247_vm11 = vmmov 0   ;;  %vm3407_vm0 = vcmask (%p2790_p13), 197632  }
 0x4bc   : >> { %2834 = vst.msk [vmem:[#allocation3 + $0x18] sm:$0xff] %vm6383_vm8, %v2832_v24  ;;  %2827 = vst.msk [vmem:[#allocation3 + $0x10] sm:$0xff] %vm6383_vm8, %v2825_v46  ;;  %v2815_v52 = vpop.permute.xlu0 %2814  ;;  %v2976_v13 = vpop.permute.xlu1 %2975  ;;  %v2990_v5 = vld [vmem:[#allocation3 + $0x30] sm:$0xff]  ;;  %v2991_v40 = vld [vmem:[#allocation3 + $0x38] sm:$0xff] }
 0x4bd   : >> { %v2816_v44 = vrot.slane %v2815_v52, 4  ;;  %v2977_v12 = vrot.slane %v2976_v13, 4  ;;  %v4521_v29 = vcombine.low %v2990_v5, %v2991_v40 }
 0x4be   : >> { %3172 = vmatpush1.bf16.msra.mxu0 %v4523_v25 }
 0x4bf   : >> { %v2818_v62 = vsel %vm6946_vm12, %v2815_v52, %v2816_v44  ;;  %3173 = vmatprep.subr.bf16.mxu0 %v5043_v18  ;;  %v2979_v58 = vsel %vm2784_vm6, %v2976_v13, %v2977_v12  ;;  %v5045_v57 = vld [vmem:[#allocation3 + $0x24] ss:$8 sps:$4 sm:$0xff]   ;;  %vm3433_vm6 = vcmask (%p2790_p13), 607632  }
 0x4c0   : >> { %2820 = vst.msk [vmem:[#allocation3 + $0x8] sm:$0xff] %vm6383_vm8, %v2818_v62  ;;  %2981 = vst.msk [vmem:[#allocation3 + $0xc0] sm:$0xff] %vm6383_vm8, %v2979_v58  ;;  %v2969_v1 = vpop.permute.xlu1 %2968  ;;  %v2962_v22 = vpop.permute.xlu0 %2961  ;;  %v2988_v60 = vld [vmem:[#allocation3 + $0x20] sm:$0xff]  ;;  %v2989_v23 = vld [vmem:[#allocation3 + $0x28] sm:$0xff] }
 0x4c1   : >> { %v2970_v55 = vrot.slane %v2969_v1, 4  ;;  %v2963_v4 = vrot.slane %v2962_v22, 4  ;;  %v4519_v45 = vcombine.low %v2988_v60, %v2989_v23  ;;  %v5246_v60 = vmov 65535  }
 0x4c2   : >> { %3174 = vmatpush1.bf16.msra.mxu0 %v4521_v29  ;;  %v5245_v29 = vmov 0.0   ;;  %v3322_v23 = vsel %vm498_vm1, 4294967295, %v5246_v60 }
 0x4c3   : >> { %3175 = vmatprep.subr.bf16.mxu0 %v5045_v57  ;;  %v2972_v53 = vsel %vm2971_vm13, %v2969_v1, %v2970_v55  ;;  %v2965_v15 = vsel %vm2964_vm4, %v2962_v22, %v2963_v4  ;;  %v5047_v17 = vld [vmem:[#allocation3 + $0x14] ss:$8 sps:$4 sm:$0xff]   ;;  %4654 = vmatprep.subr.bf16.mxu1 %v5245_v29  ;;  %v3323_v55 = vsel %vm2601_vm2, %v3322_v23, 0  ;;  %vm3318_vm13 = vcmask 990208  }
 0x4c4   : >> { %2974 = vst.msk [vmem:[#allocation3 + $0xb8] sm:$0xff] %vm6383_vm8, %v2972_v53  ;;  %2967 = vst.msk [vmem:[#allocation3 + $0xb0] sm:$0xff] %vm6383_vm8, %v2965_v15  ;;  %v2955_v20 = vpop.permute.xlu1 %2954  ;;  %v2948_v51 = vpop.permute.xlu0 %2947  ;;  %v2986_v61 = vld [vmem:[#allocation3 + $0x10] sm:$0xff]  ;;  %v2987_v63 = vld [vmem:[#allocation3 + $0x18] sm:$0xff]  ;;  %4670 = vmatprep.mubr.msk.bf16.mxu1 %vm5247_vm11, %v5245_v29  ;;  %vm3370_vm4 = vcmask 203776   ;;  %vm3419_vm2 = vcmask (%p2790_p13), 402632  }
 0x4c5   : >> { %v2956_v42 = vrot.slane %v2955_v20, 4  ;;  %v2949_v59 = vrot.slane %v2948_v51, 4  ;;  %v4517_v3 = vcombine.low %v2986_v61, %v2987_v63  ;;  %v5067_v57 = vld [vmem:[%s6850_s6 + $0x38] sm:$0x1f]   ;;  %v5068_v15 = vld [vmem:[%s6850_s6 + $0x30] sm:$0xff]   ;;  %v5073_v61 = vld [vmem:[%s6850_s6 + $0x8] sm:$0xff]  }
 0x4c6   : >> { %3176 = vmatpush1.bf16.msra.mxu0 %v4519_v45  ;;  %v3325_v53 = vand.u32 %v5067_v57, %v3323_v55  ;;  %v5070_v45 = vld [vmem:[%s6850_s6 + $0x20] sm:$0xff]   ;;  %vm3473_vm11 = vcmask (%p2790_p13), 1017632  }
 0x4c7   : >> { %3177 = vmatprep.subr.bf16.mxu0 %v5047_v17  ;;  %v2958_v6 = vsel %vm2957_vm5, %v2955_v20, %v2956_v42  ;;  %v2951_v14 = vsel %vm1637_vm3, %v2948_v51, %v2949_v59  ;;  %v5049_v28 = vld [vmem:[#allocation3 + $0x4] ss:$8 sps:$4 sm:$0xff]   ;;  %v5071_v20 = vld [vmem:[%s6850_s6 + $0x18] sm:$0xff]   ;;  %v5072_v51 = vld [vmem:[%s6850_s6 + $0x10] sm:$0xff]   ;;  %vm3400_vm5 = vcmask (%p2790_p13), 1043459   ;;  %vm3404_vm3 = vcmask (%p2790_p13), 1047559  }
 0x4c8   : >> { %2960 = vst.msk [vmem:[#allocation3 + $0xa8] sm:$0xff] %vm6383_vm8, %v2958_v6  ;;  %2953 = vst.msk [vmem:[#allocation3 + $0xa0] sm:$0xff] %vm6383_vm8, %v2951_v14  ;;  %v2941_v11 = vpop.permute.xlu1 %2940  ;;  %v2934_v16 = vpop.permute.xlu0 %2933  ;;  %v3008_v49 = vld [vmem:[#allocation3 + $0xc0] sm:$0xff]  ;;  %v2985_v32 = vld [vmem:[#allocation3 + $0x8] sm:$0xff]  ;;  %4655 = vmatpush3.bf16.msra.mxu1 %v3325_v53 }
 0x4c9   : >> { %v2942_v9 = vrot.slane %v2941_v11, 4  ;;  %v2935_v37 = vrot.slane %v2934_v16, 4  ;;  %v4540_v38 = vcombine.high %v3008_v49, %v3008_v49  ;;  %v4515_v47 = vcombine.low %v2984_v35, %v2985_v32  ;;  %4656 = vmatprep.subr.bf16.mxu1 %v5245_v29  ;;  %v5069_v17 = vld [vmem:[%s6850_s6 + $0x28] sm:$0xff]   ;;  %v5074_v6 = vld [vmem:[%s6850_s6] sm:$0xff]  }
 0x4ca   : >> { %3178 = vmatpush1.bf16.msra.mxu0 %v4517_v3  ;;  %v4539_v26 = vcombine.low %v3008_v49, %v3008_v49 }
 0x4cb   : >> { %3179 = vmatprep.subr.bf16.mxu0 %v5049_v28  ;;  %v2944_v43 = vsel %vm2943_vm14, %v2941_v11, %v2942_v9  ;;  %v2937_v21 = vsel %vm2936_vm15, %v2934_v16, %v2935_v37  ;;  %v5052_v50 = vld [vmem:[#allocation3 + $0xb4] ss:$8 sps:$4 sm:$0xff]   ;;  %v5054_v8 = vld [vmem:[#allocation3 + $0xb0] ss:$8 sps:$4 sm:$0xff]   ;;  %vm3402_vm14 = vcmask (%p2790_p13), 1045509   ;;  %vm3488_vm15 = vcmask (%p2790_p13), 1042408  }
 0x4cc   : >> { %2946 = vst.msk [vmem:[#allocation3 + $0x98] sm:$0xff] %vm6383_vm8, %v2944_v43  ;;  %2939 = vst.msk [vmem:[#allocation3 + $0x90] sm:$0xff] %vm6383_vm8, %v2937_v21  ;;  %v2927_v10 = vpop.permute.xlu1 %2926  ;;  %v2920_v33 = vpop.permute.xlu0 %2919  ;;  %v3160_v30 = vsel %vm498_vm1, %v4539_v26, 0  ;;  %4657 = vmatpush3.bf16.msra.mxu1 %v5068_v15 }
 0x4cd   : >> { %v2928_v19 = vrot.slane %v2927_v10, 4  ;;  %v2921_v41 = vrot.slane %v2920_v33, 4  ;;  %4658 = vmatprep.subr.bf16.mxu1 %v5245_v29 }
 0x4ce   : >> { %3180 = vmatpush1.bf16.msra.mxu0 %v4515_v47 }
 0x4cf   : >> { %4541 = vmatprep.subr.msk.bf16.mxu0 %vm498_vm1, %v4540_v38  ;;  %v2930_v39 = vsel %vm6888_vm7, %v2927_v10, %v2928_v19  ;;  %v2923_v2 = vsel %vm2922_vm10, %v2920_v33, %v2921_v41  ;;  %v5055_v54 = vld [vmem:[#allocation3 + $0xa4] ss:$8 sps:$4 sm:$0xff]   ;;  %v5057_v48 = vld [vmem:[#allocation3 + $0xa0] ss:$8 sps:$4 sm:$0xff]   ;;  %vm3489_vm10 = vcmask (%p2790_p13), 175106  }
 0x4d0   : >> { %2932 = vst.msk [vmem:[#allocation3 + $0x88] sm:$0xff] %vm6383_vm8, %v2930_v39  ;;  %2925 = vst.msk [vmem:[#allocation3 + $0x80] sm:$0xff] %vm6383_vm8, %v2923_v2  ;;  %4659 = vmatpush3.bf16.msra.mxu1 %v5069_v17 }
 0x4d1   : >> { %4660 = vmatprep.subr.bf16.mxu1 %v5245_v29  ;;  %vm6948_vm8 = vmmov %vm6946_vm12 }
 0x4d2   : >> { %3188 = vmatpush2.bf16.msra.mxu0 %v3160_v30  ;;  %vm6949_vm12 = vmmov %vm6948_vm8 }
 0x4d3   : >> { %3189 = vmatprep.subr.bf16.mxu0 %v5052_v50  ;;  %v5058_v36 = vld [vmem:[#allocation3 + $0x94] ss:$8 sps:$4 sm:$0xff]   ;;  %v5060_v7 = vld [vmem:[#allocation3 + $0x90] ss:$8 sps:$4 sm:$0xff]  }
 0x4d4   : >> { %4661 = vmatpush3.bf16.msra.mxu1 %v5070_v45 }
 0x4d5   : >> { %4662 = vmatprep.subr.bf16.mxu1 %v5245_v29 }
 0x4d6   : >> { %3190 = vmatpush2.bf16.msra.mxu0 %v5054_v8 }
 0x4d7   : >> { %3191 = vmatprep.subr.bf16.mxu0 %v5055_v54  ;;  %v5061_v27 = vld [vmem:[#allocation3 + $0x84] ss:$8 sps:$4 sm:$0xff]   ;;  %v5063_v31 = vld [vmem:[#allocation3 + $0x80] ss:$8 sps:$4 sm:$0xff]  }
 0x4d8   : >> { %4663 = vmatpush3.bf16.msra.mxu1 %v5071_v20 }
 0x4d9   : >> { %v3014_v56 = vpop.permute.xlu0 %3013  ;;  %v3019_v52 = vpop.permute.xlu1 %3018  ;;  %4664 = vmatprep.subr.bf16.mxu1 %v5245_v29 }
 0x4da   : >> { %3192 = vmatpush2.bf16.msra.mxu0 %v5057_v48 }
 0x4db   : >> { %3193 = vmatprep.subr.bf16.mxu0 %v5058_v36 }
 0x4dc   : >> { %4665 = vmatpush3.bf16.msra.mxu1 %v5072_v51 }
 0x4dd   : >> { %4666 = vmatprep.subr.bf16.mxu1 %v5245_v29 }
 0x4de   : >> { %3194 = vmatpush2.bf16.msra.mxu0 %v5060_v7  ;;  %v3382_v7 = vlaneseq (%p2790_p13) }
 0x4df   : >> { %3195 = vmatprep.subr.bf16.mxu0 %v5061_v27 }
 0x4e0   : >> { %4667 = vmatpush3.bf16.msra.mxu1 %v5073_v61 }
 0x4e1   : >> { %4668 = vmatprep.subr.bf16.mxu1 %v5245_v29 }
 0x4e2   : >> { %3196 = vmatpush2.bf16.msra.mxu0 %v5063_v31  ;;  %v5248_v31 = vmov (%p2790_p13), 1983009808  }
 0x4e4   : >> { %4669 = vmatpush3.bf16.msra.mxu1 %v5074_v6 }
 0x4e5   : >> { %3198 = vmatmul.mubr.bf16.vlgmr.msra.gmra.mxu0 %v5064_v0  ;;  %3938 = vmatprep.subr.bf16.mxu1 (%p2790_p13), %v5219_v34  ;;  %v3380_v0 = vunpack.c.l.s4 (%p2790_p13), %v5248_v31 }
 0x5a5   : >> { %v3199_v24 = vpop.f32.mrf.mxu0 }
 0x5a6   : >> { %v3200_v46 = vadd.f32 %v3199_v24, %v3014_v56  ;;  %v3381_v24 = vunpack.c.0.s8 (%p2790_p13), %v3380_v0 }
 0x5a7   : >> { %v3201_v18 = vpop.f32.mrf.mxu0 }
 0x5a8   : >> { %v3202_v25 = vadd.f32 %v3201_v18, %v3014_v56  ;;  %v3208_v44 = vmax.f32 %v3200_v46, 0.0  ;;  %v3383_v56 = vshrl.u32 (%p2790_p13), %v3382_v7, 7 }
 0x5a9   : >> { %v3203_v13 = vpop.f32.mrf.mxu0 }
 0x5aa   : >> { %v3209_v5 = vmax.f32 %v3202_v25, 0.0  ;;  %v3204_v40 = vadd.f32 %v3203_v13, %v3019_v52  ;;  %v6502_v13 = vsub.s32 (%p2790_p13), %v3381_v24, %v3383_v56  ;;  %v5085_v24 = vld [vmem:[%s6851_s7 + $0xa8] sm:$0xff] (%p2790_p13)  }
 0x5ab   : >> { %v3205_v12 = vpop.f32.mrf.mxu0 }
 0x5ac   : >> { %v5015_v62 = vpack.i.bf16 %v3209_v5, %v3208_v44  ;;  %v3206_v58 = vadd.f32 %v3205_v12, %v3019_v52  ;;  %v3210_v1 = vmax.f32 %v3204_v40, 0.0 }
 0x5ae   : >> { %v3211_v22 = vmax.f32 %v3206_v58, 0.0  ;;  %5016 = vrot.lane.b32.xlu1 %v5015_v62, %s6947_s23 }
 0x5b0   : >> { %v5020_v4 = vpack.i.bf16 %v3211_v22, %v3210_v1 }
 0x5b2   : >> { %5021 = vrot.lane.b32.xlu0 %v5020_v4, %s6947_s23  ;;  %v5079_v4 = vld [vmem:[%s6851_s7 + $0xb8] sm:$0xff] (%p2790_p13)   ;;  %s4211_s23 = sshll.u32 (%p2790_p13), %s6953_s16, 4  ;;  %s6801_s23 = int_to_ptr.vmem [resolvable:$true] %s4211_s23 }
 0x620   : >> { %v5017_v63 = vpop.permute.xlu1 %5016 }
 0x621   : >> { %v5019_v42 = vunpack.i.h.bf16 %v5017_v63  ;;  %v5018_v59 = vunpack.i.l.bf16 %v5017_v63 }
 0x623   : >> { %v3232_v14 = vmax.f32 %v3209_v5, %v5019_v42  ;;  %v3225_v28 = vsel %vm6948_vm8, %v5018_v59, %v5019_v42  ;;  %vm3445_vm8 = vcmask (%p2790_p13), 812632  }
 0x624   : >> { %v3231_v3 = vmax.f32 %v3208_v44, %v3225_v28  ;;  %v5022_v11 = vpop.permute.xlu0 %5021  ;;  %v5080_v28 = vld [vmem:[%s6851_s7 + $0x78] sm:$0xff] (%p2790_p13)  }
 0x625   : >> { %v5024_v16 = vunpack.i.h.bf16 %v5022_v11  ;;  %v5023_v49 = vunpack.i.l.bf16 %v5022_v11  ;;  %4616 = vmatprep.subr.bf16.mxu0 (%p2790_p13), %v5080_v28 }
 0x626   : >> { %v5025_v35 = vpack.i.bf16 %v3232_v14, %v3231_v3 }
 0x627   : >> { %v3234_v32 = vmax.f32 %v3211_v22, %v5024_v16  ;;  %v3226_v9 = vsel %vm6949_vm12, %v5023_v49, %v5024_v16  ;;  %vm3490_vm12 = vmor (%p2790_p13), %vm3489_vm10, %vm3488_vm15  ;;  %vm3615_vm15 = vcmask (%p2790_p13), 558432   ;;  %vm3627_vm10 = vcmask (%p2790_p13), 763432  }
 0x628   : >> { %v3233_v37 = vmax.f32 %v3210_v1, %v3226_v9  ;;  %5026 = vrot.lane.b32.xlu1 %v5025_v35, %s6950_s24  ;;  %v5081_v35 = vld [vmem:[%s6851_s7 + $0x38] sm:$0xff] (%p2790_p13)  }
 0x629   : > { %4617 = vmatpush3.bf16.msra.mxu0 (%p2790_p13), %v5081_v35 }
 0x62a   : >> { %v5030_v43 = vpack.i.bf16 %v3234_v32, %v3233_v37 }
 0x62c   : >> { %5031 = vrot.lane.b32.xlu0 %v5030_v43, %s6950_s24  ;;  %s6954_s24 = smov (%p2790_p13), %s6953_s16 }
 0x69a   : >> { %v5027_v21 = vpop.permute.xlu1 %5026 }
 0x69b   : >> { %v5029_v38 = vunpack.i.h.bf16 %v5027_v21  ;;  %v5028_v47 = vunpack.i.l.bf16 %v5027_v21 }
 0x69d   : >> { %v3248_v33 = vsel %vm2845_vm9, %v5028_v47, %v5029_v38 }
 0x69e   : >> { %v5032_v10 = vpop.permute.xlu0 %5031  ;;  %v3252_v39 = vmax.f32 %v3231_v3, %v3248_v33  ;;  %v5082_v33 = vld [vmem:[%s6851_s7 + $0xb0] sm:$0xff] (%p2790_p13)  }
 0x69f   : >> { %v5034_v19 = vunpack.i.h.bf16 %v5032_v10  ;;  %v5033_v41 = vunpack.i.l.bf16 %v5032_v10 }
 0x6a1   : >> { %v3249_v26 = vsel %vm2845_vm9, %v5033_v41, %v5034_v19  ;;  %vm3398_vm9 = vcmask (%p2790_p13), 1041409  }
 0x6a2   : >> { %v3253_v2 = vmax.f32 %v3233_v37, %v3249_v26 }
 0x6a4   : >> { %v3254_v50 = vpack.c.bf16 %v3253_v2, %v3252_v39  ;;  %v5083_v2 = vld [vmem:[%s6851_s7 + $0x70] sm:$0xff] (%p2790_p13)  }
 0x6a5   : > { %4618 = vmatprep.subr.bf16.mxu0 (%p2790_p13), %v5083_v2 }
 0x6a6   : >> { %4671 = vmatmul.mubr.msk.bf16.vlgmr.msra.gmra.mxu1 %vm3318_vm13, %v3254_v50  ;;  %vm3504_vm13 = vcmask (%p2790_p13), 378032  }
 0x6a7   : > { %3939 = vmatpush1.bf16.msra.mxu1 (%p2790_p13), %v5079_v4 }
 0x6a8   : > { %3940 = vmatprep.subr.bf16.mxu1 (%p2790_p13), %v5219_v34 }
 0x6ab   : > { %3941 = vmatpush1.bf16.msra.mxu1 (%p2790_p13), %v5082_v33 }
 0x6ac   : > { %3942 = vmatprep.subr.bf16.mxu1 (%p2790_p13), %v5219_v34 }
 0x6af   : > { %3943 = vmatpush1.bf16.msra.mxu1 (%p2790_p13), %v5085_v24  ;;  %v5101_v24 = vld [vmem:[%s6851_s7 + $0x40] sm:$0xff] (%p2790_p13)  }
 0x6b0   : > { %3944 = vmatprep.subr.bf16.mxu1 (%p2790_p13), %v5219_v34 }
 0x766   : >> { %v3361_v30 = vpop.f32.mrf.mxu1 }
 0x767   : >> { %3371 = vst.msk [vmem:[%s3369_s15] sm:$0xff] %vm3370_vm4, %v3361_v30 }
 0x768   : >> { %v4672_v54 = vpop.f32.mrf.mxu1  ;;  %2792 = sbr.rel (!%p2790_p13) target bundleno = 1061 (0x425), region = 140 }
 0x76a   : >> { %v3364_v8 = vpop.f32.mrf.mxu1 }
 0x76b   : >> { %3372 = vst.msk [vmem:[%s3369_s15 + $0x8] sm:$0xff] %vm3370_vm4, %v3364_v8  ;;  %s5254_s15 = smov (%p2790_p13), 75   ;;  %vm6951_vm4 = vcmask (%p2790_p13), 1022976  }
 0x76c   : >> { %v4673_v36 = vpop.f32.mrf.mxu1 }
 0x76d   : > { %v5084_v36 = vld [vmem:[%s6851_s7 + $0x30] sm:$0xff]  }
 0x76e   : > { %4619 = vmatpush3.bf16.msra.mxu0 %v5084_v36  ;;  %v5098_v36 = vld [vmem:[%s6851_s7 + $0x48] sm:$0xff]  }
 0x772   : > { %v3373_v48 = vld [vmem:[#allocation6] sm:$0xff]  ;;  %v3375_v27 = vld [vmem:[#allocation6 + $0x10] sm:$0xff]  ;;  %v3376_v52 = vld [vmem:[#allocation6 + $0x18] sm:$0xff] }
 0x773   : > { %v3447_v46 = vcombine.high %v3373_v48, %v3373_v48  ;;  %v3455_v18 = vcombine.high %v3375_v27, %v3375_v27  ;;  %v3597_v25 = vcombine.high %v3376_v52, %v3376_v52  ;;  %v6504_v44 = vld [vmem:[#allocation6 + $0x8] sm:$0xff]  ;;  %v6507_v5 = vrot.slane %v3373_v48, %v6502_v13 }
 0x774   : > { %v6510_v40 = vrot.slane %v3375_v27, %v6502_v13  ;;  %v3526_v58 = vrot.slane %v6504_v44, %v6502_v13  ;;  %v6517_v57 = vrot.slane %v3376_v52, %v6502_v13  ;;  %v3589_v1 = vcombine.high %v6504_v44, %v6504_v44 }
 0x775   : > { %v3454_v12 = vrot.slane %v3447_v46, %v6502_v13  ;;  %v3462_v62 = vrot.slane %v3455_v18, %v6502_v13  ;;  %v6520_v29 = vrot.slane %v3597_v25, %v6502_v13  ;;  %v3409_v22 = vrot.slane %v6507_v5, 1 }
 0x776   : > { %v3421_v55 = vcombine.high %v6507_v5, %v6507_v5  ;;  %v3546_v53 = vrot.slane %v3526_v58, 1  ;;  %v3536_v15 = vrot.slane %v6517_v57, 7  ;;  %v3422_v17 = vcombine.high %v6510_v40, %v6510_v40 }
 0x777   : > { %v3475_v60 = vrot.slane %v3454_v12, 1  ;;  %v3465_v23 = vrot.slane %v3462_v62, 7  ;;  %v3492_v45 = vcombine.high %v3454_v12, %v3454_v12  ;;  %v3412_v20 = vsel %vm3398_vm9, %v6510_v40, %v3409_v22 }
 0x778   : > { %v3435_v63 = vrot.slane %v3421_v55, 1  ;;  %v3413_v42 = vsel %vm3400_vm5, %v6510_v40, %v3412_v20  ;;  %v3549_v14 = vsel %vm3398_vm9, %v6517_v57, %v3546_v53  ;;  %v3537_v38 = vsel %vm3398_vm9, %v3536_v15, %v3526_v58  ;;  %v5088_v53 = vld [vmem:[%s6851_s7 + $0xa0] sm:$0xff]  }
 0x779   : > { %v3478_v51 = vsel %vm3398_vm9, %v3462_v62, %v3475_v60  ;;  %v3466_v61 = vsel %vm3398_vm9, %v3465_v23, %v3454_v12  ;;  %v3414_v3 = vsel %vm3402_vm14, %v6510_v40, %v3413_v42  ;;  %v3550_v49 = vsel %vm3400_vm5, %v6517_v57, %v3549_v14  ;;  %v5086_v12 = vld [vmem:[%s6851_s7 + $0x68] sm:$0xff]   ;;  %3945 = vmatpush1.bf16.msra.mxu1 %v5088_v53 }
 0x77a   : > { %v3479_v59 = vsel %vm3400_vm5, %v3462_v62, %v3478_v51  ;;  %v3467_v6 = vsel %vm3400_vm5, %v3465_v23, %v3466_v61  ;;  %v3415_v32 = vsel %vm3404_vm3, %v6510_v40, %v3414_v3  ;;  %v3551_v43 = vsel %vm3402_vm14, %v6517_v57, %v3550_v49  ;;  %4620 = vmatprep.subr.bf16.mxu0 %v5086_v12  ;;  %v5089_v51 = vld [vmem:[%s6851_s7 + $0x60] sm:$0xff]   ;;  %v5091_v49 = vld [vmem:[%s6851_s7 + $0x98] sm:$0xff]  }
 0x77b   : > { %v3480_v11 = vsel %vm3402_vm14, %v3462_v62, %v3479_v59  ;;  %v3468_v16 = vsel %vm3402_vm14, %v3465_v23, %v3467_v6  ;;  %3416 = vrot.lane.b32.xlu0 %v3415_v32, %s5249_s1  ;;  %v3552_v21 = vsel %vm3404_vm3, %v6517_v57, %v3551_v43  ;;  %v3438_v47 = vsel %vm3398_vm9, %v3422_v17, %v3435_v63  ;;  %v5090_v59 = vld [vmem:[%s6851_s7 + $0x20] sm:$0xff]   ;;  %s5255_s1 = smov 50  }
 0x77c   : > { %v3481_v9 = vsel %vm3404_vm3, %v3462_v62, %v3480_v11  ;;  %v3469_v37 = vsel %vm3404_vm3, %v3465_v23, %v3468_v16  ;;  %v3425_v10 = vrot.slane %v3422_v17, 7  ;;  %v3538_v19 = vsel %vm3400_vm5, %v3536_v15, %v3537_v38  ;;  %3946 = vmatprep.subr.bf16.mxu1 %v5219_v34  ;;  %v5093_v38 = vld [vmem:[%s6851_s7 + $0x18] sm:$0xff]  }
 0x77d   : > { %3482 = vrot.lane.b32.xlu1 %v3481_v9, %s5250_s30  ;;  %v3439_v41 = vsel %vm3400_vm5, %v3422_v17, %v3438_v47  ;;  %v6571_v26 = vcombine.high %v3462_v62, %v3462_v62  ;;  %v3506_v39 = vrot.slane %v3492_v45, 1  ;;  %v3539_v50 = vsel %vm3402_vm14, %v3536_v15, %v3538_v19  ;;  %s5256_s30 = smov 22   ;;  %3947 = vmatpush1.bf16.msra.mxu1 %v5091_v49 }
 0x77e   : > { %v3440_v30 = vsel %vm3402_vm14, %v3422_v17, %v3439_v41  ;;  %v3426_v54 = vsel %vm3398_vm9, %v3425_v10, %v3421_v55  ;;  %v3558_v8 = vcombine.high %v3526_v58, %v3526_v58  ;;  %v6589_v31 = vcombine.high %v6517_v57, %v6517_v57  ;;  %v5087_v57 = vld [vmem:[%s6851_s7 + $0x28] sm:$0xff]   ;;  %v5094_v41 = vld [vmem:[%s6851_s7 + $0x90] sm:$0xff]   ;;  %3948 = vmatprep.subr.bf16.mxu1 %v5219_v34 }
 0x77f   : > { %v3427_v48 = vsel %vm3400_vm5, %v3425_v10, %v3426_v54  ;;  %v3496_v27 = vrot.slane %v6571_v26, 7  ;;  %3470 = vrot.lane.b32.xlu0 %v3469_v37, %s5251_s20  ;;  %v3509_v7 = vsel %vm3398_vm9, %v6571_v26, %v3506_v39  ;;  %v3596_v56 = vrot.slane %v3589_v1, %v6502_v13  ;;  %4621 = vmatpush3.bf16.msra.mxu0 %v5087_v57  ;;  %v5092_v37 = vld [vmem:[%s6851_s7 + $0x58] sm:$0xff]   ;;  %s5257_s20 = smov 47  }
 0x780   : > { %v3577_v0 = vrot.slane %v3558_v8, 1  ;;  %v3540_v46 = vsel %vm3404_vm3, %v3536_v15, %v3539_v50  ;;  %v3441_v18 = vsel %vm3404_vm3, %v3422_v17, %v3440_v30  ;;  %v6602_v25 = vrot.slane %v6520_v29, 7  ;;  %4622 = vmatprep.subr.bf16.mxu0 %v5089_v51  ;;  %v5096_v30 = vld [vmem:[%s6851_s7 + $0x10] sm:$0xff]  }
 0x781   : > { %3553 = vrot.lane.b32.xlu1 %v3552_v21, %s5252_s2  ;;  %v3497_v52 = vsel %vm3398_vm9, %v3496_v27, %v3492_v45  ;;  %v3428_v44 = vsel %vm3402_vm14, %v3425_v10, %v3427_v48  ;;  %v3562_v58 = vrot.slane %v6589_v31, 7  ;;  %v3510_v22 = vsel %vm3400_vm5, %v6571_v26, %v3509_v7  ;;  %s5258_s2 = smov 122   ;;  %3949 = vmatpush1.bf16.msra.mxu1 %v5094_v41  ;;  %v5099_v7 = vld [vmem:[%s6851_s7 + $0x8] sm:$0xff]   ;;  %v5115_v41 = vld [vmem:[%s6855_s11 + $0x18] sm:$0xff]  }
 0x782   : > { %v3498_v62 = vsel %vm3400_vm5, %v3496_v27, %v3497_v52  ;;  %v3580_v23 = vsel %vm3398_vm9, %v6589_v31, %v3577_v0  ;;  %v3608_v55 = vsel %vm3398_vm9, %v6602_v25, %v3596_v56  ;;  %v3617_v4 = vrot.slane %v3596_v56, 1  ;;  %3950 = vmatprep.subr.bf16.mxu1 %v5219_v34  ;;  %v5104_v52 = vld [vmem:[%s6851_s7 + $0xc0] sm:$0xff]  }
 0x783   : > { %v3499_v1 = vsel %vm3402_vm14, %v3496_v27, %v3498_v62  ;;  %3541 = vrot.lane.b32.xlu0 %v3540_v46, %s5253_s21  ;;  %v3563_v60 = vsel %vm3398_vm9, %v3562_v58, %v3558_v8  ;;  %v3429_v15 = vsel %vm3404_vm3, %v3425_v10, %v3428_v44  ;;  %v3629_v20 = vcombine.high %v3596_v56, %v3596_v56  ;;  %v5100_v56 = vld [vmem:[%s6851_s7 + $0x80] sm:$0xff]   ;;  %s6955_s21 = sand.u32 1, %s5179_s26  }
 0x784   : > { %v3500_v17 = vsel %vm3404_vm3, %v3496_v27, %v3499_v1  ;;  %v3564_v45 = vsel %vm3400_vm5, %v3562_v58, %v3563_v60  ;;  %v3511_v61 = vsel %vm3402_vm14, %v6571_v26, %v3510_v22  ;;  %v3630_v42 = vcombine.high %v6520_v29, %v6520_v29  ;;  %4623 = vmatpush3.bf16.msra.mxu0 %v5090_v59  ;;  %v5097_v27 = vld [vmem:[%s6851_s7 + $0x88] sm:$0xff]  }
 0x785   : > { %3442 = vrot.lane.b32.xlu1 %v3441_v18, %s5254_s15  ;;  %v3565_v63 = vsel %vm3402_vm14, %v3562_v58, %v3564_v45  ;;  %v3581_v6 = vsel %vm3400_vm5, %v6589_v31, %v3580_v23  ;;  %v3609_v14 = vsel %vm3400_vm5, %v6602_v25, %v3608_v55  ;;  %v3643_v28 = vrot.slane %v3629_v20, 1  ;;  %4624 = vmatprep.subr.bf16.mxu0 %v5092_v37  ;;  %v5102_v18 = vld [vmem:[%s6851_s7] sm:$0xff]   ;;  %s5119_s15 = scalar_lea.vmem %s6801_s23, 32 }
 0x786   : > { %v3620_v3 = vsel %vm3398_vm9, %v6520_v29, %v3617_v4  ;;  %v3633_v11 = vrot.slane %v3630_v42, 7  ;;  %v3397_v16 = vrot.slane %v6510_v40, 7  ;;  %v3512_v35 = vsel %vm3404_vm3, %v6571_v26, %v3511_v61  ;;  %v5095_v26 = vld [vmem:[%s6851_s7 + $0x50] sm:$0xff]   ;;  %3951 = vmatpush1.bf16.msra.mxu1 %v5097_v27  ;;  %p5120_p0 = scmp.ne.s32.totalorder %s6801_s23, %s5119_s15 }
 0x787   : > { %3430 = vrot.lane.b32.xlu0 %v3429_v15, %s5255_s1  ;;  %v3566_v32 = vsel %vm3404_vm3, %v3562_v58, %v3565_v63  ;;  %v3646_v9 = vsel %vm3398_vm9, %v3630_v42, %v3643_v28  ;;  %v3582_v40 = vsel %vm3402_vm14, %v6589_v31, %v3581_v6  ;;  %v3610_v43 = vsel %vm3402_vm14, %v6602_v25, %v3609_v14  ;;  %v5105_v28 = vld [vmem:[%s6853_s9 + $0x38] ss:$0 sps:$4 sm:$0xff]  }
 0x788   : > { %v3399_v21 = vsel %vm3398_vm9, %v3397_v16, %v6507_v5  ;;  %v3647_v47 = vsel %vm3400_vm5, %v3630_v42, %v3646_v9  ;;  %v3621_v10 = vsel %vm3400_vm5, %v6520_v29, %v3620_v3  ;;  %v3634_v5 = vsel %vm3398_vm9, %v3633_v11, %v3629_v20  ;;  %4625 = vmatpush3.bf16.msra.mxu0 %v5093_v38  ;;  %v5110_v38 = vld [vmem:[%s6853_s9 + $0x10] sm:$0xff]   ;;  %p5121_p1 = pnand %p5120_p0, %p5375_p5 }
 0x789   : > { %3501 = vrot.lane.b32.xlu1 %v3500_v17, %s5256_s30  ;;  %v3401_v33 = vsel %vm3400_vm5, %v3397_v16, %v3399_v21  ;;  %v3583_v39 = vsel %vm3404_vm3, %v6589_v31, %v3582_v40  ;;  %v3611_v2 = vsel %vm3404_vm3, %v6602_v25, %v3610_v43  ;;  %v3648_v54 = vsel %vm3402_vm14, %v3630_v42, %v3647_v47  ;;  %v5106_v40 = vld [vmem:[%s6853_s9 + $0x30] sm:$0xff]   ;;  %v5108_v43 = vld [vmem:[%s6853_s9 + $0x20] sm:$0xff]   ;;  %v5109_v21 = vld [vmem:[%s6853_s9 + $0x18] sm:$0xff]  }
 0x78a   : > { %v3403_v19 = vsel %vm3402_vm14, %v3397_v16, %v3401_v33  ;;  %v3622_v8 = vsel %vm3402_vm14, %v6520_v29, %v3621_v10  ;;  %4626 = vmatprep.subr.bf16.mxu0 %v5095_v26  ;;  %v3635_v48 = vsel %vm3400_vm5, %v3633_v11, %v3634_v5  ;;  %v3649_v31 = vsel %vm3404_vm3, %v3630_v42, %v3648_v54  ;;  %v5111_v47 = vld [vmem:[%s6853_s9 + $0x8] sm:$0xff]   ;;  %v5112_v10 = vld [vmem:[%s6853_s9] sm:$0xff]   ;;  %v5116_v26 = vld [vmem:[%s6855_s11 + $0x10] sm:$0xff]   ;;  %p5122_p2 = pneg %p5121_p1 }
 0x78b   : > { %3513 = vrot.lane.b32.xlu0 %v3512_v35, %s5257_s20  ;;  %v3405_v50 = vsel %vm3404_vm3, %v3397_v16, %v3403_v19  ;;  %s5259_s20 = smov 19   ;;  %v3623_v0 = vsel %vm3404_vm3, %v6520_v29, %v3622_v8  ;;  %v3636_v46 = vsel %vm3402_vm14, %v3633_v11, %v3635_v48  ;;  %3952 = vmatprep.subr.bf16.mxu1 %v5219_v34  ;;  %v5264_v25 = vmov 0.0   ;;  %v5113_v33 = vld [vmem:[%s6855_s11 + $0x28] ss:$0 sps:$4 sm:$0x33]   ;;  %v5114_v19 = vld [vmem:[%s6855_s11 + $0x20] sm:$0xff]  }
 0x78c   : > { %3408 = vst.msk [vmem:[#allocation7] sm:$0x3] %vm3407_vm0, %v3405_v50  ;;  %4627 = vmatpush3.bf16.msra.mxu0 %v5096_v30  ;;  %v3637_v29 = vsel %vm3404_vm3, %v3633_v11, %v3636_v46  ;;  %3953 = vmatpush1.bf16.msra.mxu1 %v5100_v56  ;;  %vm3516_vm9 = vcmask 583032   ;;  %vm3573_vm5 = vcmask 1042384   ;;  %vm3574_vm14 = vcmask 150530   ;;  %v5117_v46 = vld [vmem:[%s6855_s11 + $0x8] sm:$0xff]  }
 0x78d   : > { %3567 = vrot.lane.b32.xlu1 %v3566_v32, %s5258_s2  ;;  %s5260_s2 = smov 44   ;;  %4628 = vmatprep.subr.bf16.mxu0 %v5098_v36  ;;  %vm3544_vm3 = vcmask 788032   ;;  %vm3570_vm0 = vcmask 998400   ;;  %vm3575_vm7 = vmor %vm3574_vm14, %vm3573_vm5  ;;  %v4053_v32 = vsel %vm498_vm1, %v5105_v28, 0  ;;  %vm5265_vm1 = vmmov 0  }
 0x78e   : > { %3968 = vmatprep.subr.bf16.mxu1 %v5219_v34  ;;  %v4553_v50 = vld [vmem:[%s6852_s8] ss:$0 sm:$0xff]  ;;  %vm4047_vm5 = vcmask 982016   ;;  %vm6952_vm14 = vcmask 687104  }
 0x78f   : > { %3584 = vrot.lane.b32.xlu0 %v3583_v39, %s5259_s20  ;;  %s5263_s20 = smov 94  }
 0x790   : > { %4629 = vmatpush3.bf16.msra.mxu0 %v5099_v7  ;;  %3969 = vmatpush2.bf16.msra.mxu1 %v5104_v52 }
 0x791   : > { %3612 = vrot.lane.b32.xlu1 %v3611_v2, %s5260_s2  ;;  %4630 = vmatprep.subr.bf16.mxu0 %v5101_v24  ;;  %s4599_s2 = sshll.u32 %s5358_s29, 5  ;;  %s4198_s29 = scalar_lea.sflag [#allocation9], %s6955_s21 }
 0x792   : > { %4694 = vmatprep.subr.bf16.mxu1 %v5264_v25  ;;  %s6799_s0 = scalar_lea.hbm %s6857_s13, %s4599_s2 }
 0x793   : > { %3650 = vrot.lane.b32.xlu0 %v3649_v31, %s5261_s17  ;;  %s5266_s17 = smov [#allocation8]  }
 0x794   : > { %4631 = vmatpush3.bf16.msra.mxu0 %v5102_v18  ;;  %v5118_v18 = vld [vmem:[%s6855_s11] sm:$0xff]  }
 0x795   : > { %3624 = vrot.lane.b32.xlu1 %v3623_v0, %s5262_s5  ;;  %4674 = vmatprep.subr.bf16.mxu0 %v5264_v25  ;;  %s5123_s5 = sshll.u32 %s5266_s17, 4  ;;  %s5124_s5 = int_to_ptr.vmem [resolvable:$false] %s5123_s5 }
 0x796   : > { %p5126_p3 = scmp.lt.s32.totalorder %s6801_s23, %s5124_s5 }
 0x797   : > { %3638 = vrot.lane.b32.xlu0 %v3637_v29, %s5263_s20  ;;  %v4580_v29 = vld [vmem:[%s6854_s10] ss:$0 sm:$0xff]  ;;  %s5125_s20 = scalar_lea.vmem %s5124_s5, 64 }
 0x798   : > { %p5127_p4 = scmp.lt.s32.totalorder %s5125_s20, %s5119_s15 }
 0x79a   : > { %p5128_p7 = por %p5127_p4, %p5126_p3 }
 0x79c   : > { %p5129_p8 = pnand %p5128_p7, %p5122_p2 }
 0x7ed   : > { %v3417_v12 = vpop.permute.xlu0 %3416 }
 0x7ee   : > { %3420 = vst.msk [vmem:[#allocation7] sm:$0x3] %vm3419_vm2, %v3417_v12  ;;  %vm3556_vm2 = vcmask 993032  }
 0x7ef   : > { %v3483_v44 = vpop.permute.xlu1 %3482 }
 0x7f0   : > { %v3484_v34 = vrot.slane %v3483_v44, 6 }
 0x7f1   : > { %v3471_v62 = vpop.permute.xlu0 %3470 }
 0x7f2   : > { %v3486_v23 = vsel %vm6951_vm4, %v3484_v34, %v3483_v44 }
 0x7f3   : > { %v3554_v58 = vpop.permute.xlu1 %3553 }
 0x7f5   : > { %v3542_v57 = vpop.permute.xlu0 %3541 }
 0x7f7   : > { %v3443_v1 = vpop.permute.xlu1 %3442 }
 0x7f9   : > { %v3431_v22 = vpop.permute.xlu0 %3430 }
 0x7fa   : > { %3434 = vst.msk [vmem:[#allocation7] sm:$0x3] %vm3433_vm6, %v3431_v22  ;;  %vm3587_vm6 = vcmask 353432  }
 0x7fb   : > { %v3502_v60 = vpop.permute.xlu1 %3501  ;;  %3446 = vst.msk [vmem:[#allocation7] sm:$0x3] %vm3445_vm8, %v3443_v1  ;;  %vm3656_vm8 = vcmask 1042360  }
 0x7fc   : > { %3474 = vst.msk [vmem:[#allocation7] sm:$0x3] %vm3473_vm11, %v3471_v62  ;;  %vm3657_vm11 = vcmask 125954  }
 0x7fd   : > { %3491 = vst.msk [vmem:[#allocation7] sm:$0xf] %vm3490_vm12, %v3486_v23  ;;  %v3514_v55 = vpop.permute.xlu0 %3513  ;;  %vm3653_vm12 = vcmask 973824   ;;  %vm3658_vm4 = vmor %vm3657_vm11, %vm3656_vm8 }
 0x7fe   : > { %3505 = vst.msk [vmem:[#allocation7 + $0x2] sm:$0x3] %vm3504_vm13, %v3502_v60  ;;  %vm3641_vm13 = vcmask 968432  }
 0x7ff   : > { %v3568_v4 = vpop.permute.xlu1 %3567  ;;  %3517 = vst.msk [vmem:[#allocation7 + $0x2] sm:$0x3] %vm3516_vm9, %v3514_v55  ;;  %vm4152_vm9 = vcmask 1041408  }
 0x800   : > { %v3569_v53 = vrot.slane %v3568_v4, 6  ;;  %3545 = vst.msk [vmem:[#allocation7 + $0x2] sm:$0x3] %vm3544_vm3, %v3542_v57  ;;  %v4154_v5 = vsel %vm4152_vm9, %v5113_v33, 0 }
 0x801   : > { %v3585_v17 = vpop.permute.xlu0 %3584  ;;  %3557 = vst.msk [vmem:[#allocation7 + $0x2] sm:$0x3] %vm3556_vm2, %v3554_v58 }
 0x802   : > { %v3571_v15 = vsel %vm3570_vm0, %v3569_v53, %v3568_v4 }
 0x803   : > { %v3613_v45 = vpop.permute.xlu1 %3612  ;;  %3576 = vst.msk [vmem:[#allocation7 + $0x2] sm:$0xf] %vm3575_vm7, %v3571_v15  ;;  %vm3894_vm7 = vcmask 130048  }
 0x804   : > { %3588 = vst.msk [vmem:[#allocation7 + $0x4] sm:$0x3] %vm3587_vm6, %v3585_v17 }
 0x805   : > { %3616 = vst.msk [vmem:[#allocation7 + $0x4] sm:$0x3] %vm3615_vm15, %v3613_v45  ;;  %v3651_v20 = vpop.permute.xlu0 %3650 }
 0x806   : > { %v3652_v61 = vrot.slane %v3651_v20, 6 }
 0x807   : > { %v3625_v51 = vpop.permute.xlu1 %3624 }
 0x808   : > { %3628 = vst.msk [vmem:[#allocation7 + $0x4] sm:$0x3] %vm3627_vm10, %v3625_v51  ;;  %v3654_v42 = vsel %vm3653_vm12, %v3652_v61, %v3651_v20 }
 0x809   : > { %v3639_v63 = vpop.permute.xlu0 %3638 }
 0x80a   : > { %3642 = vst.msk [vmem:[#allocation7 + $0x4] sm:$0x3] %vm3641_vm13, %v3639_v63 }
 0x80b   : > { %3659 = vst.msk [vmem:[#allocation7 + $0x4] sm:$0xf] %vm3658_vm4, %v3654_v42 }
 0x812   : > { %v3660_v59 = vld [vmem:[#allocation7] sm:$0xff] }
 0x813   : > { %v3662_v6 = vcombine.high %v3660_v59, %v3660_v59  ;;  %v3669_v14 = vrot.slane %v3660_v59, %v6502_v13 }
 0x815   : > { %v3677_v3 = vcombine.high %v3669_v14, %v3669_v14  ;;  %v3676_v11 = vrot.slane %v3662_v6, %v6502_v13  ;;  %v3683_v35 = vpack.c.bf16 %v3669_v14, %v3669_v14  ;;  %v5107_v13 = vld [vmem:[%s6853_s9 + $0x28] sm:$0xff]  }
 0x817   : > { %v3684_v16 = vpack.c.bf16 %v3677_v3, %v3677_v3  ;;  %v3678_v49 = vcombine.high %v3676_v11, %v3676_v11  ;;  %v3685_v37 = vpack.c.bf16 %v3676_v11, %v3676_v11 }
 0x819   : > { %3930 = vmatprep.mubr.bf16.mxu0 %v3684_v16  ;;  %v3686_v9 = vpack.c.bf16 %v3678_v49, %v3678_v49 }
 0x81a   : > { %3931 = vmatmul.mubr.bf16.vlgmr.msra.gmra.mxu0 %v3683_v35 }
 0x81b   : > { %4579 = vmatprep.mubr.msk.bf16.mxu1 %vm3894_vm7, %v3686_v9  ;;  %4675 = vmatpush3.bf16.msra.mxu0 %v4053_v32 }
 0x81c   : > { %3971 = vmatmul.mubr.bf16.vlgmr.msra.gmra.mxu1 %v3685_v37  ;;  %4676 = vmatprep.subr.bf16.mxu0 %v5264_v25 }
 0x81d   : > { %4690 = vmatprep.mubr.msk.bf16.mxu0 %vm5265_vm1, %v5264_v25  ;;  %4706 = vmatprep.mubr.msk.bf16.mxu1 %vm5265_vm1, %v5264_v25 }
 0x81e   : > { %4695 = vmatpush3.bf16.msra.mxu1 %v4154_v5 }
 0x81f   : > { %4677 = vmatpush3.bf16.msra.mxu0 %v5106_v40  ;;  %4696 = vmatprep.subr.bf16.mxu1 %v5264_v25 }
 0x820   : > { %4678 = vmatprep.subr.bf16.mxu0 %v5264_v25 }
 0x822   : > { %4697 = vmatpush3.bf16.msra.mxu1 %v5114_v19 }
 0x823   : > { %4679 = vmatpush3.bf16.msra.mxu0 %v5107_v13  ;;  %4698 = vmatprep.subr.bf16.mxu1 %v5264_v25 }
 0x824   : > { %4680 = vmatprep.subr.bf16.mxu0 %v5264_v25 }
 0x826   : > { %4699 = vmatpush3.bf16.msra.mxu1 %v5115_v41 }
 0x827   : > { %4681 = vmatpush3.bf16.msra.mxu0 %v5108_v43  ;;  %4700 = vmatprep.subr.bf16.mxu1 %v5264_v25 }
 0x828   : > { %4682 = vmatprep.subr.bf16.mxu0 %v5264_v25 }
 0x82a   : > { %4701 = vmatpush3.bf16.msra.mxu1 %v5116_v26 }
 0x82b   : > { %4683 = vmatpush3.bf16.msra.mxu0 %v5109_v21  ;;  %4702 = vmatprep.subr.bf16.mxu1 %v5264_v25 }
 0x82c   : > { %4684 = vmatprep.subr.bf16.mxu0 %v5264_v25 }
 0x82e   : > { %4703 = vmatpush3.bf16.msra.mxu1 %v5117_v46 }
 0x82f   : > { %4685 = vmatpush3.bf16.msra.mxu0 %v5110_v38  ;;  %4704 = vmatprep.subr.bf16.mxu1 %v5264_v25 }
 0x830   : > { %4686 = vmatprep.subr.bf16.mxu0 %v5264_v25 }
 0x832   : > { %4705 = vmatpush3.bf16.msra.mxu1 %v5118_v18 }
 0x833   : > { %4687 = vmatpush3.bf16.msra.mxu0 %v5111_v47 }
 0x834   : > { %4688 = vmatprep.subr.bf16.mxu0 %v5264_v25  ;;  %v4590_v25 = vld [vmem:[%s6856_s12] ss:$0 sm:$0xff] }
 0x837   : > { %4689 = vmatpush3.bf16.msra.mxu0 %v5112_v10 }
 0x8da   : > { %v4632_v39 = vpop.f32.mrf.mxu0 }
 0x8dc   : > { %v4633_v2 = vpop.f32.mrf.mxu0  ;;  %v3972_v30 = vpop.f32.mrf.mxu1 }
 0x8dd   : > { %v4634_v54 = vadd.f32 %v4633_v2, %v4632_v39 }
 0x8de   : > { %v4635_v8 = vpop.f32.mrf.mxu0  ;;  %v3974_v36 = vpop.f32.mrf.mxu1 }
 0x8df   : > { %v3933_v48 = vadd.f32 %v4634_v54, %v4553_v50 }
 0x8e0   : > { %v4636_v27 = vpop.f32.mrf.mxu0  ;;  %v3975_v7 = vpop.f32.mrf.mxu1 }
 0x8e1   : > { %v3973_v31 = vadd.f32 %v3972_v30, %v3933_v48 }
 0x8e2   : > { %v3976_v0 = vpop.f32.mrf.mxu1 }
 0x8e3   : > { %v3978_v56 = vmax.f32 %v3973_v31, 0.0 }
 0x8e5   : > { %v3979_v24 = vpack.c.bf16 %v3978_v56, %v3978_v56 }
 0x8e7   : > { %4691 = vmatmul.mubr.msk.bf16.vlgmr.msra.gmra.mxu0 %vm4047_vm5, %v3979_v24 }
 0x9a7   : > { %v4089_v52 = vpop.f32.mrf.mxu0 }
 0x9a8   : > { %v4090_v12 = vadd.f32 %v4580_v29, %v4089_v52 }
 0x9a9   : > { %v4692_v44 = vpop.f32.mrf.mxu0 }
 0x9aa   : > { %v4095_v62 = vmax.f32 %v4090_v12, 0.0 }
 0x9ab   : > { %v4092_v58 = vpop.f32.mrf.mxu0 }
 0x9ac   : > { %v4096_v57 = vpack.c.bf16 %v4095_v62, %v4095_v62 }
 0x9ad   : > { %v4693_v1 = vpop.f32.mrf.mxu0 }
 0x9ae   : > { %4707 = vmatmul.mubr.msk.bf16.vlgmr.msra.gmra.mxu1 %vm6952_vm14, %v4096_v57 }
 0xa6e   : > { %v4190_v34 = vpop.f32.mrf.mxu1 }
 0xa6f   : > { %v4191_v22 = vadd.f32 %v4590_v25, %v4190_v34 }
 0xa70   : > { %v4708_v60 = vpop.f32.mrf.mxu1 }
 0xa71   : > { %4196 = vst [vmem:[%s6954_s24] sm:$0x3] %v4191_v22 }
 0xa72   : > { %v4193_v23 = vpop.f32.mrf.mxu1 }
 0xa73   : > { %5132 = shalt.err (!%p5129_p8)
}
 0xa74   : > { %s5133_s22 = scalar_lea.hbm %s6799_s0, 32  ;;  %s5137_s1 = scalar_lea.hbm %s6857_s13, 64 }
 0xa75   : > { %p5134_p9 = scmp.ne.s32.totalorder %s6799_s0, %s5133_s22  ;;  %p5138_p12 = scmp.lt.s32.totalorder %s6799_s0, %s6857_s13 }
 0xa76   : > { %p5139_p13 = scmp.lt.s32.totalorder %s5137_s1, %s5133_s22 }
 0xa77   : > { %p5135_p10 = pnand %p5134_p9, %p5375_p5 }
 0xa78   : > { %p5140_p0 = por %p5139_p13, %p5138_p12 }
 0xa79   : > { %p5136_p11 = pneg %p5135_p10 }
 0xa7b   : > { %p5141_p1 = pnand %p5140_p0, %p5136_p11 }
 0xa7d   : > { %5144 = shalt.err (!%p5141_p1)
}
 0xa7e   : > { %4710 = dma.vmem_to_hbm [thread:$0]  (%p5375_p5), %s6801_s23, 32, %s6799_s0, %s4198_s29   ;;  %v4709_v55 = vpop.f32.mrf.mxu1 }
 0xa7f PF: > { %p4716_p2 = scmp.ge.s32.totalorder %s5187_s28, 2  ;;  %s4223_s21 = sand.u32 1, %s5175_s25  }
 0xa80   : > { %s4224_s15 = scalar_lea.sflag [#allocation9], %s4223_s21 }
 0xa81   : > { %p4713_p3 = pnand %p4716_p2, %p5379_p6 }
 0xa83   : > { %p4714_p4 = pneg %p4713_p3 }
 0xa85   : > { %5170 = dma.done.wait (%p4714_p4), %s4224_s15, 32  }
 0xa86   : > { %5172 = vsyncadd (%p4714_p4), %s4224_s15, 4294967264  ;;  %s6956_s18 = sld [smem:[#allocation11_spill]]  ;;  %p23_p7 = scmp.ge.s32.totalorder %s5362_s14, 4  }
 0xa87   : > { %s6957_s25 = smov %s5179_s26  ;;  %s6958_s26 = smov %s5183_s27 }
 0xa88   : > { %s6960_s28 = smov %s5362_s14  ;;  %25 = sbr.rel (!%p23_p7) target bundleno = 8 (0x8), region = 151 }
 0xa8c   : > { %s6959_s27 = smov %s6956_s18 }
 0xa8d   :  { %4229 = vsyncpa [#allocation9], 1 }
 0xa8e   :  { %4231 = vsyncpa [#allocation9 + $0x1], 1 }

</bundles_post_ra>
